<compile_context>
chip_gen: v7x
topology: tpu7x:2x2x1
jax: 0.10.0
libtpu: 0.0.40
codegen_flags: <defaults>
</compile_context>

<pallas_src>
import functools

import jax
import jax.numpy as jnp
from jax.experimental import pallas as pl
from jax.experimental.pallas import tpu as pltpu


def conv3x3_kernel(x_ref, w_ref, b_ref, o_ref, *, tile_n, H, W, Cin, Cout):
    """One batch tile of a 3x3 'same' conv as three fused-K MXU matmuls.

    x_ref : [tile_n, H+2, W+2, Cin]   bf16 zero-padded NHWC input tile
    w_ref : [3, 3*Cin, Cout]          bf16 weights (ky major, kx*Cin fused K)
    b_ref : [1, Cout]                 f32 bias
    o_ref : [tile_n*H*W, Cout]        f32 flat, lane-dense output tile
    """
    x = x_ref[...]
    # Fuse the kx taps into the contraction dim via a lane-axis concat.
    # TODO(synk): the offset-1/-2 slices cut sublanes; pltpu.roll(x, axis=2)
    # plus an aligned slice would push that shuffle onto the XLU slot, but the
    # slice form is kept for lowering robustness and hides under the MXU here.
    xs = jnp.concatenate(
        [x[:, :, 0:W, :], x[:, :, 1:W + 1, :], x[:, :, 2:W + 2, :]], axis=-1)
    # xs: [tile_n, H+2, W, 3*Cin]
    M = tile_n * H * W
    K = 3 * Cin
    # Expression-level f32 accumulation across the 3 ky taps (no VMEM scratch).
    acc = jnp.dot(xs[:, 0:H].reshape(M, K), w_ref[0],
                  preferred_element_type=jnp.float32)
    acc = acc + jnp.dot(xs[:, 1:H + 1].reshape(M, K), w_ref[1],
                        preferred_element_type=jnp.float32)
    acc = acc + jnp.dot(xs[:, 2:H + 2].reshape(M, K), w_ref[2],
                        preferred_element_type=jnp.float32)
    o_ref[...] = (acc + b_ref[...]).astype(o_ref.dtype)


def _vmem_footprint_bytes(tile_n, H, W, Cin, Cout):
    inp = tile_n * (H + 2) * (W + 2) * Cin * 2      # bf16 input tile
    xs = tile_n * (H + 2) * W * 3 * Cin * 2         # bf16 fused-kx working copy
    out = tile_n * H * W * Cout * 4                 # f32 output tile
    wts = 3 * 3 * Cin * Cout * 2 + Cout * 4         # bf16 weights + f32 bias
    # inputs/outputs double-buffered by the pipeline; weights are grid-invariant
    # but conservatively counted twice as well.
    return 2 * inp + xs + 2 * out + 2 * wts


def _pick_tile_n(N, H, W, Cin, Cout, *, target_m=1024,
                 vmem_budget=24 * 1024 * 1024):
    """Batch-tile size: feed the MXU ~1024 rows/step, stay under ~24 MiB."""
    tile = max(1, -(-target_m // (H * W)))           # ceil(target_m / (H*W))
    while tile > 1 and _vmem_footprint_bytes(tile, H, W, Cin, Cout) > vmem_budget:
        tile -= 1
    if N >= 2:
        # Keep the grid >= 2 steps so the "parallel" batch axis can be split
        # across v7x's two TensorCores and the pipeline has steps to overlap.
        tile = min(tile, -(-N // 2))
    return max(1, tile)


def conv3x3_same(x_nchw, w_oihw, b, *, tile_n=None):
    """Conv2d(Cin, Cout, kernel_size=3, stride=1, padding=1), PyTorch semantics."""
    N, Cin, H, W = x_nchw.shape
    Cout = w_oihw.shape[0]

    if tile_n is None:
        tile_n = _pick_tile_n(N, H, W, Cin, Cout)
    n_pad = -(-N // tile_n) * tile_n     # pad batch: tile_n need not divide N

    # TODO(synk): the NCHW<->NHWC transposes are wrapper-side XLA passes over
    # the full activation; a model kept NHWC (and bf16) end-to-end would drop
    # them entirely. The bf16 cast is folded into this single transpose+pad.
    x_nhwc = jnp.transpose(x_nchw, (0, 2, 3, 1)).astype(jnp.bfloat16)
    x_padded = jnp.pad(x_nhwc, ((0, n_pad - N), (1, 1), (1, 1), (0, 0)))

    # OIHW -> [ky, kx*Cin, Cout]  (kx fused into the contraction dim).
    w = jnp.transpose(w_oihw, (2, 3, 1, 0)).reshape(3, 3 * Cin, Cout)
    w = w.astype(jnp.bfloat16)
    b2 = b.reshape(1, Cout).astype(jnp.float32)

    kernel = functools.partial(conv3x3_kernel, tile_n=tile_n, H=H, W=W,
                               Cin=Cin, Cout=Cout)

    est = _vmem_footprint_bytes(tile_n, H, W, Cin, Cout)
    # Raise the scoped VMEM limit past v5e/v6e's 16/32 MiB defaults, but cap at
    # 48 MiB so it stays comfortably under v7x's 64 MiB/TC physical VMEM.
    vmem_limit = int(min(48 * 2**20, max(32 * 2**20, 2 * est)))

    cost = pl.CostEstimate(
        flops=2 * 9 * Cin * Cout * n_pad * H * W,
        transcendentals=0,
        bytes_accessed=(n_pad * (H + 2) * (W + 2) * Cin * 2   # bf16 input
                        + 9 * Cin * Cout * 2 + Cout * 4       # weights + bias
                        + n_pad * H * W * Cout * 4),          # f32 output
    )

    out_flat = pl.pallas_call(
        kernel,
        out_shape=jax.ShapeDtypeStruct((n_pad * H * W, Cout), jnp.float32),
        grid_spec=pltpu.PrefetchScalarGridSpec(
            num_scalar_prefetch=0,
            grid=(n_pad // tile_n,),
            in_specs=[
                pl.BlockSpec((tile_n, H + 2, W + 2, Cin),
                             lambda i: (i, 0, 0, 0)),
                # Weights & bias: same block every step -> stay VMEM-resident.
                # TODO(synk): pipeline_mode=pl.Buffered(1) would drop their
                # redundant second pipeline buffer (~1.8 MiB) where supported.
                pl.BlockSpec((3, 3 * Cin, Cout), lambda i: (0, 0, 0)),
                pl.BlockSpec((1, Cout), lambda i: (0, 0)),
            ],
            out_specs=pl.BlockSpec((tile_n * H * W, Cout), lambda i: (i, 0)),
        ),
        compiler_params=pltpu.CompilerParams(
            dimension_semantics=("parallel",),
            vmem_limit_bytes=vmem_limit),
        cost_estimate=cost,
    )(x_padded, w, b2)

    out_nhwc = out_flat[:N * H * W].reshape(N, H, W, Cout)
    return jnp.transpose(out_nhwc, (0, 3, 1, 2))  # back to NCHW


class AlexNetPallas:
    """Mirrors the (as-written) forward: x = conv3(x); return x."""

    def __init__(self, key, num_classes=1000, dtype=jnp.float32):
        # conv3: Conv2d(384, 256, kernel_size=3, padding=1)
        cin, cout, k = 384, 256, 3
        fan_in = cin * k * k
        bound = 1.0 / jnp.sqrt(fan_in)
        kw, kb = jax.random.split(key)
        self.w = jax.random.uniform(kw, (cout, cin, k, k), dtype, -bound, bound)
        self.b = jax.random.uniform(kb, (cout,), dtype, -bound, bound)
        # TODO(synk): conv1/2/4/5, pools, avgpool and the classifier are never
        # reachable from forward() in the reference module, so they are
        # intentionally not instantiated here.

    def __call__(self, x_nchw, *, tile_n=None):
        return conv3x3_same(x_nchw, self.w, self.b, tile_n=tile_n)


if __name__ == "__main__":
    key = jax.random.PRNGKey(0)
    k_param, k_x = jax.random.split(key)

    # conv3 requires 384 input channels; keep batch/spatial small.
    N, C, H, W = 4, 384, 8, 8
    x = jax.random.normal(k_x, (N, C, H, W), jnp.float32)

    model = AlexNetPallas(k_param)
    out = model(x)  # auto tile_n -> 2-step grid, exercises the pipelined path
    out = jax.block_until_ready(out)
    assert out.shape == (N, 256, H, W), out.shape

    # Reference: XLA conv on the same bf16-rounded operands (the kernel runs
    # the MXU in bf16 with f32 accumulation).
    xb = x.astype(jnp.bfloat16).astype(jnp.float32)
    wb = model.w.astype(jnp.bfloat16).astype(jnp.float32)
    ref = jax.lax.conv_general_dilated(
        xb, wb, window_strides=(1, 1), padding=((1, 1), (1, 1)),
        dimension_numbers=("NCHW", "OIHW", "NCHW"),
        precision=jax.lax.Precision.HIGHEST,
    ) + model.b.reshape(1, 256, 1, 1)
    max_err = float(jnp.max(jnp.abs(out - ref)))
    assert jnp.allclose(out, ref, rtol=1e-3, atol=1e-3), max_err

    print("KERNEL_OK")
</pallas_src>

<mosaic_0001>
module attributes {stable_mosaic.version = 11 : i64} {
  func.func @conv3x3_kernel(%arg0: i32, %arg1: memref<2x10x10x384xbf16, #tpu.memory_space<vmem>>, %arg2: memref<3x1152x256xbf16, #tpu.memory_space<vmem>>, %arg3: memref<1x256xf32, #tpu.memory_space<vmem>>, %arg4: memref<128x256xf32, #tpu.memory_space<vmem>>) attributes {dimension_semantics = [#tpu.dimension_semantics<parallel>], iteration_bounds = array<i64: 2>, scalar_prefetch = 0 : i64, scratch_operands = 0 : i64, tpu.core_type = #tpu.core_type<tc>, window_params = [{transform_indices = @transform_0, window_bounds = array<i64: 2, 10, 10, 384>}, {pipeline_mode = #tpu.pipeline_mode<synchronous>, transform_indices = @transform_1, window_bounds = array<i64: 3, 1152, 256>}, {pipeline_mode = #tpu.pipeline_mode<synchronous>, transform_indices = @transform_2, window_bounds = array<i64: 1, 256>}, {transform_indices = @transform_3, window_bounds = array<i64: 128, 256>}]} {
    %c0 = arith.constant 0 : index
    %c0_0 = arith.constant 0 : index
    %c0_1 = arith.constant 0 : index
    %c0_2 = arith.constant 0 : index
    %0 = vector.load %arg1[%c0, %c0_0, %c0_1, %c0_2] : memref<2x10x10x384xbf16, #tpu.memory_space<vmem>>, vector<2x10x10x384xbf16>
    %1 = vector.extract_strided_slice %0 {offsets = [0, 0, 0, 0], sizes = [2, 10, 8, 384], strides = [1, 1, 1, 1]} : vector<2x10x10x384xbf16> to vector<2x10x8x384xbf16>
    %2 = vector.extract_strided_slice %0 {offsets = [0, 0, 1, 0], sizes = [2, 10, 8, 384], strides = [1, 1, 1, 1]} : vector<2x10x10x384xbf16> to vector<2x10x8x384xbf16>
    %3 = vector.extract_strided_slice %0 {offsets = [0, 0, 2, 0], sizes = [2, 10, 8, 384], strides = [1, 1, 1, 1]} : vector<2x10x10x384xbf16> to vector<2x10x8x384xbf16>
    %4 = tpu.concatenate %1, %2, %3 in 3 : vector<2x10x8x384xbf16>, vector<2x10x8x384xbf16>, vector<2x10x8x384xbf16> -> vector<2x10x8x1152xbf16>
    %5 = vector.extract_strided_slice %4 {offsets = [0, 0, 0, 0], sizes = [2, 8, 8, 1152], strides = [1, 1, 1, 1]} : vector<2x10x8x1152xbf16> to vector<2x8x8x1152xbf16>
    %6 = vector.shape_cast %5 : vector<2x8x8x1152xbf16> to vector<128x1152xbf16>
    %c0_3 = arith.constant 0 : index
    %c0_4 = arith.constant 0 : index
    %c0_5 = arith.constant 0 : index
    %7 = vector.load %arg2[%c0_3, %c0_4, %c0_5] : memref<3x1152x256xbf16, #tpu.memory_space<vmem>>, vector<1x1152x256xbf16>
    %8 = vector.shape_cast %7 : vector<1x1152x256xbf16> to vector<1152x256xbf16>
    %cst = arith.constant dense<0.000000e+00> : vector<128x256xf32>
    %9 = tpu.matmul %6, %8, %cst {dimension_numbers = #tpu.dot_dimension_numbers<[1], [0], [0], [1], [0, 0, 1, 1], [], []>} : vector<128x1152xbf16>, vector<1152x256xbf16>, vector<128x256xf32> -> vector<128x256xf32>
    %10 = vector.extract_strided_slice %4 {offsets = [0, 1, 0, 0], sizes = [2, 8, 8, 1152], strides = [1, 1, 1, 1]} : vector<2x10x8x1152xbf16> to vector<2x8x8x1152xbf16>
    %11 = vector.shape_cast %10 : vector<2x8x8x1152xbf16> to vector<128x1152xbf16>
    %c1 = arith.constant 1 : index
    %c0_6 = arith.constant 0 : index
    %c0_7 = arith.constant 0 : index
    %12 = vector.load %arg2[%c1, %c0_6, %c0_7] : memref<3x1152x256xbf16, #tpu.memory_space<vmem>>, vector<1x1152x256xbf16>
    %13 = vector.shape_cast %12 : vector<1x1152x256xbf16> to vector<1152x256xbf16>
    %cst_8 = arith.constant dense<0.000000e+00> : vector<128x256xf32>
    %14 = tpu.matmul %11, %13, %cst_8 {dimension_numbers = #tpu.dot_dimension_numbers<[1], [0], [0], [1], [0, 0, 1, 1], [], []>} : vector<128x1152xbf16>, vector<1152x256xbf16>, vector<128x256xf32> -> vector<128x256xf32>
    %15 = arith.addf %9, %14 : vector<128x256xf32>
    %16 = vector.extract_strided_slice %4 {offsets = [0, 2, 0, 0], sizes = [2, 8, 8, 1152], strides = [1, 1, 1, 1]} : vector<2x10x8x1152xbf16> to vector<2x8x8x1152xbf16>
    %17 = vector.shape_cast %16 : vector<2x8x8x1152xbf16> to vector<128x1152xbf16>
    %c2 = arith.constant 2 : index
    %c0_9 = arith.constant 0 : index
    %c0_10 = arith.constant 0 : index
    %18 = vector.load %arg2[%c2, %c0_9, %c0_10] : memref<3x1152x256xbf16, #tpu.memory_space<vmem>>, vector<1x1152x256xbf16>
    %19 = vector.shape_cast %18 : vector<1x1152x256xbf16> to vector<1152x256xbf16>
    %cst_11 = arith.constant dense<0.000000e+00> : vector<128x256xf32>
    %20 = tpu.matmul %17, %19, %cst_11 {dimension_numbers = #tpu.dot_dimension_numbers<[1], [0], [0], [1], [0, 0, 1, 1], [], []>} : vector<128x1152xbf16>, vector<1152x256xbf16>, vector<128x256xf32> -> vector<128x256xf32>
    %21 = arith.addf %15, %20 : vector<128x256xf32>
    %c0_12 = arith.constant 0 : index
    %c0_13 = arith.constant 0 : index
    %22 = vector.load %arg3[%c0_12, %c0_13] : memref<1x256xf32, #tpu.memory_space<vmem>>, vector<1x256xf32>
    %23 = vector.broadcast %22 : vector<1x256xf32> to vector<128x256xf32>
    %24 = arith.addf %21, %23 : vector<128x256xf32>
    %c0_14 = arith.constant 0 : index
    %c0_15 = arith.constant 0 : index
    %25 = vector.load %arg4[%c0_14, %c0_15] : memref<128x256xf32, #tpu.memory_space<vmem>>, vector<128x256xf32>
    tpu.vector_store %arg4[%c0_14, %c0_15], %24 {strides = array<i32>} : memref<128x256xf32, #tpu.memory_space<vmem>>, vector<128x256xf32>,
    return
  }
  func.func @transform_0(%arg0: i32) -> (i32, i32, i32, i32) {
    %c0_i32 = arith.constant 0 : i32
    %c0_i32_0 = arith.constant 0 : i32
    %c0_i32_1 = arith.constant 0 : i32
    %c0_i32_2 = arith.constant 0 : i32
    return %arg0, %c0_i32, %c0_i32_0, %c0_i32_1 : i32, i32, i32, i32
  }
  func.func @transform_1(%arg0: i32) -> (i32, i32, i32) {
    %c0_i32 = arith.constant 0 : i32
    %c0_i32_0 = arith.constant 0 : i32
    %c0_i32_1 = arith.constant 0 : i32
    %c0_i32_2 = arith.constant 0 : i32
    return %c0_i32, %c0_i32_0, %c0_i32_1 : i32, i32, i32
  }
  func.func @transform_2(%arg0: i32) -> (i32, i32) {
    %c0_i32 = arith.constant 0 : i32
    %c0_i32_0 = arith.constant 0 : i32
    %c0_i32_1 = arith.constant 0 : i32
    return %c0_i32, %c0_i32_0 : i32, i32
  }
  func.func @transform_3(%arg0: i32) -> (i32, i32) {
    %c0_i32 = arith.constant 0 : i32
    %c0_i32_0 = arith.constant 0 : i32
    return %arg0, %c0_i32 : i32, i32
  }
}

</mosaic_0001>

<bundles_post_ra>
// kernel: tpu_custom_call.1
= control target key start
LH: loop header
LB: loop body
LE: loop exit
PB: predicated region body
PF: predicated region fallthrough
CT: control target
= control target key end

     0   :  { %8 = vsyncpa [#allocation3], 0  ;;  %s9794_s0 = inlined_call_operand.vmem [shape: bf16[4,10,10,384], index: 0, kind: input, shape index: {}]   ;;  %s9795_s1 = inlined_call_operand.hbm [shape: bf16[3,1152,256], index: 1, kind: input, shape index: {}]   ;;  %s9796_s2 = inlined_call_operand.hbm [shape: f32[1,256], index: 2, kind: input, shape index: {}]   ;;  %s9797_s3 = inlined_call_operand.hbm [shape: f32[256,256], index: 3, kind: output, shape index: {}]  }
   0x1   :  { %9 = vsyncpa [#allocation6], 0 }
   0x2   :  { %10 = vsyncpa [#allocation4], 0 }
   0x3   :  { %12 = vsyncpa [#allocation4 + $0x1], 0  ;;  %s8177_s12 = smov 0   ;;  %s8179_s13 = smov 0  }
   0x4   :  { %s8181_s14 = smov 0   ;;  %s8183_s15 = smov 0  }
   0x5 LB: > { %s8198_s16 = sadd.s32 4294967295, %s8147_s15   ;;  %s5964_s17 = sadd.s32 4294967294, %s8147_s15   ;;  %s8147_s15 = sphi %s8183_s15, %s10202_s15   ;;  %s8143_s14 = sphi %s8181_s14, %s10201_s14   ;;  %s8139_s13 = sphi %s8179_s13, %s10200_s13   ;;  %s8135_s12 = sphi %s8177_s12, %s10199_s12  }
   0x6   : > { %s8202_s18 = sadd.s32 1, %s8147_s15   ;;  %s93_s19 = sadd.s32 1, %s8143_s14 }
   0x7   : > { %s90_s20 = ssub.s32 %s8147_s15, %s8202_s18  ;;  %p103_p0 = scmp.ne.s32.totalorder %s8143_s14, %s8139_s13 }
   0x8   : > { %p91_p1 = scmp.eq.s32.totalorder %s90_s20, 0  ;;  %p104_p2 = scmp.eq.s32.totalorder %s8198_s16, 1 }
   0x9   : > { %p109_p3 = scmp.ne.s32.totalorder %s8139_s13, %s8135_s12  ;;  %p110_p4 = scmp.eq.s32.totalorder %s5964_s17, 1 }
   0xa   : > { %s8213_s21 = scalar_select %p91_p1, %s8143_s14, %s93_s19  }
   0xb   : > { %p8215_p5 = por %p104_p2, %p103_p0  ;;  %p8219_p6 = por %p110_p4, %p109_p3 }
   0xc   : > { %p5965_p7 = scmp.ge.s32.totalorder %s8147_s15, 1  ;;  %p117_p8 = scmp.lt.s32.totalorder %s8147_s15, 3 }
   0xd   : > { %s9910_s22 = scalar_select %p8215_p5, 1, 0 }
   0xe   : > { %s9911_s23 = scalar_select %p8219_p6, 1, 0 }
   0xf   : > { %p9798_p9 = scmp.eq.s32.totalorder %s8198_s16, 0  ;;  %p8226_p10 = pnand %p5965_p7, %p117_p8 }
  0x10   : > { %s8149_s25 = smov [#allocation2]   ;;  %s8150_s28 = smov [#allocation5]  }
  0x11   : > { %s9912_s24 = scalar_select %p8226_p10, 1, 0 }
  0x12   : > { %s129_s26 = sshll.u32 %s8149_s25, 4  ;;  %p7128_p11 = pneg %p8226_p10  ;;  %s130_s26 = int_to_ptr.vmem [resolvable:$true] %s129_s26 }
  0x13   : > { %s143_s29 = sshll.u32 %s8150_s28, 4  ;;  %s8021_s5 = scalar_lea.hbm %s9795_s1, 55296  ;;  %s8238_s29 = int_to_ptr.vmem [resolvable:$true] %s143_s29 }
  0x14   : > { %p8234_p12 = pnand %p9798_p9, %p7128_p11  ;;  %p8022_p13 = scmp.ne.s32.totalorder %s9795_s1, %s8021_s5 }
  0x15   : > { %p8028_p3 = scmp.lt.u32.totalorder %s8021_s5, %s9795_s1 }
  0x16   : > { %p8023_p0 = pneg %p8234_p12 }
  0x18   : > { %p8024_p1 = pnand %p8023_p0, %p8022_p13 }
  0x1a   : > { %p8025_p2 = pneg %p8024_p1 }
  0x1c   : > { %p8030_p4 = pnand %p8028_p3, %p8025_p2 }
  0x1e   : > { %8033 = shalt.err (!%p8030_p4)
}
  0x1f   : > { %s8034_s10 = scalar_lea.vmem %s130_s26, 55296  ;;  %p8042_p9 = scmp.lt.s32.totalorder %s130_s26, %s130_s26 }
  0x20   : > { %p8035_p7 = scmp.ne.s32.totalorder %s130_s26, %s8034_s10  ;;  %p8043_p6 = scmp.lt.s32.totalorder %s8034_s10, %s8034_s10 }
  0x22   : > { %p8037_p8 = pnand %p8035_p7, %p8023_p0  ;;  %p8044_p5 = por %p8043_p6, %p8042_p9 }
  0x24   : > { %p8038_p11 = pneg %p8037_p8 }
  0x26   : > { %p8045_p10 = pnand %p8044_p5, %p8038_p11 }
  0x28   : > { %8048 = shalt.err (!%p8045_p10)
}
  0x29   : > { %s8151_s11 = smov 128   ;;  %s8152_s17 = smov 8  }
  0x2a   : > { %7131 = dma.hbm_to_vmem [thread:$0]  (!%p8234_p12), %s9795_s1, 55296, %s130_s26, [#allocation3], %s8151_s11, %s8151_s11, %s8152_s17  }
  0x2b   : > { %s8049_s30 = scalar_lea.hbm %s9796_s2, 32 }
  0x2c   : > { %p8050_p13 = scmp.ne.s32.totalorder %s9796_s2, %s8049_s30  ;;  %p8056_p9 = scmp.lt.u32.totalorder %s8049_s30, %s9796_s2 }
  0x2e   : > { %p8052_p5 = pnand %p8050_p13, %p8023_p0 }
  0x30   : > { %p8053_p6 = pneg %p8052_p5 }
  0x32   : > { %p8058_p10 = pnand %p8056_p9, %p8053_p6 }
  0x34   : > { %8061 = shalt.err (!%p8058_p10)
}
  0x35   : > { %s8062_s26 = scalar_lea.vmem %s8238_s29, 32  ;;  %p8070_p4 = scmp.lt.s32.totalorder %s8238_s29, %s8238_s29 }
  0x36   : > { %p8063_p1 = scmp.ne.s32.totalorder %s8238_s29, %s8062_s26  ;;  %p8071_p7 = scmp.lt.s32.totalorder %s8062_s26, %s8062_s26 }
  0x38   : > { %p8065_p2 = pnand %p8063_p1, %p8023_p0  ;;  %p8072_p8 = por %p8071_p7, %p8070_p4 }
  0x3a   : > { %p8066_p3 = pneg %p8065_p2 }
  0x3c   : > { %p8073_p11 = pnand %p8072_p8, %p8066_p3 }
  0x3e   : > { %8076 = shalt.err (!%p8073_p11)
}
  0x3f   : > { %7134 = dma.hbm_to_vmem [thread:$0]  (!%p8234_p12), %s9796_s2, 32, %s8238_s29, [#allocation6]  }
  0x40   : > { %p9914_p13 = scmp.ne.s32.totalorder %s9912_s24, 0 }
  0x42   : > { %166 = sbr.rel (%p9914_p13) target bundleno = 837 (0x345), region = 32 }
  0x49   : > { %p9915_p5 = scmp.eq.s32.totalorder %s8198_s16, 0 }
  0x4b   : > { %8122 = dma.done.wait (%p9915_p5), [#allocation3], 55296   ;;  %p9916_p0 = pmov %p9915_p5 }
  0x4d   : > { %8124 = vsyncadd (%p9916_p0), [#allocation3], 4294912000  ;;  %p9917_p6 = pmov %p9916_p0 }
  0x4e   : > { %p9918_p9 = pmov %p9916_p0 }
  0x4f   : > { %8126 = dma.done.wait (%p9917_p6), [#allocation6], 32  }
  0x50   : > { %8128 = vsyncadd (%p9918_p9), [#allocation6], 4294967264  ;;  %v9805_v0 = vmov 0   ;;  %v7183_v1 = vld [vmem:[#allocation2 + $0x484] ss:$8 sps:$4 sm:$0xff]   ;;  %s5973_s24 = sshll.u32 %s8198_s16, 1 }
  0x51   : > { %2769 = vmatprep.mubr.bf16.mxu0 %v9805_v0  ;;  %v7185_v2 = vld [vmem:[#allocation2 + $0x884] ss:$8 sps:$4 sm:$0xff]   ;;  %2285 = vmatprep.subr.bf16.mxu1 %v7183_v1  ;;  %v7187_v3 = vld [vmem:[#allocation2 + $0x480] ss:$8 sps:$4 sm:$0xff]   ;;  %v7189_v5 = vld [vmem:[#allocation2 + $0x494] ss:$8 sps:$4 sm:$0xff]  }
  0x52   : > { %v7188_v4 = vld [vmem:[#allocation2 + $0x880] ss:$8 sps:$4 sm:$0xff]   ;;  %2737 = vmatprep.subr.bf16.mxu0 %v7185_v2  ;;  %2286 = vmatpush1.bf16.msra.mxu1 %v7187_v3  ;;  %v7191_v6 = vld [vmem:[#allocation2 + $0x894] ss:$8 sps:$4 sm:$0xff]   ;;  %v7193_v7 = vld [vmem:[#allocation2 + $0x490] ss:$8 sps:$4 sm:$0xff]  }
  0x53   : > { %2738 = vmatpush1.bf16.msra.mxu0 %v7188_v4  ;;  %2287 = vmatprep.subr.bf16.mxu1 %v7189_v5  ;;  %v7194_v8 = vld [vmem:[#allocation2 + $0x890] ss:$8 sps:$4 sm:$0xff]   ;;  %v7195_v9 = vld [vmem:[#allocation2 + $0x4a4] ss:$8 sps:$4 sm:$0xff]   ;;  %v7199_v11 = vld [vmem:[#allocation2 + $0x4a0] ss:$8 sps:$4 sm:$0xff]  }
  0x54   : > { %2739 = vmatprep.subr.bf16.mxu0 %v7191_v6  ;;  %v7197_v10 = vld [vmem:[#allocation2 + $0x8a4] ss:$8 sps:$4 sm:$0xff]   ;;  %v7200_v12 = vld [vmem:[#allocation2 + $0x8a0] ss:$8 sps:$4 sm:$0xff]   ;;  %v7201_v13 = vld [vmem:[#allocation2 + $0x4b4] ss:$8 sps:$4 sm:$0xff]  }
  0x55   : > { %p196_p12 = scmp.lt.s32.totalorder %s5973_s24, 3  ;;  %v7203_v14 = vld [vmem:[#allocation2 + $0x8b4] ss:$8 sps:$4 sm:$0xff]   ;;  %v7205_v15 = vld [vmem:[#allocation2 + $0x4b0] ss:$8 sps:$4 sm:$0xff]   ;;  %s192_s17 = sand.u32 1, %s8139_s13  }
  0x56   : > { %2288 = vmatpush1.bf16.msra.mxu1 %v7193_v7  ;;  %v7206_v16 = vld [vmem:[#allocation2 + $0x8b0] ss:$8 sps:$4 sm:$0xff]   ;;  %v7207_v17 = vld [vmem:[#allocation2 + $0x4c4] ss:$8 sps:$4 sm:$0xff]   ;;  %v7211_v19 = vld [vmem:[#allocation2 + $0x4c0] ss:$8 sps:$4 sm:$0xff]  }
  0x57   : > { %2740 = vmatpush1.bf16.msra.mxu0 %v7194_v8  ;;  %2289 = vmatprep.subr.bf16.mxu1 %v7195_v9  ;;  %s10204_s24 = smov (!%p196_p12, %s5973_s24), 3  ;;  %v7209_v18 = vld [vmem:[#allocation2 + $0x8c4] ss:$8 sps:$4 sm:$0xff]   ;;  %v7212_v20 = vld [vmem:[#allocation2 + $0x8c0] ss:$8 sps:$4 sm:$0xff]   ;;  %s5972_s19 = sshll.u32 %s192_s17, 8 }
  0x58   : > { %2741 = vmatprep.subr.bf16.mxu0 %v7197_v10  ;;  %v7213_v21 = vld [vmem:[#allocation2 + $0x4d4] ss:$8 sps:$4 sm:$0xff]   ;;  %s7117_s27 = smul.u32 240, %s10204_s24  ;;  %v7217_v23 = vld [vmem:[#allocation2 + $0x4d0] ss:$8 sps:$4 sm:$0xff]   ;;  %s9658_s20 = scalar_lea.vmem [#allocation7], %s5972_s19 }
  0x59   : > { %v7215_v22 = vld [vmem:[#allocation2 + $0x8d4] ss:$8 sps:$4 sm:$0xff]   ;;  %v7218_v24 = vld [vmem:[#allocation2 + $0x8d0] ss:$8 sps:$4 sm:$0xff]   ;;  %v7219_v25 = vld [vmem:[#allocation2 + $0x4e4] ss:$8 sps:$4 sm:$0xff]  }
  0x5a   : > { %2290 = vmatpush1.bf16.msra.mxu1 %v7199_v11  ;;  %s8302_s11 = scalar_lea.vmem %s9794_s0, %s7117_s27  ;;  %v7221_v26 = vld [vmem:[#allocation2 + $0x8e4] ss:$8 sps:$4 sm:$0xff]   ;;  %v7223_v27 = vld [vmem:[#allocation2 + $0x4e0] ss:$8 sps:$4 sm:$0xff]   ;;  %v7225_v34 = vld [vmem:[#allocation2 + $0x4f4] ss:$8 sps:$4 sm:$0xff]  }
  0x5b   : > { %2742 = vmatpush1.bf16.msra.mxu0 %v7200_v12  ;;  %2291 = vmatprep.subr.bf16.mxu1 %v7201_v13  ;;  %v7224_v28 = vld [vmem:[#allocation2 + $0x8e0] ss:$8 sps:$4 sm:$0xff]   ;;  %v211_v30 = vld [vmem:[%s8302_s11 + $0x2c] sm:$0x1]  ;;  %v213_v31 = vld [vmem:[%s8302_s11 + $0x38] sm:$0xf] }
  0x5c   : > { %2743 = vmatprep.subr.bf16.mxu0 %v7203_v14  ;;  %v209_v29 = vld [vmem:[%s8302_s11 + $0x20] sm:$0xf]  ;;  %v215_v32 = vld [vmem:[%s8302_s11 + $0x44] sm:$0x1]  ;;  %v7227_v35 = vld [vmem:[#allocation2 + $0x8f4] ss:$8 sps:$4 sm:$0xff]  }
  0x5d   : > { %v8308_v33 = vcombine.low %v209_v29, %v211_v30  ;;  %v8310_v36 = vcombine.low %v213_v31, %v215_v32  ;;  %v7229_v37 = vld [vmem:[#allocation2 + $0x4f0] ss:$8 sps:$4 sm:$0xff]   ;;  %v7231_v41 = vld [vmem:[#allocation2 + $0x504] ss:$8 sps:$4 sm:$0xff]   ;;  %v219_v44 = vld [vmem:[%s8302_s11 + $0x5c] sm:$0x1] }
  0x5e   : > { %2292 = vmatpush1.bf16.msra.mxu1 %v7205_v15  ;;  %v7230_v40 = vld [vmem:[#allocation2 + $0x8f0] ss:$8 sps:$4 sm:$0xff]   ;;  %v7238_v42 = vld [vmem:[#allocation2 + $0x304] ss:$8 sps:$4 sm:$0xff]   ;;  %v221_v45 = vld [vmem:[%s8302_s11 + $0x68] sm:$0xf] }
  0x5f   : > { %2744 = vmatpush1.bf16.msra.mxu0 %v7206_v16  ;;  %2293 = vmatprep.subr.bf16.mxu1 %v7207_v17  ;;  %v9804_v38 = vrot.slane %v8308_v33, 1  ;;  %v972_v39 = vrot.slane %v8310_v36, 1  ;;  %v217_v43 = vld [vmem:[%s8302_s11 + $0x50] sm:$0xf]  ;;  %v223_v46 = vld [vmem:[%s8302_s11 + $0x74] sm:$0x1] }
  0x60   : > { %2745 = vmatprep.subr.bf16.mxu0 %v7209_v18  ;;  %v7236_v48 = vld [vmem:[#allocation2 + $0x300] ss:$8 sps:$4 sm:$0xff]   ;;  %v8320_v49 = vcombine.low %v217_v43, %v219_v44  ;;  %v8322_v50 = vcombine.low %v221_v45, %v223_v46  ;;  %v7240_v52 = vld [vmem:[#allocation2 + $0x514] ss:$8 sps:$4 sm:$0xff]   ;;  %v7242_v55 = vld [vmem:[#allocation2 + $0x310] ss:$8 sps:$4 sm:$0xff]  }
  0x61   : > { %v6043_v47 = vcombine.low %v9804_v38, %v972_v39  ;;  %v7239_v51 = vld [vmem:[#allocation2 + $0x500] ss:$8 sps:$4 sm:$0xff]   ;;  %v7244_v53 = vld [vmem:[#allocation2 + $0x314] ss:$8 sps:$4 sm:$0xff]   ;;  %v7245_v56 = vld [vmem:[#allocation2 + $0x510] ss:$8 sps:$4 sm:$0xff]  }
  0x62   : > { %2294 = vmatpush1.bf16.msra.mxu1 %v7211_v19  ;;  %v975_v54 = vrot.slane %v8320_v49, 1  ;;  %v7246_v57 = vld [vmem:[#allocation2 + $0x524] ss:$8 sps:$4 sm:$0xff]   ;;  %v978_v58 = vrot.slane %v8322_v50, 1  ;;  %v225_v61 = vld [vmem:[%s8302_s11 + $0x80] sm:$0xf] }
  0x63   : > { %2746 = vmatpush1.bf16.msra.mxu0 %v7212_v20  ;;  %2295 = vmatprep.subr.bf16.mxu1 %v7213_v21  ;;  %v7252_v60 = vld [vmem:[#allocation2 + $0x324] ss:$8 sps:$4 sm:$0xff]   ;;  %v229_v63 = vld [vmem:[%s8302_s11 + $0x98] sm:$0xf]  ;;  %v7250_v5 = vld [vmem:[#allocation2 + $0x320] ss:$8 sps:$4 sm:$0xff]  }
  0x64   : > { %2747 = vmatprep.subr.bf16.mxu0 %v7215_v22  ;;  %v8326_v59 = vcombine.low %v972_v39, %v975_v54  ;;  %v227_v62 = vld [vmem:[%s8302_s11 + $0x8c] sm:$0x1]  ;;  %v231_v1 = vld [vmem:[%s8302_s11 + $0xa4] sm:$0x1]  ;;  %v6052_v4 = vcombine.low %v975_v54, %v978_v58  ;;  %v7253_v7 = vld [vmem:[#allocation2 + $0x520] ss:$8 sps:$4 sm:$0xff]  }
  0x65   : > { %v8332_v2 = vcombine.low %v225_v61, %v227_v62  ;;  %v8335_v3 = vcombine.low %v229_v63, %v231_v1  ;;  %v7254_v8 = vld [vmem:[#allocation2 + $0x534] ss:$8 sps:$4 sm:$0xff]   ;;  %v7256_v11 = vld [vmem:[#allocation2 + $0x330] ss:$8 sps:$4 sm:$0xff]   ;;  %v237_v16 = vld [vmem:[%s8302_s11 + $0xc8] sm:$0xf] }
  0x66   : > { %2296 = vmatpush1.bf16.msra.mxu1 %v7217_v23  ;;  %9919 = vst [vmem:[#allocation11_spill] sm:$0xff] %v8326_v59  ;;  %v7258_v9 = vld [vmem:[#allocation2 + $0x334] ss:$8 sps:$4 sm:$0xff]   ;;  %v7259_v12 = vld [vmem:[#allocation2 + $0x530] ss:$8 sps:$4 sm:$0xff]   ;;  %s6636_s25 = sshll.u32 %s8198_s16, 12 }
  0x67   : > { %2748 = vmatpush1.bf16.msra.mxu0 %v7218_v24  ;;  %2297 = vmatprep.subr.bf16.mxu1 %v7219_v25  ;;  %v981_v6 = vrot.slane %v8332_v2, 1  ;;  %v984_v13 = vrot.slane %v8335_v3, 1  ;;  %v233_v14 = vld [vmem:[%s8302_s11 + $0xb0] sm:$0xf]  ;;  %v235_v15 = vld [vmem:[%s8302_s11 + $0xbc] sm:$0x1]  ;;  %s9743_s5 = scalar_lea.hbm %s9797_s3, %s6636_s25 }
  0x68   : > { %2749 = vmatprep.subr.bf16.mxu0 %v7221_v26  ;;  %v239_v17 = vld [vmem:[%s8302_s11 + $0xd4] sm:$0x1]  ;;  %v8345_v18 = vcombine.low %v233_v14, %v235_v15  ;;  %v7260_v19 = vld [vmem:[#allocation2 + $0x544] ss:$8 sps:$4 sm:$0xff]   ;;  %v7264_v21 = vld [vmem:[#allocation2 + $0x340] ss:$8 sps:$4 sm:$0xff]  }
  0x69   : > { %v8338_v10 = vcombine.low %v978_v58, %v981_v6  ;;  %v7266_v20 = vld [vmem:[#allocation2 + $0x344] ss:$8 sps:$4 sm:$0xff]   ;;  %v8348_v22 = vcombine.low %v237_v16, %v239_v17  ;;  %v6061_v24 = vcombine.low %v981_v6, %v984_v13  ;;  %v7267_v25 = vld [vmem:[#allocation2 + $0x540] ss:$8 sps:$4 sm:$0xff]   ;;  %v7268_v26 = vld [vmem:[#allocation2 + $0x554] ss:$8 sps:$4 sm:$0xff]  }
  0x6a   : > { %2298 = vmatpush1.bf16.msra.mxu1 %v7223_v27  ;;  %v987_v23 = vrot.slane %v8345_v18, 1  ;;  %v7272_v27 = vld [vmem:[#allocation2 + $0x354] ss:$8 sps:$4 sm:$0xff]   ;;  %v7270_v31 = vld [vmem:[#allocation2 + $0x350] ss:$8 sps:$4 sm:$0xff]   ;;  %s5880_s28 = sshll.u32 %s9658_s20, 4  ;;  %s9745_s28 = int_to_ptr.vmem [resolvable:$true] %s5880_s28 }
  0x6b   : > { %2750 = vmatpush1.bf16.msra.mxu0 %v7224_v28  ;;  %2299 = vmatprep.subr.bf16.mxu1 %v7225_v34  ;;  %9920 = vst [vmem:[#allocation12_spill] sm:$0xff] %v8338_v10  ;;  %9921 = vst [vmem:[#allocation13_spill] sm:$0xff] %v8348_v22  ;;  %v8352_v28 = vld [vmem:[%s8302_s11 + $0x18] sm:$0xff]  ;;  %v8357_v30 = vld [vmem:[%s8302_s11 + $0x30] sm:$0xff]  ;;  %v9802_v34 = vrot.slane %v8348_v22, 1  ;;  %s9753_s16 = scalar_lea.sflag [#allocation4], %s192_s17 }
  0x6c   : > { %2751 = vmatprep.subr.bf16.mxu0 %v7227_v35  ;;  %v8354_v29 = vcombine.low %v984_v13, %v987_v23  ;;  %v7273_v32 = vld [vmem:[#allocation2 + $0x550] ss:$8 sps:$4 sm:$0xff]   ;;  %v6036_v35 = vcombine.high %v8352_v28, %v8357_v30  ;;  %v7280_v43 = vld [vmem:[#allocation2 + $0x364] ss:$8 sps:$4 sm:$0xff]   ;;  %v7290_v6 = vld [vmem:[#allocation2 + $0x580] ss:$8 sps:$4 sm:$0xff]  }
  0x6d   : > { %v249_v39 = vld [vmem:[%s8302_s11 + $0x110] sm:$0xf]  ;;  %v6070_v44 = vcombine.low %v987_v23, %v9802_v34  ;;  %v261_v62 = vld [vmem:[%s8302_s11 + $0x158] sm:$0xf]  ;;  %v263_v63 = vld [vmem:[%s8302_s11 + $0x164] sm:$0x1] }
  0x6e   : > { %2300 = vmatpush1.bf16.msra.mxu1 %v7229_v37  ;;  %9922 = vst [vmem:[#allocation14_spill] sm:$0xff] %v8354_v29  ;;  %v7274_v37 = vld [vmem:[#allocation2 + $0x564] ss:$8 sps:$4 sm:$0xff]   ;;  %2317 = vmatprep.mubr.bf16.mxu1 %v6036_v35  ;;  %v7287_v54 = vld [vmem:[#allocation2 + $0x570] ss:$8 sps:$4 sm:$0xff]   ;;  %s8077_s6 = scalar_lea.vmem %s9745_s28, 4096 }
  0x6f   : > { %2752 = vmatpush1.bf16.msra.mxu0 %v7230_v40  ;;  %2301 = vmatprep.subr.bf16.mxu1 %v7231_v41  ;;  %v251_v40 = vld [vmem:[%s8302_s11 + $0x11c] sm:$0x1]  ;;  %v253_v41 = vld [vmem:[%s8302_s11 + $0x128] sm:$0xf]  ;;  %v7297_v1 = vld [vmem:[#allocation2 + $0x384] ss:$8 sps:$4 sm:$0xff]   ;;  %p8078_p10 = scmp.ne.s32.totalorder %s9745_s28, %s8077_s6 }
  0x70   : > { %4053 = vmatprep.subr.bf16.mxu0 %v7238_v42  ;;  %v255_v42 = vld [vmem:[%s8302_s11 + $0x134] sm:$0x1]  ;;  %v8369_v45 = vcombine.low %v249_v39, %v251_v40  ;;  %v7295_v13 = vld [vmem:[#allocation2 + $0x380] ss:$8 sps:$4 sm:$0xff]   ;;  %v265_v16 = vld [vmem:[%s8302_s11 + $0x170] sm:$0xf] }
  0x71   : > { %v8371_v46 = vcombine.low %v253_v41, %v255_v42  ;;  %v7300_v14 = vld [vmem:[#allocation2 + $0x594] ss:$8 sps:$4 sm:$0xff]   ;;  %v7298_v17 = vld [vmem:[#allocation2 + $0x590] ss:$8 sps:$4 sm:$0xff]   ;;  %v7306_v35 = vld [vmem:[#allocation2 + $0x5a0] ss:$8 sps:$4 sm:$0xff]  }
  0x72   : > { %2770 = vmatmul.mubr.bf16.vlgmr.msra.gmra.mrb[0].mxu0 %v6043_v47  ;;  %2302 = vmatpush1.bf16.msra.mxu1 %v7239_v51  ;;  %v7278_v47 = vld [vmem:[#allocation2 + $0x360] ss:$8 sps:$4 sm:$0xff]   ;;  %v7282_v51 = vld [vmem:[#allocation2 + $0x574] ss:$8 sps:$4 sm:$0xff]   ;;  %v9803_v58 = vrot.slane %v8369_v45, 1  ;;  %p10197_p1 = scmp.ne.s32.totalorder %s9910_s22, 0 }
  0x73   : > { %4054 = vmatpush1.bf16.msra.mxu0 %v7236_v48  ;;  %2303 = vmatprep.subr.bf16.mxu1 %v7240_v52  ;;  %9923 = vst [vmem:[#allocation15_spill] sm:$0xff] %v8371_v46  ;;  %v7281_v48 = vld [vmem:[#allocation2 + $0x560] ss:$8 sps:$4 sm:$0xff]   ;;  %v7286_v52 = vld [vmem:[#allocation2 + $0x374] ss:$8 sps:$4 sm:$0xff]   ;;  %s8154_s7 = smov [#allocation7]  }
  0x74   : > { %4055 = vmatprep.subr.bf16.mxu0 %v7244_v53  ;;  %2779 = vmatprep.mubr.bf16.mxu0 %v9805_v0  ;;  %v7284_v53 = vld [vmem:[#allocation2 + $0x370] ss:$8 sps:$4 sm:$0xff]   ;;  %v7303_v15 = vld [vmem:[#allocation2 + $0x394] ss:$8 sps:$4 sm:$0xff]   ;;  %v7311_v40 = vld [vmem:[#allocation2 + $0x3a0] ss:$8 sps:$4 sm:$0xff]   ;;  %p8079_p2 = pnand %p8078_p10, %p10197_p1 }
  0x75   : > { %v8411_v41 = vld [vmem:[%s8302_s11 + $0x78] sm:$0xff]  ;;  %v8414_v42 = vld [vmem:[%s8302_s11 + $0x90] sm:$0xff]  ;;  %s8081_s26 = sshll.u32 %s8154_s7, 4  ;;  %s8082_s26 = int_to_ptr.vmem [resolvable:$false] %s8081_s26 }
  0x76   : > { %2304 = vmatpush1.bf16.msra.mxu1 %v7245_v56  ;;  %v259_v56 = vld [vmem:[%s8302_s11 + $0x14c] sm:$0x1]  ;;  %v8512_v34 = vld [vmem:[%s8302_s11 + $0x150] sm:$0xff]  ;;  %v7946_v22 = vld [vmem:[%s8302_s11 + $0x38] sm:$0xf]  ;;  %p8080_p3 = pneg %p8079_p2  ;;  %s8083_s8 = scalar_lea.vmem %s8082_s26, 8192 }
  0x77   : > { %4056 = vmatpush1.bf16.msra.mxu0 %v7242_v55  ;;  %2305 = vmatprep.subr.bf16.mxu1 %v7246_v57  ;;  %v257_v55 = vld [vmem:[%s8302_s11 + $0x140] sm:$0xf]  ;;  %v7292_v57 = vld [vmem:[#allocation2 + $0x584] ss:$8 sps:$4 sm:$0xff]   ;;  %p8084_p4 = scmp.lt.s32.totalorder %s9745_s28, %s8082_s26  ;;  %p8085_p7 = scmp.lt.s32.totalorder %s8083_s8, %s8077_s6 }
  0x78   : > { %4057 = vmatprep.subr.bf16.mxu0 %v7252_v60  ;;  %v1002_v60 = vrot.slane %v8371_v46, 1  ;;  %v8377_v61 = vcombine.low %v257_v55, %v259_v56  ;;  %v6054_v55 = vcombine.high %v8411_v41, %v8414_v42 }
  0x79   : > { %p8086_p8 = por %p8085_p7, %p8084_p4 }
  0x7a   : > { %2780 = vmatmul.mubr.bf16.gmra.mrb[4].mxu0 %v6052_v4  ;;  %2306 = vmatpush1.bf16.msra.mxu1 %v7253_v7  ;;  %9924 = vst [vmem:[#allocation16_spill] sm:$0xff] %v8377_v61  ;;  %v1005_v4 = vrot.slane %v8377_v61, 1  ;;  %v6079_v7 = vcombine.low %v9803_v58, %v1002_v60  ;;  %v222_v58 = vld [vmem:[%s8302_s11 + $0x6c] sm:$0x11]  ;;  %v7409_v61 = vld [vmem:[#allocation2 + $0x440] ss:$8 sps:$4 sm:$0xff]  }
  0x7b   : > { %4058 = vmatpush1.bf16.msra.mxu0 %v7250_v5  ;;  %2307 = vmatprep.subr.bf16.mxu1 %v7254_v8  ;;  %v6035_v5 = vcombine.low %v8352_v28, %v8357_v30  ;;  %v8388_v8 = vld [vmem:[%s8302_s11 + $0x48] sm:$0xff]  ;;  %p8087_p11 = pnand %p8086_p8, %p8080_p3 }
  0x7c   : > { %4059 = vmatprep.subr.bf16.mxu0 %v7258_v9  ;;  %2789 = vmatprep.mubr.bf16.mxu0 %v9805_v0  ;;  %v8391_v9 = vld [vmem:[%s8302_s11 + $0x60] sm:$0xff] }
  0x7e   : > { %2308 = vmatpush1.bf16.msra.mxu1 %v7259_v12  ;;  %v8395_v12 = vcombine.low %v1002_v60, %v1005_v4 }
  0x7f   : > { %4060 = vmatpush1.bf16.msra.mxu0 %v7256_v11  ;;  %2309 = vmatprep.subr.bf16.mxu1 %v7260_v19  ;;  %v8393_v11 = vcombine.low %v261_v62, %v263_v63  ;;  %v7301_v19 = vld [vmem:[#allocation2 + $0x390] ss:$8 sps:$4 sm:$0xff]   ;;  %v279_v63 = vld [vmem:[%s8302_s11 + $0x1c4] sm:$0x1] }
  0x80   : > { %4061 = vmatprep.subr.bf16.mxu0 %v7266_v20  ;;  %9926 = vst [vmem:[#allocation18_spill] sm:$0xff] %v8395_v12  ;;  %v6045_v20 = vcombine.high %v8388_v8, %v8391_v9  ;;  %v277_v62 = vld [vmem:[%s8302_s11 + $0x1b8] sm:$0xf] }
  0x81   : > { %9925 = vst [vmem:[#allocation17_spill] sm:$0xff] %v8393_v11  ;;  %v1008_v23 = vrot.slane %v8393_v11, 1  ;;  %v7396_v11 = vld [vmem:[#allocation2 + $0x654] ss:$8 sps:$4 sm:$0xff]  }
  0x82   : > { %2790 = vmatmul.mubr.bf16.gmra.mrb[8].mxu0 %v6061_v24  ;;  %2310 = vmatpush1.bf16.msra.mxu1 %v7267_v25  ;;  %v269_v24 = vld [vmem:[%s8302_s11 + $0x188] sm:$0xf] }
  0x83   : > { %4062 = vmatpush1.bf16.msra.mxu0 %v7264_v21  ;;  %2311 = vmatprep.subr.bf16.mxu1 %v7268_v26  ;;  %v267_v21 = vld [vmem:[%s8302_s11 + $0x17c] sm:$0x1]  ;;  %v271_v26 = vld [vmem:[%s8302_s11 + $0x194] sm:$0x1]  ;;  %v6088_v39 = vcombine.low %v1005_v4, %v1008_v23  ;;  %v7329_v4 = vld [vmem:[#allocation2 + $0x3c4] ss:$8 sps:$4 sm:$0xff]  }
  0x84   : > { %4063 = vmatprep.subr.bf16.mxu0 %v7272_v27  ;;  %2799 = vmatprep.mubr.bf16.mxu0 %v9805_v0  ;;  %v8403_v25 = vcombine.low %v265_v16, %v267_v21  ;;  %v7308_v27 = vld [vmem:[#allocation2 + $0x5a4] ss:$8 sps:$4 sm:$0xff]  }
  0x85   : > { %v8439_v16 = vld [vmem:[%s8302_s11 + $0xc0] sm:$0xff] }
  0x86   : > { %2312 = vmatpush1.bf16.msra.mxu1 %v7273_v32  ;;  %9927 = vst [vmem:[#allocation19_spill] sm:$0xff] %v8403_v25  ;;  %v1011_v32 = vrot.slane %v8403_v25, 1  ;;  %v210_v21 = vld [vmem:[%s8302_s11 + $0x24] sm:$0x11]  ;;  %v246_v25 = vld [vmem:[%s8302_s11 + $0xfc] sm:$0x11] }
  0x87   : > { %4064 = vmatpush1.bf16.msra.mxu0 %v7270_v31  ;;  %2313 = vmatprep.subr.bf16.mxu1 %v7274_v37  ;;  %v7313_v31 = vld [vmem:[#allocation2 + $0x3a4] ss:$8 sps:$4 sm:$0xff]   ;;  %v6044_v37 = vcombine.low %v8388_v8, %v8391_v9 }
  0x88   : > { %4065 = vmatprep.subr.bf16.mxu0 %v7280_v43  ;;  %v8416_v43 = vcombine.low %v269_v24, %v271_v26  ;;  %v7335_v24 = vld [vmem:[#allocation2 + $0x3d4] ss:$8 sps:$4 sm:$0xff]  }
  0x8a   : > { %2800 = vmatmul.mubr.bf16.gmra.mrb[12].mxu0 %v6070_v44  ;;  %2314 = vmatpush1.bf16.msra.mxu1 %v7281_v48  ;;  %9928 = vst [vmem:[#allocation20_spill] sm:$0xff] %v8416_v43  ;;  %v8418_v44 = vcombine.low %v1008_v23, %v1011_v32  ;;  %v7319_v48 = vld [vmem:[#allocation2 + $0x3b4] ss:$8 sps:$4 sm:$0xff]   ;;  %v1014_v60 = vrot.slane %v8416_v43, 1 }
  0x8b   : > { %4066 = vmatpush1.bf16.msra.mxu0 %v7278_v47  ;;  %2315 = vmatprep.subr.bf16.mxu1 %v7282_v51  ;;  %v7316_v47 = vld [vmem:[#allocation2 + $0x5b4] ss:$8 sps:$4 sm:$0xff]   ;;  %v273_v51 = vld [vmem:[%s8302_s11 + $0x1a0] sm:$0xf] }
  0x8c   : > { %4067 = vmatprep.subr.bf16.mxu0 %v7286_v52  ;;  %2809 = vmatprep.mubr.bf16.mxu0 %v9805_v0  ;;  %9929 = vst [vmem:[#allocation21_spill] sm:$0xff] %v8418_v44  ;;  %v275_v52 = vld [vmem:[%s8302_s11 + $0x1ac] sm:$0x1]  ;;  %v7332_v23 = vld [vmem:[#allocation2 + $0x5d4] ss:$8 sps:$4 sm:$0xff]  }
  0x8d   : > { %v8424_v56 = vcombine.low %v273_v51, %v275_v52  ;;  %v8463_v51 = vld [vmem:[%s8302_s11 + $0x108] sm:$0xff]  ;;  %v8466_v52 = vcombine.low %v8352_v28, %v210_v21 }
  0x8e   : > { %2316 = vmatpush1.bf16.msra.mxu1 %v7287_v54  ;;  %v7317_v54 = vld [vmem:[#allocation2 + $0x3b0] ss:$8 sps:$4 sm:$0xff]  }
  0x8f   : > { %4068 = vmatpush1.bf16.msra.mxu0 %v7284_v53  ;;  %2398 = vmatprep.subr.bf16.mxu1 %v7292_v57  ;;  %v7314_v53 = vld [vmem:[#allocation2 + $0x5b0] ss:$8 sps:$4 sm:$0xff]   ;;  %9930 = vst [vmem:[#allocation22_spill] sm:$0xff] %v8424_v56  ;;  %v7324_v57 = vld [vmem:[#allocation2 + $0x5c4] ss:$8 sps:$4 sm:$0xff]  }
  0x90   : > { %4069 = vmatprep.subr.bf16.mxu0 %v7297_v1  ;;  %v1017_v1 = vrot.slane %v8424_v56, 1  ;;  %v7397_v56 = vld [vmem:[#allocation2 + $0x430] ss:$8 sps:$4 sm:$0xff]  }
  0x91   : > { %2318 = vmatmul.mubr.bf16.vlgmr.msra.gmra.mrb[0].mxu1 %v6035_v5  ;;  %v7322_v5 = vld [vmem:[#allocation2 + $0x5c0] ss:$8 sps:$4 sm:$0xff]  }
  0x92   : > { %2810 = vmatmul.mubr.bf16.gmra.mrb[16].mxu0 %v6079_v7  ;;  %2399 = vmatpush1.bf16.msra.mxu1 %v7290_v6  ;;  %v7327_v6 = vld [vmem:[#allocation2 + $0x3c0] ss:$8 sps:$4 sm:$0xff]  }
  0x93   : > { %4070 = vmatpush1.bf16.msra.mxu0 %v7295_v13  ;;  %2400 = vmatprep.subr.bf16.mxu1 %v7300_v14  ;;  %v8432_v7 = vld [vmem:[%s8302_s11 + $0xa8] sm:$0xff]  ;;  %v8434_v13 = vcombine.low %v1014_v60, %v1017_v1  ;;  %v6053_v14 = vcombine.low %v8411_v41, %v8414_v42 }
  0x94   : > { %4071 = vmatprep.subr.bf16.mxu0 %v7303_v15  ;;  %2327 = vmatprep.mubr.bf16.mxu1 %v6045_v20  ;;  %v6097_v15 = vcombine.low %v1011_v32, %v1014_v60  ;;  %v206_v20 = vld [vmem:[%s8302_s11 + $0xc] sm:$0x11]  ;;  %v6062_v60 = vcombine.low %v8432_v7, %v8439_v16 }
  0x95   : > { %2819 = vmatprep.mubr.bf16.mxu0 %v9805_v0  ;;  %9931 = vst [vmem:[#allocation23_spill] sm:$0xff] %v8434_v13  ;;  %v7330_v32 = vld [vmem:[#allocation2 + $0x5d0] ss:$8 sps:$4 sm:$0xff]  }
  0x96   : > { %2401 = vmatpush1.bf16.msra.mxu1 %v7298_v17  ;;  %v8441_v17 = vcombine.low %v277_v62, %v279_v63  ;;  %v7338_v62 = vld [vmem:[#allocation2 + $0x5e0] ss:$8 sps:$4 sm:$0xff]  }
  0x97   : > { %4072 = vmatpush1.bf16.msra.mxu0 %v7301_v19  ;;  %2402 = vmatprep.subr.bf16.mxu1 %v7308_v27  ;;  %v204_v19 = vld [vmem:[%s8302_s11] sm:$0xff]  ;;  %v8449_v27 = vcombine.high %v8352_v28, %v210_v21  ;;  %v218_v28 = vld [vmem:[%s8302_s11 + $0x54] sm:$0x11] }
  0x98   : > { %4073 = vmatprep.subr.bf16.mxu0 %v7313_v31  ;;  %9932 = vst [vmem:[#allocation24_spill] sm:$0xff] %v8441_v17  ;;  %v8446_v26 = vcombine.high %v204_v19, %v206_v20  ;;  %v6063_v31 = vcombine.high %v8432_v7, %v8439_v16  ;;  %v7351_v21 = vld [vmem:[#allocation2 + $0x3f4] ss:$8 sps:$4 sm:$0xff]  }
  0x99   : > { %2328 = vmatmul.mubr.bf16.gmra.mrb[4].mxu1 %v6044_v37  ;;  %v7333_v37 = vld [vmem:[#allocation2 + $0x3d0] ss:$8 sps:$4 sm:$0xff]  }
  0x9a   : > { %2820 = vmatmul.mubr.bf16.gmra.mrb[20].mxu0 %v6088_v39  ;;  %2403 = vmatpush1.bf16.msra.mxu1 %v7306_v35  ;;  %9933 = vst [vmem:[#allocation25_spill] sm:$0xff] %v8446_v26  ;;  %v9801_v35 = vrot.slane %v8441_v17, 1  ;;  %v7340_v39 = vld [vmem:[#allocation2 + $0x5e4] ss:$8 sps:$4 sm:$0xff]  }
  0x9b   : > { %4074 = vmatpush1.bf16.msra.mxu0 %v7311_v40  ;;  %2404 = vmatprep.subr.bf16.mxu1 %v7316_v47  ;;  %v8456_v40 = vcombine.high %v8357_v30, %v8388_v8  ;;  %v8460_v47 = vcombine.low %v8357_v30, %v8388_v8  ;;  %v8550_v17 = vld [vmem:[%s8302_s11 + $0x180] sm:$0xff] }
  0x9c   : > { %4075 = vmatprep.subr.bf16.mxu0 %v7319_v48  ;;  %2337 = vmatprep.mubr.bf16.mxu1 %v6054_v55  ;;  %v7345_v48 = vld [vmem:[#allocation2 + $0x3e4] ss:$8 sps:$4 sm:$0xff]   ;;  %v6106_v63 = vcombine.low %v1017_v1, %v9801_v35  ;;  %v8509_v35 = vld [vmem:[%s8302_s11 + $0x138] sm:$0xff] }
  0x9d   : > { %2829 = vmatprep.mubr.bf16.mxu0 %v9805_v0  ;;  %9934 = vst [vmem:[#allocation26_spill] sm:$0xff] %v8456_v40  ;;  %9935 = vst [vmem:[#allocation27_spill] sm:$0xff] %v8460_v47  ;;  %v8472_v55 = vld [vmem:[%s8302_s11 + $0x120] sm:$0xff] }
  0x9e   : > { %2405 = vmatpush1.bf16.msra.mxu1 %v7314_v53  ;;  %v965_v53 = vrot.slane %v8446_v26, 1  ;;  %v6072_v1 = vcombine.high %v8463_v51, %v8472_v55  ;;  %v7376_v26 = vld [vmem:[#allocation2 + $0x410] ss:$8 sps:$4 sm:$0xff]  }
  0x9f   : > { %4076 = vmatpush1.bf16.msra.mxu0 %v7317_v54  ;;  %2406 = vmatprep.subr.bf16.mxu1 %v7324_v57  ;;  %v9807_v54 = vrot.slane %v8449_v27, 1  ;;  %v214_v57 = vld [vmem:[%s8302_s11 + $0x3c] sm:$0x11] }
  0xa0   : > { %4077 = vmatprep.subr.bf16.mxu0 %v7329_v4  ;;  %v8479_v4 = vcombine.low %v204_v19, %v206_v20  ;;  %v967_v20 = vrot.slane %v8466_v52, 1 }
  0xa1   : > { %2338 = vmatmul.mubr.bf16.gmra.mrb[8].mxu1 %v6053_v14  ;;  %v8487_v14 = vcombine.high %v8391_v9, %v8411_v41  ;;  %v6258_v19 = vcombine.low %v965_v53, %v9807_v54  ;;  %v7363_v53 = vld [vmem:[#allocation2 + $0x404] ss:$8 sps:$4 sm:$0xff]   ;;  %v7366_v54 = vld [vmem:[#allocation2 + $0x614] ss:$8 sps:$4 sm:$0xff]  }
  0xa2   : > { %2830 = vmatmul.mubr.bf16.gmra.mrb[24].mxu0 %v6097_v15  ;;  %2407 = vmatpush1.bf16.msra.mxu1 %v7322_v5  ;;  %9936 = vst [vmem:[#allocation28_spill] sm:$0xff] %v8479_v4  ;;  %v8483_v5 = vcombine.low %v8357_v30, %v214_v57  ;;  %v7348_v15 = vld [vmem:[#allocation2 + $0x5f4] ss:$8 sps:$4 sm:$0xff]  }
  0xa3   : > { %4078 = vmatpush1.bf16.msra.mxu0 %v7327_v6  ;;  %2408 = vmatprep.subr.bf16.mxu1 %v7332_v23  ;;  %v7343_v6 = vld [vmem:[#allocation2 + $0x3e0] ss:$8 sps:$4 sm:$0xff]   ;;  %9937 = vst [vmem:[#allocation29_spill] sm:$0xff] %v8487_v14  ;;  %v8495_v23 = vcombine.high %v8357_v30, %v214_v57  ;;  %v7349_v30 = vld [vmem:[#allocation2 + $0x3f0] ss:$8 sps:$4 sm:$0xff]  }
  0xa4   : > { %4079 = vmatprep.subr.bf16.mxu0 %v7335_v24  ;;  %2347 = vmatprep.mubr.bf16.mxu1 %v6063_v31  ;;  %v8498_v24 = vcombine.high %v8388_v8, %v218_v28  ;;  %v970_v31 = vrot.slane %v8483_v5, 1 }
  0xa5   : > { %2839 = vmatprep.mubr.bf16.mxu0 %v9805_v0  ;;  %v8521_v0 = vcombine.low %v8388_v8, %v218_v28  ;;  %v8533_v8 = vcombine.high %v8414_v42, %v8432_v7  ;;  %v8537_v28 = vcombine.low %v8414_v42, %v8432_v7 }
  0xa6   : > { %2409 = vmatpush1.bf16.msra.mxu1 %v7330_v32  ;;  %v8503_v32 = vcombine.low %v8391_v9, %v8411_v41  ;;  %v8506_v57 = vcombine.low %v967_v20, %v970_v31 }
  0xa7   : > { %4080 = vmatpush1.bf16.msra.mxu0 %v7333_v37  ;;  %2410 = vmatprep.subr.bf16.mxu1 %v7340_v39  ;;  %v7346_v37 = vld [vmem:[#allocation2 + $0x5f0] ss:$8 sps:$4 sm:$0xff]   ;;  %v964_v39 = vrot.slane %v8479_v4, 1  ;;  %9940 = vst [vmem:[#allocation32_spill] sm:$0xff] %v8533_v8  ;;  %9941 = vst [vmem:[#allocation33_spill] sm:$0xff] %v8537_v28  ;;  %v566_v8 = vshrl.u32 %v8466_v52, 16 }
  0xa8   : > { %4081 = vmatprep.subr.bf16.mxu0 %v7345_v48  ;;  %9938 = vst [vmem:[#allocation30_spill] sm:$0xff] %v8503_v32  ;;  %v7360_v48 = vld [vmem:[#allocation2 + $0x604] ss:$8 sps:$4 sm:$0xff]   ;;  %9939 = vst [vmem:[#allocation31_spill] sm:$0xff] %v8506_v57  ;;  %v8589_v28 = vld [vmem:[%s8302_s11 + $0x198] sm:$0xff]  ;;  %v610_v14 = vshll.u32 %v8521_v0, 16 }
  0xa9   : > { %2348 = vmatmul.mubr.bf16.gmra.mrb[12].mxu1 %v6062_v60  ;;  %v6257_v38 = vcombine.low %v964_v39, %v967_v20  ;;  %v7364_v20 = vld [vmem:[#allocation2 + $0x610] ss:$8 sps:$4 sm:$0xff]   ;;  %v7384_v4 = vld [vmem:[#allocation2 + $0x424] ss:$8 sps:$4 sm:$0xff]  }
  0xaa   : > { %2840 = vmatmul.mubr.bf16.gmra.mrb[28].mxu0 %v6106_v63  ;;  %2411 = vmatpush1.bf16.msra.mxu1 %v7338_v62  ;;  %v9814_v63 = vrot.slane %v8498_v24, 1  ;;  %v226_v62 = vld [vmem:[%s8302_s11 + $0x84] sm:$0x11]  ;;  %v250_v32 = vld [vmem:[%s8302_s11 + $0x114] sm:$0x11]  ;;  %v612_v47 = vrot.slane %v610_v14, 1 }
  0xab   : > { %4082 = vmatpush1.bf16.msra.mxu0 %v7343_v6  ;;  %2412 = vmatprep.subr.bf16.mxu1 %v7348_v15  ;;  %v6071_v6 = vcombine.low %v8463_v51, %v8472_v55  ;;  %v7358_v15 = vld [vmem:[#allocation2 + $0x600] ss:$8 sps:$4 sm:$0xff]   ;;  %v8529_v60 = vcombine.high %v8411_v41, %v226_v62  ;;  %v7423_v14 = vld [vmem:[#allocation2 + $0x450] ss:$8 sps:$4 sm:$0xff]  }
  0xac   : > { %4083 = vmatprep.subr.bf16.mxu0 %v7351_v21  ;;  %2357 = vmatprep.mubr.bf16.mxu1 %v6072_v1  ;;  %v7361_v21 = vld [vmem:[#allocation2 + $0x400] ss:$8 sps:$4 sm:$0xff]   ;;  %v6081_v1 = vcombine.high %v8509_v35, %v8512_v34 }
  0xad   : > { %4085 = vmatprep.mubr.bf16.mxu0 %v6258_v19  ;;  %v8526_v19 = vcombine.high %v8391_v9, %v222_v58  ;;  %v8547_v57 = vld [vmem:[%s8302_s11 + $0x168] sm:$0xff] }
  0xae   : > { %2413 = vmatpush1.bf16.msra.mxu1 %v7346_v37  ;;  %v9942_v37 = vrot.slane %v8495_v23, 1  ;;  %v8672_v13 = vcombine.high %v8512_v34, %v8547_v57 }
  0xaf   : > { %4084 = vmatpush1.bf16.msra.mxu0 %v7349_v30  ;;  %2414 = vmatprep.subr.bf16.mxu1 %v7360_v48  ;;  %v7378_v30 = vld [vmem:[#allocation2 + $0x414] ss:$8 sps:$4 sm:$0xff]   ;;  %v7373_v48 = vld [vmem:[#allocation2 + $0x624] ss:$8 sps:$4 sm:$0xff]  }
  0xb0   : > { %4166 = vmatprep.subr.bf16.mxu0 %v7363_v53  ;;  %v8543_v39 = vcombine.low %v9942_v37, %v9814_v63  ;;  %v9816_v53 = vrot.slane %v8521_v0, 1  ;;  %v234_v63 = vld [vmem:[%s8302_s11 + $0xb4] sm:$0x11]  ;;  %v7371_v37 = vld [vmem:[#allocation2 + $0x620] ss:$8 sps:$4 sm:$0xff]   ;;  %9964 = vst [vmem:[#allocation47_spill] sm:$0xff] %v8672_v13 }
  0xb1   : > { %2358 = vmatmul.mubr.bf16.gmra.mrb[16].mxu1 %v6071_v6  ;;  %v568_v6 = vshll.u32 %v8466_v52, 16  ;;  %v6089_v52 = vcombine.low %v8547_v57, %v8550_v17 }
  0xb2   : > { %9943 = vst [vmem:[#allocation34_spill] sm:$0xff] %v8543_v39  ;;  %4086 = vmatmul.mubr.bf16.vlgmr.msra.gmra.mrb[32].mxu0 %v6257_v38  ;;  %2415 = vmatpush1.bf16.msra.mxu1 %v7358_v15  ;;  %v230_v38 = vld [vmem:[%s8302_s11 + $0x9c] sm:$0x11]  ;;  %v6080_v15 = vcombine.low %v8509_v35, %v8512_v34 }
  0xb3   : > { %4167 = vmatpush1.bf16.msra.mxu0 %v7361_v21  ;;  %2416 = vmatprep.subr.bf16.mxu1 %v7366_v54  ;;  %v8561_v21 = vcombine.low %v970_v31, %v9816_v53  ;;  %v8564_v54 = vcombine.low %v8391_v9, %v222_v58  ;;  %v9945_v31 = vrot.slane %v8529_v60, 1  ;;  %v9946_v53 = vrot.slane %v8526_v19, 1 }
  0xb4   : > { %2367 = vmatprep.mubr.bf16.mxu1 %v6081_v1  ;;  %4095 = vmatprep.mubr.bf16.mxu0 %v8543_v39  ;;  %v8567_v1 = vcombine.low %v8411_v41, %v226_v62  ;;  %v7381_v39 = vld [vmem:[#allocation2 + $0x634] ss:$8 sps:$4 sm:$0xff]   ;;  %v8579_v9 = vcombine.high %v8414_v42, %v230_v38  ;;  %v8582_v41 = vcombine.high %v8432_v7, %v234_v63  ;;  %v7382_v62 = vld [vmem:[#allocation2 + $0x420] ss:$8 sps:$4 sm:$0xff]   ;;  %v570_v43 = vrot.slane %v568_v6, 1 }
  0xb5   : > { %4168 = vmatprep.subr.bf16.mxu0 %v7378_v30  ;;  %9944 = vst [vmem:[#allocation35_spill] sm:$0xff] %v8561_v21  ;;  %v6090_v30 = vcombine.high %v8547_v57, %v8550_v17  ;;  %v8576_v58 = vcombine.low %v9946_v53, %v9945_v31  ;;  %v7399_v31 = vld [vmem:[#allocation2 + $0x434] ss:$8 sps:$4 sm:$0xff]   ;;  %v9950_v6 = vrot.slane %v8564_v54, 1  ;;  %v8620_v53 = vcombine.high %v8472_v55, %v8509_v35 }
  0xb6   : > { %2417 = vmatpush1.bf16.msra.mxu1 %v7364_v20  ;;  %9948 = vst [vmem:[#allocation37_spill] sm:$0xff] %v8582_v41  ;;  %v589_v20 = vshll.u32 %v8483_v5, 16  ;;  %v629_v46 = vshrl.u32 %v8564_v54, 16 }
  0xb7   : > { %4169 = vmatpush1.bf16.msra.mxu0 %v7376_v26  ;;  %2418 = vmatprep.subr.bf16.mxu1 %v7373_v48  ;;  %9947 = vst [vmem:[#allocation36_spill] sm:$0xff] %v8576_v58  ;;  %v7379_v26 = vld [vmem:[#allocation2 + $0x630] ss:$8 sps:$4 sm:$0xff]   ;;  %v8611_v48 = vcombine.low %v8414_v42, %v230_v38  ;;  %9953 = vst [vmem:[#allocation40_spill] sm:$0xff] %v8620_v53 }
  0xb8   : > { %4170 = vmatprep.subr.bf16.mxu0 %v7384_v4  ;;  %v7391_v4 = vld [vmem:[#allocation2 + $0x644] ss:$8 sps:$4 sm:$0xff]  }
  0xb9   : > { %2368 = vmatmul.mubr.bf16.gmra.mrb[20].mxu1 %v6080_v15  ;;  %v8594_v15 = vld [vmem:[%s8302_s11 + $0x1b0] sm:$0xff] }
  0xba   : > { %4096 = vmatmul.mubr.bf16.gmra.mrb[36].mxu0 %v8561_v21  ;;  %2419 = vmatpush1.bf16.msra.mxu1 %v7371_v37  ;;  %v587_v21 = vshrl.u32 %v8483_v5, 16  ;;  %v591_v37 = vrot.slane %v589_v20, 1  ;;  %v8614_v5 = vcombine.low %v8432_v7, %v234_v63  ;;  %v6099_v20 = vcombine.high %v8589_v28, %v8594_v15 }
  0xbb   : > { %2377 = vmatprep.mubr.bf16.mxu1 %v6090_v30  ;;  %2420 = vmatprep.subr.bf16.mxu1 %v7381_v39  ;;  %v244_v30 = vld [vmem:[%s8302_s11 + $0xf0] sm:$0xff]  ;;  %v9949_v39 = vrot.slane %v8567_v1, 1  ;;  %v8631_v7 = vcombine.high %v8463_v51, %v250_v32  ;;  %v8635_v63 = vcombine.low %v8472_v55, %v8509_v35 }
  0xbc   : > { %4105 = vmatprep.mubr.bf16.mxu0 %v8576_v58  ;;  %4171 = vmatpush1.bf16.msra.mxu0 %v7382_v62  ;;  %9952 = vst [vmem:[#allocation39_spill] sm:$0xff] %v8614_v5  ;;  %v7389_v62 = vld [vmem:[#allocation2 + $0x640] ss:$8 sps:$4 sm:$0xff]   ;;  %v8628_v38 = vcombine.high %v244_v30, %v246_v25  ;;  %v8639_v53 = vor.u32 %v591_v37, %v587_v21 }
  0xbd   : > { %v8608_v58 = vcombine.low %v9950_v6, %v9949_v39  ;;  %4172 = vmatprep.subr.bf16.mxu0 %v7399_v31  ;;  %v9954_v39 = vrot.slane %v8582_v41, 1  ;;  %v9955_v31 = vrot.slane %v8579_v9, 1  ;;  %9958 = vst [vmem:[#allocation43_spill] sm:$0xff] %v8635_v63  ;;  %v7411_v6 = vld [vmem:[#allocation2 + $0x444] ss:$8 sps:$4 sm:$0xff]   ;;  %v8664_v37 = vcombine.low %v244_v30, %v246_v25 }
  0xbe   : > { %2421 = vmatpush1.bf16.msra.mxu1 %v7379_v26  ;;  %9957 = vst [vmem:[#allocation42_spill] sm:$0xff] %v8628_v38  ;;  %v7394_v26 = vld [vmem:[#allocation2 + $0x650] ss:$8 sps:$4 sm:$0xff]   ;;  %v7425_v63 = vld [vmem:[#allocation2 + $0x454] ss:$8 sps:$4 sm:$0xff]   ;;  %v995_v21 = vrot.slane %v8628_v38, 1 }
  0xbf   : > { %9951 = vst [vmem:[#allocation38_spill] sm:$0xff] %v8608_v58  ;;  %2422 = vmatprep.subr.bf16.mxu1 %v7391_v4  ;;  %v8626_v42 = vcombine.low %v9955_v31, %v9954_v39  ;;  %v8637_v4 = vor.u32 %v570_v43, %v566_v8  ;;  %v631_v43 = vshll.u32 %v8564_v54, 16  ;;  %v596_v8 = vshll.u32 %v8495_v23, 16  ;;  %v258_v31 = vld [vmem:[%s8302_s11 + $0x144] sm:$0x11]  ;;  %9963 = vst [vmem:[#allocation46_spill] sm:$0xff] %v8664_v37 }
  0xc0   : > { %4173 = vmatpush1.bf16.msra.mxu0 %v7397_v56  ;;  %v7406_v56 = vld [vmem:[#allocation2 + $0x664] ss:$8 sps:$4 sm:$0xff]   ;;  %v594_v39 = vshrl.u32 %v8495_v23, 16  ;;  %v615_v30 = vshrl.u32 %v8498_v24, 16 }
  0xc1   : > { %9956 = vst [vmem:[#allocation41_spill] sm:$0xff] %v8626_v42  ;;  %9959 = vst [vmem:[#allocation44_spill] sm:$0xff] %v8637_v4  ;;  %2378 = vmatmul.mubr.bf16.gmra.mrb[24].mxu1 %v6089_v52  ;;  %v254_v52 = vld [vmem:[%s8302_s11 + $0x12c] sm:$0x11]  ;;  %4174 = vmatprep.subr.bf16.mxu0 %v7411_v6  ;;  %v8667_v6 = vcombine.low %v8463_v51, %v250_v32  ;;  %v633_v40 = vrot.slane %v631_v43, 1  ;;  %v598_v41 = vrot.slane %v596_v8, 1 }
  0xc2   : > { %4106 = vmatmul.mubr.bf16.gmra.mrb[40].mxu0 %v8608_v58  ;;  %2423 = vmatpush1.bf16.msra.mxu1 %v7389_v62  ;;  %v6038_v62 = vcombine.low %v8637_v4, %v8639_v53  ;;  %v6098_v58 = vcombine.low %v8589_v28, %v8594_v15  ;;  %v7404_v4 = vld [vmem:[#allocation2 + $0x660] ss:$8 sps:$4 sm:$0xff]   ;;  %v8677_v51 = vcombine.high %v8472_v55, %v254_v52  ;;  %v7431_v8 = vld [vmem:[#allocation2 + $0x464] ss:$8 sps:$4 sm:$0xff]  }
  0xc3   : > { %2387 = vmatprep.mubr.bf16.mxu1 %v6099_v20  ;;  %2424 = vmatprep.subr.bf16.mxu1 %v7396_v11  ;;  %v608_v20 = vshrl.u32 %v8521_v0, 16  ;;  %v9960_v11 = vrot.slane %v8614_v5, 1  ;;  %v8680_v32 = vcombine.high %v8509_v35, %v258_v31  ;;  %v8694_v13 = vor.u32 %v633_v40, %v629_v46  ;;  %v7420_v43 = vld [vmem:[#allocation2 + $0x684] ss:$8 sps:$4 sm:$0xff]  }
  0xc4   : > { %4115 = vmatprep.mubr.bf16.mxu0 %v8626_v42  ;;  %v9961_v42 = vrot.slane %v8611_v48, 1  ;;  %4175 = vmatpush1.bf16.msra.mxu0 %v7409_v61  ;;  %v9965_v61 = vrot.slane %v8631_v7, 1  ;;  %v9856_v44 = vrot.slane %v8677_v51, 1  ;;  %v650_v46 = vshrl.u32 %v8567_v1, 16 }
  0xc5   : > { %4176 = vmatprep.subr.bf16.mxu0 %v7425_v63  ;;  %v617_v63 = vshll.u32 %v8498_v24, 16  ;;  %v8705_v40 = vor.u32 %v598_v41, %v594_v39 }
  0xc6   : > { %v8662_v38 = vcombine.low %v9961_v42, %v9960_v11  ;;  %2425 = vmatpush1.bf16.msra.mxu1 %v7394_v26  ;;  %v7414_v42 = vld [vmem:[#allocation2 + $0x674] ss:$8 sps:$4 sm:$0xff]   ;;  %v6294_v25 = vcombine.low %v995_v21, %v9965_v61  ;;  %v8686_v26 = vcombine.low %v8512_v34, %v8547_v57  ;;  %v652_v21 = vshll.u32 %v8567_v1, 16  ;;  %v7412_v11 = vld [vmem:[#allocation2 + $0x670] ss:$8 sps:$4 sm:$0xff]  }
  0xc7   : > { %2426 = vmatprep.subr.bf16.mxu1 %v7406_v56  ;;  %v994_v56 = vrot.slane %v8664_v37, 1  ;;  %v8692_v61 = vor.u32 %v612_v47, %v608_v20  ;;  %v8702_v47 = vcombine.low %v8472_v55, %v254_v52  ;;  %v8716_v55 = vld [vmem:[%s8302_s11 + $0xcc] sm:$0x11]  ;;  %v7418_v52 = vld [vmem:[#allocation2 + $0x680] ss:$8 sps:$4 sm:$0xff]  }
  0xc8   : > { %9962 = vst [vmem:[#allocation45_spill] sm:$0xff] %v8662_v38  ;;  %9966 = vst [vmem:[#allocation48_spill] sm:$0xff] %v8686_v26  ;;  %v673_v26 = vshll.u32 %v8611_v48, 16  ;;  %4177 = vmatpush1.bf16.msra.mxu0 %v7423_v14  ;;  %v671_v14 = vshrl.u32 %v8611_v48, 16 }
  0xc9   : > { %2388 = vmatmul.mubr.bf16.gmra.mrb[28].mxu1 %v6098_v58  ;;  %v619_v58 = vrot.slane %v617_v63, 1  ;;  %4178 = vmatprep.subr.bf16.mxu0 %v7431_v8  ;;  %v6047_v41 = vcombine.low %v8692_v61, %v8694_v13  ;;  %v9969_v63 = vrot.slane %v8495_v23, 1  ;;  %v7445_v23 = vld [vmem:[#allocation2 + $0x474] ss:$8 sps:$4 sm:$0xff]  }
  0xca   : > { %4116 = vmatmul.mubr.bf16.gmra.mrb[44].mxu0 %v8662_v38  ;;  %2427 = vmatpush1.bf16.msra.mxu1 %v7404_v4  ;;  %v7945_v38 = vld [vmem:[%s8302_s11 + $0x20] sm:$0xf]  ;;  %v9855_v4 = vrot.slane %v8680_v32, 1  ;;  %v675_v39 = vrot.slane %v673_v26, 1  ;;  %v207_v26 = vld [vmem:[%s8302_s11 + $0x14] sm:$0x1] }
  0xcb   : > { %2430 = vmatprep.mubr.bf16.mxu1 %v6038_v62  ;;  %2428 = vmatprep.subr.bf16.mxu1 %v7414_v42  ;;  %v6037_v37 = vcombine.low %v7945_v38, %v7946_v22  ;;  %v7429_v62 = vld [vmem:[#allocation2 + $0x460] ss:$8 sps:$4 sm:$0xff]   ;;  %v8707_v20 = vor.u32 %v619_v58, %v615_v30  ;;  %v9967_v42 = vrot.slane %v8667_v6, 1  ;;  %v8712_v38 = vcombine.low %v8509_v35, %v258_v31 }
  0xcc   : > { %4125 = vmatprep.mubr.bf16.mxu0 %v6294_v25  ;;  %v654_v25 = vrot.slane %v652_v21, 1  ;;  %v9970_v35 = vrot.slane %v8449_v27, 1  ;;  %v8734_v8 = vcombine.low %v9856_v44, %v9855_v4  ;;  %v205_v21 = vld [vmem:[%s8302_s11 + $0x8] sm:$0xf]  ;;  %4179 = vmatpush1.bf16.msra.mxu0 %v7429_v62  ;;  %v7443_v62 = vld [vmem:[#allocation2 + $0x470] ss:$8 sps:$4 sm:$0xff]   ;;  %v8754_v44 = vor.u32 %v675_v39, %v671_v14 }
  0xcd   : > { %v6293_v22 = vcombine.low %v994_v56, %v9967_v42  ;;  %v8722_v30 = vcombine.low %v8705_v40, %v8707_v20  ;;  %v7428_v56 = vld [vmem:[#allocation2 + $0x694] ss:$8 sps:$4 sm:$0xff]   ;;  %v8741_v42 = vcombine.low %v8439_v16, %v8716_v55  ;;  %v7452_v4 = vld [vmem:[#allocation2 + $0x904] ss:$8 sps:$4 sm:$0xff]   ;;  %4180 = vmatprep.subr.bf16.mxu0 %v7445_v23  ;;  %v9977_v14 = vrot.slane %v8712_v38, 1 }
  0xce   : > { %2429 = vmatpush1.bf16.msra.mxu1 %v7412_v11  ;;  %v8728_v31 = vcombine.low %v9970_v35, %v9969_v63  ;;  %9972 = vst [vmem:[#allocation51_spill] sm:$0xff] %v8734_v8  ;;  %v7426_v11 = vld [vmem:[#allocation2 + $0x690] ss:$8 sps:$4 sm:$0xff]   ;;  %v8749_v63 = vcombine.low %v8550_v17, %v8589_v28  ;;  %v8752_v16 = vor.u32 %v654_v25, %v650_v46  ;;  %v262_v58 = vld [vmem:[%s8302_s11 + $0x15c] sm:$0x11]  ;;  %v9980_v23 = vrot.slane %v8526_v19, 1 }
  0xcf   : > { %9968 = vst [vmem:[#allocation49_spill] sm:$0xff] %v8722_v30  ;;  %2511 = vmatprep.subr.bf16.mxu1 %v7420_v43  ;;  %9973 = vst [vmem:[#allocation52_spill] sm:$0xff] %v8741_v42  ;;  %v8745_v43 = vcombine.high %v8550_v17, %v8589_v28  ;;  %v7437_v30 = vld [vmem:[#allocation2 + $0x6a4] ss:$8 sps:$4 sm:$0xff]   ;;  %v715_v35 = vshll.u32 %v8741_v42, 16 }
  0xd0   : > { %9971 = vst [vmem:[#allocation50_spill] sm:$0xff] %v8728_v31  ;;  %9975 = vst [vmem:[#allocation54_spill] sm:$0xff] %v8749_v63  ;;  %v8763_v63 = vcombine.low %v205_v21, %v207_v26  ;;  %v7948_v46 = vld [vmem:[%s8302_s11 + $0x68] sm:$0xf]  ;;  %4181 = vmatpush1.bf16.msra.mxu0 %v7443_v62  ;;  %v9981_v21 = vrot.slane %v8498_v24, 1  ;;  %v9983_v62 = vrot.slane %v8564_v54, 1 }
  0xd1   : > { %9974 = vst [vmem:[#allocation53_spill] sm:$0xff] %v8745_v43  ;;  %2431 = vmatmul.mubr.bf16.vlgmr.msra.gmra.mrb[0].mxu1 %v6037_v37  ;;  %v694_v37 = vshll.u32 %v8614_v5, 16  ;;  %5192 = vmatprep.subr.bf16.mxu0 %v7452_v4  ;;  %v713_v4 = vshrl.u32 %v8741_v42, 16  ;;  %v717_v43 = vrot.slane %v715_v35, 1  ;;  %v9986_v54 = vmov 0  }
  0xd2   : > { %4126 = vmatmul.mubr.bf16.gmra.mrb[48].mxu0 %v6293_v22  ;;  %2512 = vmatpush1.bf16.msra.mxu1 %v7418_v52  ;;  %v8760_v22 = vcombine.high %v8512_v34, %v262_v58  ;;  %9976 = vst [vmem:[#allocation55_spill] sm:$0xff] %v8763_v63  ;;  %v7947_v52 = vld [vmem:[%s8302_s11 + $0x50] sm:$0xf]  ;;  %v8779_v26 = vcombine.low %v9981_v21, %v9980_v23  ;;  %v966_v24 = vrot.slane %v8763_v63, 1  ;;  %v778_v23 = vshll.u32 %v8667_v6, 16 }
  0xd3   : > { %2440 = vmatprep.mubr.bf16.mxu1 %v6047_v41  ;;  %2513 = vmatprep.subr.bf16.mxu1 %v7428_v56  ;;  %v6046_v25 = vcombine.low %v7947_v52, %v7948_v46  ;;  %v9978_v41 = vrot.slane %v8702_v47, 1  ;;  %v7435_v56 = vld [vmem:[#allocation2 + $0x6a0] ss:$8 sps:$4 sm:$0xff]   ;;  %v7442_v52 = vld [vmem:[#allocation2 + $0x6b4] ss:$8 sps:$4 sm:$0xff]   ;;  %v692_v46 = vshrl.u32 %v8614_v5, 16 }
  0xd4   : > { %4135 = vmatprep.mubr.bf16.mxu0 %v8734_v8  ;;  %v6056_v8 = vcombine.low %v8752_v16, %v8754_v44  ;;  %9982 = vst [vmem:[#allocation57_spill] sm:$0xff] %v8779_v26  ;;  %v266_v21 = vld [vmem:[%s8302_s11 + $0x174] sm:$0x11]  ;;  %v270_v35 = vld [vmem:[%s8302_s11 + $0x18c] sm:$0x11]  ;;  %v9990_v42 = vrot.slane %v8529_v60, 1  ;;  %v8819_v26 = vcombine.low %v8639_v53, %v8692_v61 }
  0xd5   : > { %v8771_v39 = vcombine.low %v9978_v41, %v9977_v14  ;;  %v696_v14 = vrot.slane %v694_v37, 1  ;;  %v7449_v37 = vld [vmem:[#allocation2 + $0x6c4] ss:$8 sps:$4 sm:$0xff]   ;;  %v7447_v63 = vld [vmem:[#allocation2 + $0x6c0] ss:$8 sps:$4 sm:$0xff]  }
  0xd6   : > { %2514 = vmatpush1.bf16.msra.mxu1 %v7426_v11  ;;  %v9984_v11 = vrot.slane %v8521_v0, 1  ;;  %v7450_v5 = vld [vmem:[#allocation2 + $0x900] ss:$8 sps:$4 sm:$0xff]   ;;  %v7456_v61 = vld [vmem:[#allocation2 + $0x910] ss:$8 sps:$4 sm:$0xff]  }
  0xd7   : > { %9979 = vst [vmem:[#allocation56_spill] sm:$0xff] %v8771_v39  ;;  %2515 = vmatprep.subr.bf16.mxu1 %v7437_v30  ;;  %v7440_v30 = vld [vmem:[#allocation2 + $0x6b0] ss:$8 sps:$4 sm:$0xff]   ;;  %v8792_v0 = vor.u32 %v696_v14, %v692_v46  ;;  %v8834_v53 = vld [vmem:[%s8302_s11 + $0x1a4] sm:$0x11] }
  0xd8   : > { %v8786_v41 = vcombine.low %v9984_v11, %v9983_v62  ;;  %v8797_v62 = vor.u32 %v717_v43, %v713_v4  ;;  %v8801_v11 = vcombine.high %v8547_v57, %v266_v21  ;;  %v7950_v46 = vld [vmem:[%s8302_s11 + $0x98] sm:$0xf]  ;;  %v776_v43 = vshrl.u32 %v8667_v6, 16 }
  0xd9   : > { %2441 = vmatmul.mubr.bf16.gmra.mrb[4].mxu1 %v6046_v25  ;;  %v799_v25 = vshll.u32 %v8702_v47, 16  ;;  %v9989_v4 = vrot.slane %v8579_v9, 1 }
  0xda   : > { %9985 = vst [vmem:[#allocation58_spill] sm:$0xff] %v8786_v41  ;;  %4136 = vmatmul.mubr.bf16.gmra.mrb[52].mxu0 %v8771_v39  ;;  %2516 = vmatpush1.bf16.msra.mxu1 %v7435_v56  ;;  %v8804_v56 = vcombine.high %v8550_v17, %v270_v35  ;;  %v7949_v39 = vld [vmem:[%s8302_s11 + $0x80] sm:$0xf] }
  0xdb   : > { %2450 = vmatprep.mubr.bf16.mxu1 %v6056_v8  ;;  %2517 = vmatprep.subr.bf16.mxu1 %v7442_v52  ;;  %v9988_v8 = vrot.slane %v8308_v33, 1  ;;  %v6055_v14 = vcombine.low %v7949_v39, %v7950_v46  ;;  %v8815_v41 = vcombine.low %v9990_v42, %v9989_v4  ;;  %v797_v39 = vshrl.u32 %v8702_v47, 16 }
  0xdc   : > { %4198 = vmatprep.mubr.bf16.mxu0 %v9986_v54  ;;  %9987 = vst [vmem:[#allocation59_spill] sm:$0xff] %v8804_v56  ;;  %v9993_v46 = vrot.slane %v8567_v1, 1  ;;  %v6065_v56 = vcombine.low %v8792_v0, %v8797_v62  ;;  %v780_v42 = vrot.slane %v778_v23, 1  ;;  %v801_v4 = vrot.slane %v799_v25, 1  ;;  %v7453_v1 = vld [vmem:[#allocation2 + $0x6d0] ss:$8 sps:$4 sm:$0xff]  }
  0xdd   : > { %v6259_v52 = vcombine.low %v966_v24, %v9988_v8  ;;  %9991 = vst [vmem:[#allocation60_spill] sm:$0xff] %v8815_v41  ;;  %v7455_v24 = vld [vmem:[#allocation2 + $0x6d4] ss:$8 sps:$4 sm:$0xff]   ;;  %v8831_v41 = vcombine.low %v8512_v34, %v262_v58  ;;  %v7466_v23 = vld [vmem:[#allocation2 + $0x924] ss:$8 sps:$4 sm:$0xff]   ;;  %v820_v25 = vshll.u32 %v8712_v38, 16 }
  0xde   : > { %2518 = vmatpush1.bf16.msra.mxu1 %v7440_v30  ;;  %v7458_v8 = vld [vmem:[#allocation2 + $0x914] ss:$8 sps:$4 sm:$0xff]   ;;  %v9992_v30 = vrot.slane %v8611_v48, 1  ;;  %v8838_v48 = vcombine.high %v8589_v28, %v8834_v53  ;;  %v8841_v34 = vor.u32 %v780_v42, %v776_v43  ;;  %v8843_v58 = vor.u32 %v801_v4, %v797_v39 }
  0xdf   : > { %2519 = vmatprep.subr.bf16.mxu1 %v7449_v37  ;;  %v7463_v37 = vld [vmem:[#allocation2 + $0x6e4] ss:$8 sps:$4 sm:$0xff]   ;;  %v7469_v43 = vld [vmem:[#allocation2 + $0x6f4] ss:$8 sps:$4 sm:$0xff]   ;;  %v8858_v42 = vcombine.low %v8550_v17, %v270_v35 }
  0xe0   : > { %v8826_v31 = vcombine.low %v9993_v46, %v9992_v30  ;;  %9994 = vst [vmem:[#allocation61_spill] sm:$0xff] %v8841_v34  ;;  %v7472_v39 = vld [vmem:[#allocation2 + $0x934] ss:$8 sps:$4 sm:$0xff]   ;;  %v818_v30 = vshrl.u32 %v8712_v38, 16  ;;  %v8855_v46 = vcombine.low %v8547_v57, %v266_v21  ;;  %v6074_v4 = vcombine.low %v8841_v34, %v8843_v58  ;;  %v7470_v57 = vld [vmem:[#allocation2 + $0x930] ss:$8 sps:$4 sm:$0xff]  }
  0xe1   : > { %2451 = vmatmul.mubr.bf16.gmra.mrb[8].mxu1 %v6055_v14  ;;  %v7951_v14 = vld [vmem:[%s8302_s11 + $0xb0] sm:$0xf]  ;;  %v7476_v21 = vld [vmem:[#allocation2 + $0x704] ss:$8 sps:$4 sm:$0xff]  }
  0xe2   : > { %4199 = vmatmul.mubr.bf16.vlgmr.msra.gmra.mrb[32].mxu0 %v6259_v52  ;;  %2520 = vmatpush1.bf16.msra.mxu1 %v7447_v63  ;;  %v841_v52 = vshll.u32 %v8831_v41, 16  ;;  %v7952_v63 = vld [vmem:[%s8302_s11 + $0xc8] sm:$0xf]  ;;  %v7479_v17 = vld [vmem:[#allocation2 + $0x944] ss:$8 sps:$4 sm:$0xff]   ;;  %v862_v35 = vshll.u32 %v8855_v46, 16 }
  0xe3   : > { %5193 = vmatpush1.bf16.msra.mxu0 %v7450_v5  ;;  %2521 = vmatprep.subr.bf16.mxu1 %v7455_v24  ;;  %v6064_v5 = vcombine.low %v7951_v14, %v7952_v63  ;;  %v7461_v24 = vld [vmem:[#allocation2 + $0x6e0] ss:$8 sps:$4 sm:$0xff]   ;;  %v7953_v14 = vld [vmem:[%s8302_s11 + $0x110] sm:$0xf] }
  0xe4   : > { %5194 = vmatprep.subr.bf16.mxu0 %v7458_v8  ;;  %2460 = vmatprep.mubr.bf16.mxu1 %v6065_v56  ;;  %v7464_v8 = vld [vmem:[#allocation2 + $0x920] ss:$8 sps:$4 sm:$0xff]   ;;  %v8851_v56 = vcombine.low %v8694_v13, %v8752_v16  ;;  %v843_v13 = vrot.slane %v841_v52, 1  ;;  %v7467_v16 = vld [vmem:[#allocation2 + $0x6f0] ss:$8 sps:$4 sm:$0xff]  }
  0xe5   : > { %4208 = vmatprep.mubr.bf16.mxu0 %v9986_v54  ;;  %v7954_v63 = vld [vmem:[%s8302_s11 + $0x128] sm:$0xf] }
  0xe6   : > { %2522 = vmatpush1.bf16.msra.mxu1 %v7453_v1  ;;  %9995 = vst [vmem:[#allocation62_spill] sm:$0xff] %v8851_v56  ;;  %v822_v1 = vrot.slane %v820_v25, 1 }
  0xe7   : > { %5195 = vmatpush1.bf16.msra.mxu0 %v7456_v61  ;;  %2523 = vmatprep.subr.bf16.mxu1 %v7463_v37  ;;  %v839_v61 = vshrl.u32 %v8831_v41, 16  ;;  %v883_v37 = vshll.u32 %v8858_v42, 16 }
  0xe8   : > { %5196 = vmatprep.subr.bf16.mxu0 %v7466_v23  ;;  %v7474_v23 = vld [vmem:[#allocation2 + $0x700] ss:$8 sps:$4 sm:$0xff]   ;;  %v8867_v25 = vor.u32 %v822_v1, %v818_v30  ;;  %v8885_v30 = vcombine.low %v8754_v44, %v8792_v0  ;;  %v7485_v1 = vld [vmem:[#allocation2 + $0x954] ss:$8 sps:$4 sm:$0xff]   ;;  %v8898_v0 = vcombine.low %v8589_v28, %v8834_v53 }
  0xe9   : > { %2461 = vmatmul.mubr.bf16.gmra.mrb[12].mxu1 %v6064_v5  ;;  %v8869_v52 = vor.u32 %v843_v13, %v839_v61  ;;  %v6073_v5 = vcombine.low %v7953_v14, %v7954_v63  ;;  %v864_v61 = vrot.slane %v862_v35, 1  ;;  %v881_v13 = vshrl.u32 %v8858_v42, 16  ;;  %v7490_v35 = vld [vmem:[#allocation2 + $0x724] ss:$8 sps:$4 sm:$0xff]  }
  0xea   : > { %4209 = vmatmul.mubr.bf16.gmra.mrb[36].mxu0 %v8326_v59  ;;  %2524 = vmatpush1.bf16.msra.mxu1 %v7461_v24  ;;  %v8874_v24 = vld [vmem:[%s8302_s11 + $0x1bc] sm:$0x11]  ;;  %v9997_v59 = vrot.slane %v8631_v7, 1  ;;  %v9999_v14 = vrot.slane %v8667_v6, 1  ;;  %v245_v6 = vld [vmem:[%s8302_s11 + $0xf8] sm:$0xf] }
  0xeb   : > { %5197 = vmatpush1.bf16.msra.mxu0 %v7464_v8  ;;  %2525 = vmatprep.subr.bf16.mxu1 %v7469_v43  ;;  %v7477_v8 = vld [vmem:[#allocation2 + $0x940] ss:$8 sps:$4 sm:$0xff]   ;;  %v7482_v43 = vld [vmem:[#allocation2 + $0x714] ss:$8 sps:$4 sm:$0xff]   ;;  %v6083_v44 = vcombine.low %v8867_v25, %v8869_v52 }
  0xec   : > { %5198 = vmatprep.subr.bf16.mxu0 %v7472_v39  ;;  %2470 = vmatprep.mubr.bf16.mxu1 %v6074_v4  ;;  %v860_v39 = vshrl.u32 %v8855_v46, 16  ;;  %v9996_v4 = vrot.slane %v8677_v51, 1 }
  0xed   : > { %4218 = vmatprep.mubr.bf16.mxu0 %v9986_v54 }
  0xee   : > { %2526 = vmatpush1.bf16.msra.mxu1 %v7467_v16  ;;  %v8881_v34 = vcombine.low %v9997_v59, %v9996_v4  ;;  %v885_v16 = vrot.slane %v883_v37, 1  ;;  %v7480_v59 = vld [vmem:[#allocation2 + $0x710] ss:$8 sps:$4 sm:$0xff]   ;;  %v7493_v37 = vld [vmem:[#allocation2 + $0x964] ss:$8 sps:$4 sm:$0xff]   ;;  %v8907_v28 = vor.u32 %v864_v61, %v860_v39 }
  0xef   : > { %5199 = vmatpush1.bf16.msra.mxu0 %v7470_v57  ;;  %2527 = vmatprep.subr.bf16.mxu1 %v7476_v21  ;;  %v9998_v57 = vrot.slane %v8702_v47, 1  ;;  %v8902_v21 = vcombine.low %v8594_v15, %v8874_v24  ;;  %v7483_v47 = vld [vmem:[#allocation2 + $0x950] ss:$8 sps:$4 sm:$0xff]   ;;  %v904_v15 = vshll.u32 %v8898_v0, 16  ;;  %v7955_v4 = vld [vmem:[%s8302_s11 + $0x140] sm:$0xf] }
  0xf0   : > { %5200 = vmatprep.subr.bf16.mxu0 %v7479_v17  ;;  %v247_v17 = vld [vmem:[%s8302_s11 + $0x104] sm:$0x1]  ;;  %v8909_v53 = vor.u32 %v885_v16, %v881_v13  ;;  %v7496_v39 = vld [vmem:[#allocation2 + $0x734] ss:$8 sps:$4 sm:$0xff]   ;;  %v902_v16 = vshrl.u32 %v8898_v0, 16 }
  0xf1   : > { %v8892_v63 = vcombine.low %v9999_v14, %v9998_v57  ;;  %10000 = vst [vmem:[#allocation63_spill] sm:$0xff] %v8902_v21  ;;  %2471 = vmatmul.mubr.bf16.gmra.mrb[16].mxu1 %v6073_v5  ;;  %v925_v5 = vshll.u32 %v8902_v21, 16  ;;  %v8916_v57 = vcombine.low %v245_v6, %v247_v17  ;;  %v7499_v61 = vld [vmem:[#allocation2 + $0x974] ss:$8 sps:$4 sm:$0xff]   ;;  %v906_v14 = vrot.slane %v904_v15, 1 }
  0xf2   : > { %4219 = vmatmul.mubr.bf16.gmra.mrb[40].mxu0 %v8338_v10  ;;  %2528 = vmatpush1.bf16.msra.mxu1 %v7474_v23  ;;  %v7956_v23 = vld [vmem:[%s8302_s11 + $0x158] sm:$0xf]  ;;  %v6092_v13 = vcombine.low %v8907_v28, %v8909_v53  ;;  %v7505_v17 = vld [vmem:[#allocation2 + $0x744] ss:$8 sps:$4 sm:$0xff]  }
  0xf3   : > { %5201 = vmatpush1.bf16.msra.mxu0 %v7477_v8  ;;  %2529 = vmatprep.subr.bf16.mxu1 %v7482_v43  ;;  %v6082_v8 = vcombine.low %v7955_v4, %v7956_v23  ;;  %10001 = vst [vmem:[#allocation64_spill] sm:$0xff] %v8916_v57  ;;  %v7488_v43 = vld [vmem:[#allocation2 + $0x720] ss:$8 sps:$4 sm:$0xff]   ;;  %v927_v10 = vrot.slane %v925_v5, 1  ;;  %v7497_v6 = vld [vmem:[#allocation2 + $0x970] ss:$8 sps:$4 sm:$0xff]   ;;  %v8926_v15 = vor.u32 %v906_v14, %v902_v16 }
  0xf4   : > { %5202 = vmatprep.subr.bf16.mxu0 %v7485_v1  ;;  %2480 = vmatprep.mubr.bf16.mxu1 %v6083_v44  ;;  %v7491_v1 = vld [vmem:[#allocation2 + $0x960] ss:$8 sps:$4 sm:$0xff]   ;;  %v923_v44 = vshrl.u32 %v8902_v21, 16  ;;  %v603_v4 = vshll.u32 %v8310_v36, 16  ;;  %v7957_v23 = vld [vmem:[%s8302_s11 + $0x170] sm:$0xf] }
  0xf5   : > { %4228 = vmatprep.mubr.bf16.mxu0 %v9986_v54  ;;  %v7512_v16 = vld [vmem:[#allocation2 + $0x754] ss:$8 sps:$4 sm:$0xff]  }
  0xf6   : > { %2530 = vmatpush1.bf16.msra.mxu1 %v7480_v59  ;;  %v996_v59 = vrot.slane %v8916_v57, 1  ;;  %v8928_v5 = vor.u32 %v927_v10, %v923_v44  ;;  %v8938_v10 = vcombine.low %v8843_v58, %v8867_v25  ;;  %v7515_v14 = vld [vmem:[#allocation2 + $0x994] ss:$8 sps:$4 sm:$0xff]   ;;  %v7510_v58 = vld [vmem:[#allocation2 + $0x750] ss:$8 sps:$4 sm:$0xff]  }
  0xf7   : > { %5203 = vmatpush1.bf16.msra.mxu0 %v7483_v47  ;;  %2531 = vmatprep.subr.bf16.mxu1 %v7490_v35  ;;  %v7494_v47 = vld [vmem:[#allocation2 + $0x730] ss:$8 sps:$4 sm:$0xff]   ;;  %v7509_v35 = vld [vmem:[#allocation2 + $0x984] ss:$8 sps:$4 sm:$0xff]  }
  0xf8   : > { %5204 = vmatprep.subr.bf16.mxu0 %v7493_v37  ;;  %v582_v37 = vshll.u32 %v8308_v33, 16  ;;  %v7513_v25 = vld [vmem:[#allocation2 + $0x990] ss:$8 sps:$4 sm:$0xff]  }
  0xf9   : > { %2481 = vmatmul.mubr.bf16.gmra.mrb[20].mxu1 %v6082_v8  ;;  %v7958_v8 = vld [vmem:[%s8302_s11 + $0x188] sm:$0xf] }
  0xfa   : > { %4229 = vmatmul.mubr.bf16.gmra.mrb[44].mxu0 %v8354_v29  ;;  %2532 = vmatpush1.bf16.msra.mxu1 %v7488_v43  ;;  %v6091_v43 = vcombine.low %v7957_v23, %v7958_v8  ;;  %v580_v29 = vshrl.u32 %v8308_v33, 16  ;;  %v584_v44 = vrot.slane %v582_v37, 1  ;;  %v6101_v23 = vcombine.low %v8926_v15, %v8928_v5  ;;  %v242_v8 = vld [vmem:[%s8302_s11 + $0xe4] sm:$0x11] }
  0xfb   : > { %5205 = vmatpush1.bf16.msra.mxu0 %v7491_v1  ;;  %2533 = vmatprep.subr.bf16.mxu1 %v7496_v39  ;;  %v10002_v1 = vrot.slane %v8369_v45, 1  ;;  %v575_v33 = vshll.u32 %v8449_v27, 16 }
  0xfc   : > { %5206 = vmatprep.subr.bf16.mxu0 %v7499_v61  ;;  %2490 = vmatprep.mubr.bf16.mxu1 %v6092_v13  ;;  %v7503_v61 = vld [vmem:[#allocation2 + $0x740] ss:$8 sps:$4 sm:$0xff]   ;;  %v8951_v37 = vor.u32 %v584_v44, %v580_v29  ;;  %v7527_v29 = vld [vmem:[#allocation2 + $0x774] ss:$8 sps:$4 sm:$0xff]  }
  0xfd   : > { %4238 = vmatprep.mubr.bf16.mxu0 %v9986_v54  ;;  %v6295_v39 = vcombine.low %v996_v59, %v10002_v1  ;;  %v7507_v13 = vld [vmem:[#allocation2 + $0x980] ss:$8 sps:$4 sm:$0xff]   ;;  %v601_v59 = vshrl.u32 %v8310_v36, 16  ;;  %v7524_v36 = vld [vmem:[#allocation2 + $0x9a4] ss:$8 sps:$4 sm:$0xff]   ;;  %v624_v1 = vshll.u32 %v8320_v49, 16 }
  0xfe   : > { %2534 = vmatpush1.bf16.msra.mxu1 %v7494_v47  ;;  %v605_v47 = vrot.slane %v603_v4, 1  ;;  %10004 = vst [vmem:[#allocation66_spill] sm:$0xff] %v8951_v37  ;;  %v573_v4 = vshrl.u32 %v8449_v27, 16  ;;  %v8963_v27 = vcombine.low %v8869_v52, %v8907_v28  ;;  %v7530_v44 = vld [vmem:[#allocation2 + $0x9b4] ss:$8 sps:$4 sm:$0xff]   ;;  %v638_v52 = vshll.u32 %v8526_v19, 16 }
  0xff   : > { %5207 = vmatpush1.bf16.msra.mxu0 %v7497_v6  ;;  %2535 = vmatprep.subr.bf16.mxu1 %v7505_v17  ;;  %v8944_v6 = vld [vmem:[%s8302_s11 + $0xd8] sm:$0xff]  ;;  %v7533_v28 = vld [vmem:[#allocation2 + $0x784] ss:$8 sps:$4 sm:$0xff]  }
 0x100   : > { %5208 = vmatprep.subr.bf16.mxu0 %v7509_v35  ;;  %v8949_v17 = vcombine.high %v8944_v6, %v242_v8  ;;  %v7521_v35 = vld [vmem:[#allocation2 + $0x764] ss:$8 sps:$4 sm:$0xff]   ;;  %v577_v8 = vrot.slane %v575_v33, 1  ;;  %v643_v33 = vshrl.u32 %v8322_v50, 16 }
 0x101   : > { %2491 = vmatmul.mubr.bf16.gmra.mrb[24].mxu1 %v6091_v43  ;;  %v8955_v43 = vor.u32 %v605_v47, %v601_v59  ;;  %v626_v47 = vrot.slane %v624_v1, 1 }
 0x102   : > { %4239 = vmatmul.mubr.bf16.gmra.mrb[48].mxu0 %v6295_v39  ;;  %10003 = vst [vmem:[#allocation65_spill] sm:$0xff] %v8949_v17  ;;  %2536 = vmatpush1.bf16.msra.mxu1 %v7503_v61  ;;  %v645_v39 = vshll.u32 %v8322_v50, 16  ;;  %v7959_v61 = vld [vmem:[%s8302_s11 + $0x1a0] sm:$0xf]  ;;  %v687_v50 = vshll.u32 %v8335_v3, 16 }
 0x103   : > { %5209 = vmatpush1.bf16.msra.mxu0 %v7507_v13  ;;  %2537 = vmatprep.subr.bf16.mxu1 %v7512_v16  ;;  %v7960_v13 = vld [vmem:[%s8302_s11 + $0x1b8] sm:$0xf]  ;;  %v7519_v16 = vld [vmem:[#allocation2 + $0x760] ss:$8 sps:$4 sm:$0xff]   ;;  %v6040_v59 = vcombine.low %v8951_v37, %v8955_v43  ;;  %v7562_v37 = vld [vmem:[#allocation2 + $0xa04] ss:$8 sps:$4 sm:$0xff]  }
 0x104   : > { %5210 = vmatprep.subr.bf16.mxu0 %v7515_v14  ;;  %2500 = vmatprep.mubr.bf16.mxu1 %v6101_v23  ;;  %v6100_v57 = vcombine.low %v7959_v61, %v7960_v13  ;;  %v7522_v14 = vld [vmem:[#allocation2 + $0x9a0] ss:$8 sps:$4 sm:$0xff]   ;;  %v622_v23 = vshrl.u32 %v8320_v49, 16  ;;  %v647_v61 = vrot.slane %v645_v39, 1  ;;  %v8970_v13 = vor.u32 %v577_v8, %v573_v4 }
 0x105   : > { %4248 = vmatprep.mubr.bf16.mxu0 %v9986_v54  ;;  %v666_v49 = vshll.u32 %v8332_v2, 16  ;;  %v636_v4 = vshrl.u32 %v8526_v19, 16  ;;  %v7531_v39 = vld [vmem:[#allocation2 + $0x780] ss:$8 sps:$4 sm:$0xff]   ;;  %v685_v19 = vshrl.u32 %v8335_v3, 16 }
 0x106   : > { %2538 = vmatpush1.bf16.msra.mxu1 %v7510_v58  ;;  %v7525_v58 = vld [vmem:[#allocation2 + $0x770] ss:$8 sps:$4 sm:$0xff]   ;;  %10005 = vst [vmem:[#allocation67_spill] sm:$0xff] %v8970_v13  ;;  %v6039_v1 = vcombine.low %v8970_v13, %v8705_v40  ;;  %v7534_v8 = vld [vmem:[#allocation2 + $0x9c0] ss:$8 sps:$4 sm:$0xff]  }
 0x107   : > { %5211 = vmatpush1.bf16.msra.mxu0 %v7513_v25  ;;  %2539 = vmatprep.subr.bf16.mxu1 %v7521_v35  ;;  %v7528_v25 = vld [vmem:[#allocation2 + $0x9b0] ss:$8 sps:$4 sm:$0xff]   ;;  %v7536_v35 = vld [vmem:[#allocation2 + $0x9c4] ss:$8 sps:$4 sm:$0xff]  }
 0x108   : > { %5212 = vmatprep.subr.bf16.mxu0 %v7524_v36  ;;  %v8978_v36 = vor.u32 %v647_v61, %v643_v33  ;;  %v659_v33 = vshll.u32 %v8529_v60, 16  ;;  %v680_v61 = vshll.u32 %v8579_v9, 16  ;;  %v7545_v3 = vld [vmem:[#allocation2 + $0x7a4] ss:$8 sps:$4 sm:$0xff]  }
 0x109   : > { %2501 = vmatmul.mubr.bf16.gmra.mrb[28].mxu1 %v6100_v57  ;;  %v8976_v57 = vor.u32 %v626_v47, %v622_v23  ;;  %v8986_v23 = vcombine.low %v8909_v53, %v8926_v15  ;;  %v689_v47 = vrot.slane %v687_v50, 1  ;;  %v7537_v53 = vld [vmem:[#allocation2 + $0x790] ss:$8 sps:$4 sm:$0xff]   ;;  %v7558_v13 = vld [vmem:[#allocation2 + $0x7c4] ss:$8 sps:$4 sm:$0xff]  }
 0x10a   : > { %4249 = vmatmul.mubr.bf16.gmra.mrb[52].mxu0 %v8395_v12  ;;  %2540 = vmatpush1.bf16.msra.mxu1 %v7519_v16  ;;  %v640_v16 = vrot.slane %v638_v52, 1  ;;  %v7540_v15 = vld [vmem:[#allocation2 + $0x9d0] ss:$8 sps:$4 sm:$0xff]   ;;  %v9005_v12 = vld [vmem:[%s8302_s11 + $0xc0] sm:$0xff] }
 0x10b   : > { %5213 = vmatpush1.bf16.msra.mxu0 %v7522_v14  ;;  %2541 = vmatprep.subr.bf16.mxu1 %v7527_v29  ;;  %v7539_v14 = vld [vmem:[#allocation2 + $0x794] ss:$8 sps:$4 sm:$0xff]   ;;  %v664_v29 = vshrl.u32 %v8332_v2, 16  ;;  %v6049_v40 = vcombine.low %v8976_v57, %v8978_v36  ;;  %v708_v2 = vshll.u32 %v8345_v18, 16  ;;  %v9000_v50 = vor.u32 %v689_v47, %v685_v19  ;;  %v9018_v47 = vld [vmem:[%s8302_s11 + $0x1c8] sm:$0xff] }
 0x10c   : > { %5214 = vmatprep.subr.bf16.mxu0 %v7530_v44  ;;  %2543 = vmatprep.mubr.bf16.mxu1 %v6040_v59  ;;  %v668_v44 = vrot.slane %v666_v49, 1  ;;  %v7542_v59 = vld [vmem:[#allocation2 + $0x9d4] ss:$8 sps:$4 sm:$0xff]  }
 0x10d   : > { %4258 = vmatprep.mubr.bf16.mxu0 %v9986_v54  ;;  %10009 = vst [vmem:[#allocation69_spill] sm:$0xff] %v9000_v50 }
 0x10e   : > { %2542 = vmatpush1.bf16.msra.mxu1 %v7525_v58  ;;  %v10006_v58 = vld [vmem:[#allocation21_spill] sm:$0xff]  ;;  %v8997_v52 = vor.u32 %v668_v44, %v664_v29  ;;  %v7546_v29 = vld [vmem:[#allocation2 + $0x9e0] ss:$8 sps:$4 sm:$0xff]  }
 0x10f   : > { %5215 = vmatpush1.bf16.msra.mxu0 %v7528_v25  ;;  %2624 = vmatprep.subr.bf16.mxu1 %v7533_v28  ;;  %v8995_v25 = vor.u32 %v640_v16, %v636_v4  ;;  %v10008_v28 = vld [vmem:[#allocation13_spill] sm:$0xff]  ;;  %v9009_v4 = vcombine.high %v9005_v12, %v8716_v55  ;;  %v682_v16 = vrot.slane %v680_v61, 1 }
 0x110   : > { %5216 = vmatprep.subr.bf16.mxu0 %v7536_v35  ;;  %v729_v49 = vshll.u32 %v10008_v28, 16  ;;  %v7548_v35 = vld [vmem:[#allocation2 + $0x9e4] ss:$8 sps:$4 sm:$0xff]   ;;  %v10011_v44 = vld [vmem:[#allocation37_spill] sm:$0xff]  ;;  %v727_v55 = vshrl.u32 %v10008_v28, 16 }
 0x111   : > { %2544 = vmatmul.mubr.bf16.vlgmr.msra.gmra.mrb[0].mxu1 %v6039_v1  ;;  %10007 = vst [vmem:[#allocation68_spill] sm:$0xff] %v8995_v25  ;;  %v657_v1 = vshrl.u32 %v8529_v60, 16  ;;  %10010 = vst [vmem:[#allocation70_spill] sm:$0xff] %v9009_v4  ;;  %v6048_v60 = vcombine.low %v8707_v20, %v8995_v25  ;;  %v722_v61 = vshll.u32 %v9009_v4, 16  ;;  %v7549_v28 = vld [vmem:[#allocation2 + $0x7b0] ss:$8 sps:$4 sm:$0xff]  }
 0x112   : > { %4259 = vmatmul.mubr.bf16.gmra.mrb[56].mxu0 %v10006_v58  ;;  %2625 = vmatpush1.bf16.msra.mxu1 %v7531_v39  ;;  %v706_v58 = vshrl.u32 %v8345_v18, 16  ;;  %v661_v39 = vrot.slane %v659_v33, 1  ;;  %v7543_v18 = vld [vmem:[#allocation2 + $0x7a0] ss:$8 sps:$4 sm:$0xff]   ;;  %v731_v19 = vrot.slane %v729_v49, 1 }
 0x113   : > { %5217 = vmatpush1.bf16.msra.mxu0 %v7534_v8  ;;  %2626 = vmatprep.subr.bf16.mxu1 %v7539_v14  ;;  %v678_v8 = vshrl.u32 %v8579_v9, 16  ;;  %v710_v14 = vrot.slane %v708_v2, 1  ;;  %v7551_v9 = vld [vmem:[#allocation2 + $0x7b4] ss:$8 sps:$4 sm:$0xff]   ;;  %v6058_v2 = vcombine.low %v8997_v52, %v9000_v50 }
 0x114   : > { %5218 = vmatprep.subr.bf16.mxu0 %v7542_v59  ;;  %2553 = vmatprep.mubr.bf16.mxu1 %v6049_v40  ;;  %v701_v59 = vshll.u32 %v10011_v44, 16  ;;  %v282_v40 = vld [vmem:[%s8302_s11 + $0x1d4] sm:$0x11] }
 0x115   : > { %4268 = vmatprep.mubr.bf16.mxu0 %v9986_v54  ;;  %v7554_v33 = vld [vmem:[#allocation2 + $0x9f4] ss:$8 sps:$4 sm:$0xff]   ;;  %v9023_v20 = vcombine.high %v9018_v47, %v282_v40  ;;  %v9030_v49 = vor.u32 %v682_v16, %v678_v8  ;;  %v7552_v54 = vld [vmem:[#allocation2 + $0x9f0] ss:$8 sps:$4 sm:$0xff]   ;;  %v720_v40 = vshrl.u32 %v9009_v4, 16  ;;  %v792_v8 = vshll.u32 %v8369_v45, 16 }
 0x116   : > { %2627 = vmatpush1.bf16.msra.mxu1 %v7537_v53  ;;  %v10013_v53 = vld [vmem:[#allocation23_spill] sm:$0xff] }
 0x117   : > { %5219 = vmatpush1.bf16.msra.mxu0 %v7540_v15  ;;  %2628 = vmatprep.subr.bf16.mxu1 %v7545_v3  ;;  %10012 = vst [vmem:[#allocation37_spill] sm:$0xff] %v9023_v20  ;;  %v9028_v15 = vor.u32 %v661_v39, %v657_v1  ;;  %10015 = vst [vmem:[#allocation72_spill] sm:$0xff] %v9030_v49  ;;  %v699_v3 = vshrl.u32 %v10011_v44, 16  ;;  %v724_v1 = vrot.slane %v722_v61, 1  ;;  %v10018_v39 = vld [vmem:[#allocation26_spill] sm:$0xff]  ;;  %v10019_v16 = vld [vmem:[#allocation15_spill] sm:$0xff] }
 0x118   : > { %5220 = vmatprep.subr.bf16.mxu0 %v7548_v35  ;;  %v703_v35 = vrot.slane %v701_v59, 1  ;;  %v7556_v59 = vld [vmem:[#allocation2 + $0x7c0] ss:$8 sps:$4 sm:$0xff]   ;;  %v790_v61 = vshrl.u32 %v8369_v45, 16  ;;  %v811_v20 = vshrl.u32 %v10019_v16, 16 }
 0x119   : > { %2554 = vmatmul.mubr.bf16.gmra.mrb[4].mxu1 %v6048_v60  ;;  %10014 = vst [vmem:[#allocation71_spill] sm:$0xff] %v9028_v15  ;;  %v9034_v60 = vor.u32 %v710_v14, %v706_v58  ;;  %v7565_v58 = vld [vmem:[#allocation2 + $0x7d4] ss:$8 sps:$4 sm:$0xff]  }
 0x11a   : > { %4269 = vmatmul.mubr.bf16.gmra.mrb[60].mxu0 %v10013_v53  ;;  %2629 = vmatpush1.bf16.msra.mxu1 %v7543_v18  ;;  %v9036_v53 = vor.u32 %v731_v19, %v727_v55  ;;  %v813_v18 = vshll.u32 %v10019_v16, 16  ;;  %v7568_v14 = vld [vmem:[#allocation2 + $0xa14] ss:$8 sps:$4 sm:$0xff]   ;;  %v9045_v19 = vor.u32 %v703_v35, %v699_v3  ;;  %v7566_v3 = vld [vmem:[#allocation2 + $0xa10] ss:$8 sps:$4 sm:$0xff]  }
 0x11b   : > { %5221 = vmatpush1.bf16.msra.mxu0 %v7546_v29  ;;  %2630 = vmatprep.subr.bf16.mxu1 %v7551_v9  ;;  %10016 = vst [vmem:[#allocation73_spill] sm:$0xff] %v9034_v60  ;;  %v6057_v29 = vcombine.low %v9028_v15, %v9030_v49  ;;  %v7560_v9 = vld [vmem:[#allocation2 + $0xa00] ss:$8 sps:$4 sm:$0xff]   ;;  %v7573_v35 = vld [vmem:[#allocation2 + $0x7e4] ss:$8 sps:$4 sm:$0xff]   ;;  %v783_v49 = vshrl.u32 %v8631_v7, 16 }
 0x11c   : > { %5222 = vmatprep.subr.bf16.mxu0 %v7554_v33  ;;  %10017 = vst [vmem:[#allocation74_spill] sm:$0xff] %v9036_v53  ;;  %2563 = vmatprep.mubr.bf16.mxu1 %v6058_v2  ;;  %v6067_v55 = vcombine.low %v9034_v60, %v9036_v53  ;;  %10020 = vst [vmem:[#allocation26_spill] sm:$0xff] %v9045_v19  ;;  %v9047_v33 = vor.u32 %v724_v1, %v720_v40  ;;  %v794_v2 = vrot.slane %v792_v8, 1  ;;  %v7563_v53 = vld [vmem:[#allocation2 + $0x7d0] ss:$8 sps:$4 sm:$0xff]  }
 0x11d   : > { %5224 = vmatprep.mubr.bf16.mxu0 %v10018_v39  ;;  %v7577_v40 = vld [vmem:[#allocation2 + $0xa24] ss:$8 sps:$4 sm:$0xff]   ;;  %v10023_v1 = vld [vmem:[#allocation29_spill] sm:$0xff] }
 0x11e   : > { %2631 = vmatpush1.bf16.msra.mxu1 %v7549_v28  ;;  %10021 = vst [vmem:[#allocation15_spill] sm:$0xff] %v9047_v33  ;;  %v815_v28 = vrot.slane %v813_v18, 1  ;;  %v6066_v45 = vcombine.low %v9045_v19, %v9047_v33  ;;  %v9057_v8 = vor.u32 %v794_v2, %v790_v61  ;;  %v10026_v18 = vld [vmem:[#allocation16_spill] sm:$0xff]  ;;  %v7580_v61 = vld [vmem:[#allocation2 + $0x7f4] ss:$8 sps:$4 sm:$0xff]  }
 0x11f   : > { %5223 = vmatpush1.bf16.msra.mxu0 %v7552_v54  ;;  %2632 = vmatprep.subr.bf16.mxu1 %v7558_v13  ;;  %v10022_v54 = vld [vmem:[#allocation27_spill] sm:$0xff]  ;;  %v806_v13 = vshll.u32 %v8677_v51, 16  ;;  %v7583_v2 = vld [vmem:[#allocation2 + $0xa34] ss:$8 sps:$4 sm:$0xff]  }
 0x120   : > { %5305 = vmatprep.subr.bf16.mxu0 %v7562_v37  ;;  %v785_v37 = vshll.u32 %v8631_v7, 16  ;;  %10024 = vst [vmem:[#allocation27_spill] sm:$0xff] %v9057_v8  ;;  %v9059_v16 = vor.u32 %v815_v28, %v811_v20  ;;  %v7571_v33 = vld [vmem:[#allocation2 + $0x7e0] ss:$8 sps:$4 sm:$0xff]   ;;  %v832_v20 = vshrl.u32 %v10026_v18, 16 }
 0x121   : > { %2564 = vmatmul.mubr.bf16.gmra.mrb[8].mxu1 %v6057_v29  ;;  %v834_v29 = vshll.u32 %v10026_v18, 16  ;;  %v808_v17 = vrot.slane %v806_v13, 1  ;;  %v7581_v18 = vld [vmem:[#allocation2 + $0xa30] ss:$8 sps:$4 sm:$0xff]  }
 0x122   : > { %5225 = vmatmul.mubr.bf16.vlgmr.msra.gmra.mrb[32].mxu0 %v10022_v54  ;;  %2633 = vmatpush1.bf16.msra.mxu1 %v7556_v59  ;;  %10025 = vst [vmem:[#allocation29_spill] sm:$0xff] %v9059_v16  ;;  %v10027_v59 = vld [vmem:[#allocation17_spill] sm:$0xff]  ;;  %v6076_v28 = vcombine.low %v9057_v8, %v9059_v16  ;;  %v10031_v8 = vld [vmem:[#allocation19_spill] sm:$0xff] }
 0x123   : > { %5306 = vmatpush1.bf16.msra.mxu0 %v7560_v9  ;;  %2634 = vmatprep.subr.bf16.mxu1 %v7565_v58  ;;  %v855_v9 = vshll.u32 %v10027_v59, 16  ;;  %v787_v58 = vrot.slane %v785_v37, 1  ;;  %v836_v19 = vrot.slane %v834_v29, 1  ;;  %v853_v7 = vshrl.u32 %v10027_v59, 16  ;;  %v7587_v59 = vld [vmem:[#allocation2 + $0x804] ss:$8 sps:$4 sm:$0xff]  }
 0x124   : > { %5307 = vmatprep.subr.bf16.mxu0 %v7568_v14  ;;  %2573 = vmatprep.mubr.bf16.mxu1 %v6067_v55  ;;  %v804_v14 = vshrl.u32 %v8677_v51, 16  ;;  %v7575_v55 = vld [vmem:[#allocation2 + $0xa20] ss:$8 sps:$4 sm:$0xff]   ;;  %v876_v29 = vshll.u32 %v10031_v8, 16  ;;  %v874_v25 = vshrl.u32 %v10031_v8, 16 }
 0x125   : > { %5234 = vmatprep.mubr.bf16.mxu0 %v10023_v1  ;;  %v857_v37 = vrot.slane %v855_v9, 1  ;;  %v10028_v51 = vld [vmem:[#allocation30_spill] sm:$0xff]  ;;  %v10032_v9 = vld [vmem:[#allocation20_spill] sm:$0xff] }
 0x126   : > { %2635 = vmatpush1.bf16.msra.mxu1 %v7563_v53  ;;  %v9070_v53 = vor.u32 %v787_v58, %v783_v49  ;;  %v9072_v13 = vor.u32 %v808_v17, %v804_v14  ;;  %v897_v16 = vshll.u32 %v10032_v9, 16  ;;  %v10033_v49 = vld [vmem:[#allocation32_spill] sm:$0xff]  ;;  %v9079_v17 = vor.u32 %v836_v19, %v832_v20  ;;  %v7597_v20 = vld [vmem:[#allocation2 + $0xa54] ss:$8 sps:$4 sm:$0xff]  }
 0x127   : > { %5308 = vmatpush1.bf16.msra.mxu0 %v7566_v3  ;;  %2636 = vmatprep.subr.bf16.mxu1 %v7573_v35  ;;  %v827_v3 = vshll.u32 %v8680_v32, 16  ;;  %v848_v35 = vshll.u32 %v8760_v22, 16  ;;  %v9081_v58 = vor.u32 %v857_v37, %v853_v7  ;;  %v846_v14 = vshrl.u32 %v8760_v22, 16  ;;  %v7595_v8 = vld [vmem:[#allocation2 + $0xa50] ss:$8 sps:$4 sm:$0xff]  }
 0x128   : > { %5309 = vmatprep.subr.bf16.mxu0 %v7577_v40  ;;  %10029 = vst [vmem:[#allocation16_spill] sm:$0xff] %v9070_v53  ;;  %10030 = vst [vmem:[#allocation17_spill] sm:$0xff] %v9072_v13  ;;  %v7578_v40 = vld [vmem:[#allocation2 + $0x7f0] ss:$8 sps:$4 sm:$0xff]   ;;  %v895_v19 = vshrl.u32 %v10032_v9, 16  ;;  %v878_v7 = vrot.slane %v876_v29, 1 }
 0x129   : > { %2574 = vmatmul.mubr.bf16.gmra.mrb[12].mxu1 %v6066_v45  ;;  %v7591_v45 = vld [vmem:[#allocation2 + $0xa44] ss:$8 sps:$4 sm:$0xff]   ;;  %10034 = vst [vmem:[#allocation30_spill] sm:$0xff] %v9079_v17  ;;  %10035 = vst [vmem:[#allocation19_spill] sm:$0xff] %v9081_v58  ;;  %v829_v50 = vrot.slane %v827_v3, 1  ;;  %v850_v60 = vrot.slane %v848_v35, 1  ;;  %v6085_v15 = vcombine.low %v9079_v17, %v9081_v58 }
 0x12a   : > { %5235 = vmatmul.mubr.bf16.gmra.mrb[36].mxu0 %v10028_v51  ;;  %2637 = vmatpush1.bf16.msra.mxu1 %v7571_v33  ;;  %v825_v33 = vshrl.u32 %v8680_v32, 16  ;;  %v899_v37 = vrot.slane %v897_v16, 1  ;;  %v869_v3 = vshll.u32 %v8801_v11, 16  ;;  %v10036_v35 = vld [vmem:[#allocation33_spill] sm:$0xff]  ;;  %v7604_v16 = vld [vmem:[#allocation2 + $0x824] ss:$8 sps:$4 sm:$0xff]   ;;  %v9100_v58 = vor.u32 %v878_v7, %v874_v25 }
 0x12b   : > { %5310 = vmatpush1.bf16.msra.mxu0 %v7575_v55  ;;  %2638 = vmatprep.subr.bf16.mxu1 %v7580_v61  ;;  %v6075_v55 = vcombine.low %v9070_v53, %v9072_v13  ;;  %v7585_v61 = vld [vmem:[#allocation2 + $0x800] ss:$8 sps:$4 sm:$0xff]   ;;  %v6468_v53 = vcombine.high %v9005_v12, %v8944_v6  ;;  %v7608_v9 = vld [vmem:[#allocation2 + $0xa64] ss:$8 sps:$4 sm:$0xff]   ;;  %v867_v13 = vshrl.u32 %v8801_v11, 16  ;;  %v6467_v25 = vcombine.low %v9005_v12, %v8944_v6 }
 0x12c   : > { %5311 = vmatprep.subr.bf16.mxu0 %v7583_v2  ;;  %2583 = vmatprep.mubr.bf16.mxu1 %v6076_v28  ;;  %v7589_v2 = vld [vmem:[#allocation2 + $0xa40] ss:$8 sps:$4 sm:$0xff]   ;;  %v7594_v28 = vld [vmem:[#allocation2 + $0x814] ss:$8 sps:$4 sm:$0xff]   ;;  %v911_v17 = vshll.u32 %v8838_v48, 16 }
 0x12d   : > { %5244 = vmatprep.mubr.bf16.mxu0 %v10033_v49 }
 0x12e   : > { %2639 = vmatpush1.bf16.msra.mxu1 %v7578_v40  ;;  %v7592_v40 = vld [vmem:[#allocation2 + $0x810] ss:$8 sps:$4 sm:$0xff]  }
 0x12f   : > { %5312 = vmatpush1.bf16.msra.mxu0 %v7581_v18  ;;  %2640 = vmatprep.subr.bf16.mxu1 %v7587_v59  ;;  %v9095_v18 = vor.u32 %v829_v50, %v825_v33  ;;  %v9097_v59 = vor.u32 %v850_v60, %v846_v14  ;;  %v871_v50 = vrot.slane %v869_v3, 1  ;;  %v10041_v33 = vld [vmem:[#allocation22_spill] sm:$0xff] }
 0x130   : > { %5313 = vmatprep.subr.bf16.mxu0 %v7591_v45  ;;  %v10039_v45 = vld [vmem:[#allocation59_spill] sm:$0xff]  ;;  %v918_v14 = vshll.u32 %v10041_v33, 16  ;;  %v7614_v3 = vld [vmem:[#allocation2 + $0xa74] ss:$8 sps:$4 sm:$0xff]  }
 0x131   : > { %2584 = vmatmul.mubr.bf16.gmra.mrb[16].mxu1 %v6075_v55  ;;  %10037 = vst [vmem:[#allocation20_spill] sm:$0xff] %v9095_v18  ;;  %10038 = vst [vmem:[#allocation32_spill] sm:$0xff] %v9097_v59  ;;  %v890_v29 = vshll.u32 %v10039_v45, 16  ;;  %v9102_v55 = vor.u32 %v899_v37, %v895_v19  ;;  %v888_v60 = vshrl.u32 %v10039_v45, 16  ;;  %v7606_v19 = vld [vmem:[#allocation2 + $0xa60] ss:$8 sps:$4 sm:$0xff]  }
 0x132   : > { %5245 = vmatmul.mubr.bf16.gmra.mrb[40].mxu0 %v10036_v35  ;;  %2641 = vmatpush1.bf16.msra.mxu1 %v7585_v61  ;;  %v10042_v61 = vld [vmem:[#allocation24_spill] sm:$0xff]  ;;  %v920_v12 = vrot.slane %v918_v14, 1  ;;  %v909_v14 = vshrl.u32 %v8838_v48, 16 }
 0x133   : > { %5314 = vmatpush1.bf16.msra.mxu0 %v7589_v2  ;;  %2642 = vmatprep.subr.bf16.mxu1 %v7594_v28  ;;  %10040 = vst [vmem:[#allocation33_spill] sm:$0xff] %v9102_v55  ;;  %v939_v2 = vshll.u32 %v10042_v61, 16  ;;  %v6084_v28 = vcombine.low %v9095_v18, %v9097_v59  ;;  %v892_v7 = vrot.slane %v890_v29, 1  ;;  %v9113_v37 = vld [vmem:[%s8302_s11 + $0x1b0] sm:$0xff]  ;;  %v6094_v59 = vcombine.low %v9100_v58, %v9102_v55  ;;  %v7620_v55 = vld [vmem:[#allocation2 + $0x844] ss:$8 sps:$4 sm:$0xff]  }
 0x134   : > { %5315 = vmatprep.subr.bf16.mxu0 %v7597_v20  ;;  %2593 = vmatprep.mubr.bf16.mxu1 %v6085_v15  ;;  %v7602_v20 = vld [vmem:[#allocation2 + $0x820] ss:$8 sps:$4 sm:$0xff]   ;;  %v9117_v15 = vcombine.high %v9113_v37, %v8874_v24  ;;  %v916_v18 = vshrl.u32 %v10041_v33, 16  ;;  %v937_v6 = vshrl.u32 %v10042_v61, 16  ;;  %v7609_v24 = vld [vmem:[#allocation2 + $0x830] ss:$8 sps:$4 sm:$0xff]  }
 0x135   : > { %5254 = vmatprep.mubr.bf16.mxu0 %v6468_v53  ;;  %v7611_v53 = vld [vmem:[#allocation2 + $0x834] ss:$8 sps:$4 sm:$0xff]   ;;  %v941_v29 = vrot.slane %v939_v2, 1  ;;  %v7624_v33 = vld [vmem:[#allocation2 + $0xa84] ss:$8 sps:$4 sm:$0xff]  }
 0x136   : > { %2643 = vmatpush1.bf16.msra.mxu1 %v7592_v40  ;;  %v7612_v40 = vld [vmem:[#allocation2 + $0xa70] ss:$8 sps:$4 sm:$0xff]   ;;  %v7654_v61 = vld [vmem:[#allocation2 + $0xac4] ss:$8 sps:$4 sm:$0xff]  }
 0x137   : > { %5316 = vmatpush1.bf16.msra.mxu0 %v7595_v8  ;;  %2644 = vmatprep.subr.bf16.mxu1 %v7604_v16  ;;  %v9124_v8 = vor.u32 %v871_v50, %v867_v13  ;;  %v9126_v16 = vor.u32 %v892_v7, %v888_v60  ;;  %v10043_v2 = vld [vmem:[#allocation40_spill] sm:$0xff]  ;;  %v913_v13 = vrot.slane %v911_v17, 1  ;;  %v930_v50 = vshrl.u32 %v9117_v15, 16 }
 0x138   : > { %5317 = vmatprep.subr.bf16.mxu0 %v7608_v9  ;;  %v932_v9 = vshll.u32 %v9117_v15, 16  ;;  %v7625_v17 = vld [vmem:[#allocation2 + $0x850] ss:$8 sps:$4 sm:$0xff]  }
 0x139   : > { %2594 = vmatmul.mubr.bf16.gmra.mrb[20].mxu1 %v6084_v28  ;;  %v9131_v28 = vor.u32 %v920_v12, %v916_v18  ;;  %v6093_v60 = vcombine.low %v9124_v8, %v9126_v16  ;;  %v9141_v12 = vor.u32 %v913_v13, %v909_v14 }
 0x13a   : > { %5255 = vmatmul.mubr.bf16.gmra.mrb[44].mxu0 %v6467_v25  ;;  %2645 = vmatpush1.bf16.msra.mxu1 %v7602_v20  ;;  %v9133_v25 = vor.u32 %v941_v29, %v937_v6  ;;  %v7618_v20 = vld [vmem:[#allocation2 + $0x840] ss:$8 sps:$4 sm:$0xff]   ;;  %v934_v7 = vrot.slane %v932_v9, 1  ;;  %v7628_v29 = vld [vmem:[#allocation2 + $0xa90] ss:$8 sps:$4 sm:$0xff]  }
 0x13b   : > { %5318 = vmatpush1.bf16.msra.mxu0 %v7606_v19  ;;  %2646 = vmatprep.subr.bf16.mxu1 %v7611_v53  ;;  %v7622_v19 = vld [vmem:[#allocation2 + $0xa80] ss:$8 sps:$4 sm:$0xff]   ;;  %v7627_v53 = vld [vmem:[#allocation2 + $0x854] ss:$8 sps:$4 sm:$0xff]  }
 0x13c   : > { %5319 = vmatprep.subr.bf16.mxu0 %v7614_v3  ;;  %2603 = vmatprep.mubr.bf16.mxu1 %v6094_v59  ;;  %v7630_v59 = vld [vmem:[#allocation2 + $0xa94] ss:$8 sps:$4 sm:$0xff]   ;;  %v6103_v18 = vcombine.low %v9131_v28, %v9133_v25  ;;  %v10044_v3 = vld [vmem:[#allocation43_spill] sm:$0xff]  ;;  %v9143_v6 = vor.u32 %v934_v7, %v930_v50 }
 0x13d   : > { %5264 = vmatprep.mubr.bf16.mxu0 %v10043_v2  ;;  %v10047_v9 = vld [vmem:[#allocation47_spill] sm:$0xff]  ;;  %v7646_v7 = vld [vmem:[#allocation2 + $0xab4] ss:$8 sps:$4 sm:$0xff]  }
 0x13e   : > { %2647 = vmatpush1.bf16.msra.mxu1 %v7609_v24  ;;  %10045 = vst [vmem:[#allocation59_spill] sm:$0xff] %v9143_v6  ;;  %v7636_v24 = vld [vmem:[#allocation2 + $0x864] ss:$8 sps:$4 sm:$0xff]   ;;  %v6102_v14 = vcombine.low %v9141_v12, %v9143_v6  ;;  %v7634_v50 = vld [vmem:[#allocation2 + $0x860] ss:$8 sps:$4 sm:$0xff]  }
 0x13f   : > { %5320 = vmatpush1.bf16.msra.mxu0 %v7612_v40  ;;  %2648 = vmatprep.subr.bf16.mxu1 %v7620_v55  ;;  %v7640_v55 = vld [vmem:[#allocation2 + $0xaa4] ss:$8 sps:$4 sm:$0xff]   ;;  %v10065_v6 = vld [vmem:[#allocation58_spill] sm:$0xff] }
 0x140   : > { %5321 = vmatprep.subr.bf16.mxu0 %v7624_v33 }
 0x141   : > { %2604 = vmatmul.mubr.bf16.gmra.mrb[24].mxu1 %v6093_v60  ;;  %v7638_v60 = vld [vmem:[#allocation2 + $0xaa0] ss:$8 sps:$4 sm:$0xff]  }
 0x142   : > { %5265 = vmatmul.mubr.bf16.gmra.mrb[48].mxu0 %v10044_v3  ;;  %2649 = vmatpush1.bf16.msra.mxu1 %v7618_v20 }
 0x143   : > { %5322 = vmatpush1.bf16.msra.mxu0 %v7622_v19  ;;  %2650 = vmatprep.subr.bf16.mxu1 %v7627_v53  ;;  %v7643_v19 = vld [vmem:[#allocation2 + $0x874] ss:$8 sps:$4 sm:$0xff]   ;;  %v10051_v53 = vld [vmem:[#allocation48_spill] sm:$0xff] }
 0x144   : > { %5323 = vmatprep.subr.bf16.mxu0 %v7630_v59  ;;  %2613 = vmatprep.mubr.bf16.mxu1 %v6103_v18  ;;  %v7641_v59 = vld [vmem:[#allocation2 + $0x870] ss:$8 sps:$4 sm:$0xff]  }
 0x145   : > { %v9145_v40 = vpop.f32.mrb[0].mxu0  ;;  %5274 = vmatprep.mubr.bf16.mxu0 %v10047_v9  ;;  %v7644_v18 = vld [vmem:[#allocation2 + $0xab0] ss:$8 sps:$4 sm:$0xff]  }
 0x146   : > { %10046 = vst [vmem:[#allocation22_spill] sm:$0xff] %v9145_v40  ;;  %v9148_v33 = vpop.f32.mrb[1].mxu0  ;;  %2651 = vmatpush1.bf16.msra.mxu1 %v7625_v17  ;;  %v7650_v17 = vld [vmem:[#allocation2 + $0x4] ss:$8 sps:$4 sm:$0xff]  }
 0x147   : > { %10048 = vst [vmem:[#allocation40_spill] sm:$0xff] %v9148_v33  ;;  %v9152_v13 = vpop.f32.mrb[2].mxu0  ;;  %5324 = vmatpush1.bf16.msra.mxu0 %v7628_v29  ;;  %2652 = vmatprep.subr.bf16.mxu1 %v7636_v24  ;;  %v10059_v33 = vld [vmem:[#allocation54_spill] sm:$0xff] }
 0x148   : > { %10049 = vst [vmem:[#allocation43_spill] sm:$0xff] %v9152_v13  ;;  %v9154_v20 = vpop.f32.mrb[3].mxu0  ;;  %5325 = vmatprep.subr.bf16.mxu0 %v7640_v55  ;;  %v10053_v13 = vld [vmem:[#allocation50_spill] sm:$0xff] }
 0x149   : > { %10050 = vst [vmem:[#allocation47_spill] sm:$0xff] %v9154_v20  ;;  %2614 = vmatmul.mubr.bf16.gmra.mrb[28].mxu1 %v6102_v14  ;;  %v10054_v20 = vld [vmem:[#allocation53_spill] sm:$0xff]  ;;  %v7648_v14 = vld [vmem:[#allocation2] ss:$8 sps:$4 sm:$0xff]  }
 0x14a   : > { %5275 = vmatmul.mubr.bf16.gmra.mrb[52].mxu0 %v10051_v53  ;;  %2653 = vmatpush1.bf16.msra.mxu1 %v7634_v50  ;;  %v7652_v50 = vld [vmem:[#allocation2 + $0xac0] ss:$8 sps:$4 sm:$0xff]  }
 0x14b   : > { %5326 = vmatpush1.bf16.msra.mxu0 %v7638_v60  ;;  %2654 = vmatprep.subr.bf16.mxu1 %v7643_v19  ;;  %v7657_v19 = vld [vmem:[#allocation2 + $0x14] ss:$8 sps:$4 sm:$0xff]  }
 0x14c   : > { %5327 = vmatprep.subr.bf16.mxu0 %v7646_v7  ;;  %2656 = vmatprep.mubr.bf16.mxu1 %v10053_v13  ;;  %v7660_v7 = vld [vmem:[#allocation2 + $0xad4] ss:$8 sps:$4 sm:$0xff]   ;;  %v10058_v13 = vld [vmem:[#allocation31_spill] sm:$0xff] }
 0x14d   : > { %v9157_v29 = vpop.f32.mrb[4].mxu0  ;;  %5284 = vmatprep.mubr.bf16.mxu0 %v10054_v20 }
 0x14e   : > { %10052 = vst [vmem:[#allocation48_spill] sm:$0xff] %v9157_v29  ;;  %v9161_v24 = vpop.f32.mrb[5].mxu0  ;;  %2655 = vmatpush1.bf16.msra.mxu1 %v7641_v59  ;;  %v6477_v29 = vcombine.high %v9113_v37, %v9018_v47  ;;  %v7655_v59 = vld [vmem:[#allocation2 + $0x10] ss:$8 sps:$4 sm:$0xff]  }
 0x14f   : > { %10055 = vst [vmem:[#allocation50_spill] sm:$0xff] %v9161_v24  ;;  %v9163_v55 = vpop.f32.mrb[6].mxu0  ;;  %5328 = vmatpush1.bf16.msra.mxu0 %v7644_v18  ;;  %3714 = vmatprep.subr.bf16.mxu1 %v7650_v17  ;;  %v7666_v18 = vld [vmem:[#allocation2 + $0x24] ss:$8 sps:$4 sm:$0xff]  }
 0x150   : > { %10056 = vst [vmem:[#allocation53_spill] sm:$0xff] %v9163_v55  ;;  %v9165_v60 = vpop.f32.mrb[7].mxu0  ;;  %5329 = vmatprep.subr.bf16.mxu0 %v7654_v61  ;;  %v7658_v55 = vld [vmem:[#allocation2 + $0xad0] ss:$8 sps:$4 sm:$0xff]   ;;  %v7670_v24 = vld [vmem:[#allocation2 + $0xae4] ss:$8 sps:$4 sm:$0xff]  }
 0x151   : > { %10057 = vst [vmem:[#allocation75_spill] sm:$0xff] %v9165_v60  ;;  %2657 = vmatmul.mubr.bf16.vlgmr.msra.gmra.mrb[0].mxu1 %v10058_v13  ;;  %v10061_v61 = vld [vmem:[#allocation57_spill] sm:$0xff]  ;;  %v6476_v13 = vcombine.low %v9113_v37, %v9018_v47 }
 0x152   : > { %5285 = vmatmul.mubr.bf16.gmra.mrb[56].mxu0 %v10059_v33  ;;  %3715 = vmatpush1.bf16.msra.mxu1 %v7648_v14  ;;  %v7664_v14 = vld [vmem:[#allocation2 + $0x20] ss:$8 sps:$4 sm:$0xff]   ;;  %v7671_v47 = vld [vmem:[#allocation2 + $0x30] ss:$8 sps:$4 sm:$0xff]  }
 0x153   : > { %5330 = vmatpush1.bf16.msra.mxu0 %v7652_v50  ;;  %3716 = vmatprep.subr.bf16.mxu1 %v7657_v19  ;;  %v7668_v50 = vld [vmem:[#allocation2 + $0xae0] ss:$8 sps:$4 sm:$0xff]   ;;  %v7674_v37 = vld [vmem:[#allocation2 + $0xaf0] ss:$8 sps:$4 sm:$0xff]  }
 0x154   : > { %5331 = vmatprep.subr.bf16.mxu0 %v7660_v7  ;;  %2666 = vmatprep.mubr.bf16.mxu1 %v10061_v61  ;;  %v7673_v7 = vld [vmem:[#allocation2 + $0x34] ss:$8 sps:$4 sm:$0xff]   ;;  %v10067_v61 = vld [vmem:[#allocation60_spill] sm:$0xff] }
 0x155   : > { %v9171_v60 = vpop.f32.mrb[8].mxu0  ;;  %5294 = vmatprep.mubr.bf16.mxu0 %v6477_v29  ;;  %v7679_v29 = vld [vmem:[#allocation2 + $0x44] ss:$8 sps:$4 sm:$0xff]  }
 0x156   : > { %10060 = vst [vmem:[#allocation31_spill] sm:$0xff] %v9171_v60  ;;  %v9174_v17 = vpop.f32.mrb[9].mxu0  ;;  %3717 = vmatpush1.bf16.msra.mxu1 %v7655_v59  ;;  %v7676_v60 = vld [vmem:[#allocation2 + $0xaf4] ss:$8 sps:$4 sm:$0xff]  }
 0x157   : > { %10062 = vst [vmem:[#allocation54_spill] sm:$0xff] %v9174_v17  ;;  %v9178_v40 = vpop.f32.mrb[10].mxu0  ;;  %5332 = vmatpush1.bf16.msra.mxu0 %v7658_v55  ;;  %3718 = vmatprep.subr.bf16.mxu1 %v7666_v18  ;;  %v7683_v55 = vld [vmem:[#allocation2 + $0xb04] ss:$8 sps:$4 sm:$0xff]   ;;  %v7963_v18 = vld [vmem:[%s8302_s11 + $0x38] sm:$0xf] }
 0x158   : > { %10063 = vst [vmem:[#allocation57_spill] sm:$0xff] %v9178_v40  ;;  %v9180_v19 = vpop.f32.mrb[11].mxu0  ;;  %5333 = vmatprep.subr.bf16.mxu0 %v7670_v24  ;;  %v7965_v24 = vld [vmem:[%s8302_s11 + $0xd8] sm:$0xff]  ;;  %v7966_v40 = vld [vmem:[%s8302_s11 + $0xe4] sm:$0x11] }
 0x159   : > { %10064 = vst [vmem:[#allocation76_spill] sm:$0xff] %v9180_v19  ;;  %2667 = vmatmul.mubr.bf16.gmra.mrb[4].mxu1 %v10065_v6  ;;  %v7689_v19 = vld [vmem:[#allocation2 + $0xb14] ss:$8 sps:$4 sm:$0xff]   ;;  %v9200_v17 = vcombine.low %v7965_v24, %v7966_v40  ;;  %v7692_v40 = vld [vmem:[#allocation2 + $0x64] ss:$8 sps:$4 sm:$0xff]  }
 0x15a   : > { %5295 = vmatmul.mubr.bf16.gmra.mrb[60].mxu0 %v6476_v13  ;;  %3719 = vmatpush1.bf16.msra.mxu1 %v7664_v14  ;;  %v7964_v13 = vld [vmem:[%s8302_s11 + $0x50] sm:$0xf]  ;;  %v7696_v24 = vld [vmem:[#allocation2 + $0xb24] ss:$8 sps:$4 sm:$0xff]  }
 0x15b   : > { %5334 = vmatpush1.bf16.msra.mxu0 %v7668_v50  ;;  %3720 = vmatprep.subr.bf16.mxu1 %v7673_v7  ;;  %v9192_v14 = vcombine.low %v7963_v18, %v7964_v13  ;;  %v7681_v7 = vld [vmem:[#allocation2 + $0xb00] ss:$8 sps:$4 sm:$0xff]   ;;  %v10072_v18 = vrot.slane %v10011_v44, 1 }
 0x15c   : > { %5335 = vmatprep.subr.bf16.mxu0 %v7676_v60  ;;  %2676 = vmatprep.mubr.bf16.mxu1 %v10067_v61  ;;  %v7677_v60 = vld [vmem:[#allocation2 + $0x40] ss:$8 sps:$4 sm:$0xff]   ;;  %v7686_v61 = vld [vmem:[#allocation2 + $0x54] ss:$8 sps:$4 sm:$0xff]  }
 0x15d   : > { %v9183_v59 = vpop.f32.mrb[12].mxu0  ;;  %5337 = vmatprep.mubr.bf16.mxu0 %v8819_v26 }
 0x15e   : > { %10066 = vst [vmem:[#allocation58_spill] sm:$0xff] %v9183_v59  ;;  %v9188_v6 = vpop.f32.mrb[13].mxu0  ;;  %3721 = vmatpush1.bf16.msra.mxu1 %v7671_v47  ;;  %v10073_v47 = vld [vmem:[#allocation52_spill] sm:$0xff] }
 0x15f   : > { %10068 = vst [vmem:[#allocation60_spill] sm:$0xff] %v9188_v6  ;;  %v9194_v50 = vpop.f32.mrb[14].mxu0  ;;  %5336 = vmatpush1.bf16.msra.mxu0 %v7674_v37  ;;  %3722 = vmatprep.subr.bf16.mxu1 %v7679_v29  ;;  %v10071_v6 = vrot.slane %v9009_v4, 1  ;;  %v9903_v37 = vrot.slane %v10073_v47, 1  ;;  %v7684_v29 = vld [vmem:[#allocation2 + $0x50] ss:$8 sps:$4 sm:$0xff]  }
 0x160   : > { %10069 = vst [vmem:[#allocation77_spill] sm:$0xff] %v9194_v50  ;;  %v9196_v59 = vpop.f32.mrb[15].mxu0  ;;  %5418 = vmatprep.subr.bf16.mxu0 %v7683_v55  ;;  %v7687_v55 = vld [vmem:[#allocation2 + $0xb10] ss:$8 sps:$4 sm:$0xff]   ;;  %v7968_v50 = vld [vmem:[%s8302_s11 + $0x80] sm:$0xf] }
 0x161   : > { %10070 = vst [vmem:[#allocation78_spill] sm:$0xff] %v9196_v59  ;;  %v6069_v13 = vcombine.low %v10072_v18, %v10071_v6  ;;  %2677 = vmatmul.mubr.bf16.gmra.mrb[8].mxu1 %v8826_v31  ;;  %v736_v31 = vshll.u32 %v9200_v17, 16  ;;  %v10076_v6 = vld [vmem:[#allocation39_spill] sm:$0xff]  ;;  %v734_v47 = vshrl.u32 %v9200_v17, 16 }
 0x162   : > { %5338 = vmatmul.mubr.bf16.vlgmr.msra.gmra.mrb[32].mxu0 %v9192_v14  ;;  %3723 = vmatpush1.bf16.msra.mxu1 %v7677_v60  ;;  %v10077_v60 = vrot.slane %v10076_v6, 1  ;;  %v7967_v18 = vld [vmem:[%s8302_s11 + $0x68] sm:$0xf] }
 0x163   : > { %5419 = vmatpush1.bf16.msra.mxu0 %v7681_v7  ;;  %3724 = vmatprep.subr.bf16.mxu1 %v7686_v61  ;;  %v9221_v61 = vcombine.low %v7967_v18, %v7968_v50  ;;  %v738_v6 = vrot.slane %v736_v31, 1  ;;  %v7697_v50 = vld [vmem:[#allocation2 + $0x70] ss:$8 sps:$4 sm:$0xff]  }
 0x164   : > { %5420 = vmatprep.subr.bf16.mxu0 %v7689_v19  ;;  %2686 = vmatprep.mubr.bf16.mxu1 %v6069_v13  ;;  %v6068_v7 = vcombine.low %v10077_v60, %v9903_v37  ;;  %v7690_v13 = vld [vmem:[#allocation2 + $0x60] ss:$8 sps:$4 sm:$0xff]   ;;  %v7709_v60 = vld [vmem:[#allocation2 + $0xb44] ss:$8 sps:$4 sm:$0xff]   ;;  %v7969_v18 = vld [vmem:[%s8302_s11 + $0x98] sm:$0xf] }
 0x165   : > { %v9209_v59 = vpop.f32.mrb[16].mxu0  ;;  %5347 = vmatprep.mubr.bf16.mxu0 %v8851_v56  ;;  %v7702_v56 = vld [vmem:[#allocation2 + $0xb34] ss:$8 sps:$4 sm:$0xff]   ;;  %v739_v31 = vor.u32 %v738_v6, %v734_v47  ;;  %v10084_v47 = vrot.slane %v8760_v22, 1  ;;  %v10085_v6 = vrot.slane %v8680_v32, 1 }
 0x166   : > { %10074 = vst [vmem:[#allocation79_spill] sm:$0xff] %v9209_v59  ;;  %v9213_v44 = vpop.f32.mrb[17].mxu0  ;;  %3725 = vmatpush1.bf16.msra.mxu1 %v7684_v29  ;;  %v7694_v59 = vld [vmem:[#allocation2 + $0xb20] ss:$8 sps:$4 sm:$0xff]   ;;  %v7700_v29 = vld [vmem:[#allocation2 + $0xb30] ss:$8 sps:$4 sm:$0xff]  }
 0x167   : > { %10075 = vst [vmem:[#allocation80_spill] sm:$0xff] %v9213_v44  ;;  %v9223_v19 = vpop.f32.mrb[18].mxu0  ;;  %5421 = vmatpush1.bf16.msra.mxu0 %v7687_v55  ;;  %3726 = vmatprep.subr.bf16.mxu1 %v7692_v40  ;;  %v7699_v44 = vld [vmem:[#allocation2 + $0x74] ss:$8 sps:$4 sm:$0xff]   ;;  %v7705_v55 = vld [vmem:[#allocation2 + $0x84] ss:$8 sps:$4 sm:$0xff]  }
 0x168   : > { %10078 = vst [vmem:[#allocation39_spill] sm:$0xff] %v9223_v19  ;;  %v9225_v4 = vpop.f32.mrb[19].mxu0  ;;  %5422 = vmatprep.subr.bf16.mxu0 %v7696_v24  ;;  %v7715_v24 = vld [vmem:[#allocation2 + $0xb54] ss:$8 sps:$4 sm:$0xff]   ;;  %v7723_v32 = vld [vmem:[#allocation2 + $0xb64] ss:$8 sps:$4 sm:$0xff]  }
 0x169   : > { %10079 = vst [vmem:[#allocation81_spill] sm:$0xff] %v9225_v4  ;;  %2687 = vmatmul.mubr.bf16.gmra.mrb[12].mxu1 %v6068_v7 }
 0x16a   : > { %5348 = vmatmul.mubr.bf16.gmra.mrb[36].mxu0 %v9221_v61  ;;  %3727 = vmatpush1.bf16.msra.mxu1 %v7690_v13  ;;  %v7970_v13 = vld [vmem:[%s8302_s11 + $0xb0] sm:$0xf] }
 0x16b   : > { %5423 = vmatpush1.bf16.msra.mxu0 %v7694_v59  ;;  %3728 = vmatprep.subr.bf16.mxu1 %v7699_v44  ;;  %v9238_v59 = vcombine.low %v7969_v18, %v7970_v13  ;;  %v7707_v44 = vld [vmem:[#allocation2 + $0xb40] ss:$8 sps:$4 sm:$0xff]   ;;  %v6470_v18 = vcombine.low %v8797_v62, %v739_v31  ;;  %v7718_v13 = vld [vmem:[#allocation2 + $0xa4] ss:$8 sps:$4 sm:$0xff]   ;;  %v7726_v62 = vld [vmem:[#allocation2 + $0xb4] ss:$8 sps:$4 sm:$0xff]  }
 0x16c   : > { %5424 = vmatprep.subr.bf16.mxu0 %v7702_v56  ;;  %2696 = vmatprep.mubr.bf16.mxu1 %v8881_v34  ;;  %v7703_v56 = vld [vmem:[#allocation2 + $0x80] ss:$8 sps:$4 sm:$0xff]   ;;  %v7712_v34 = vld [vmem:[#allocation2 + $0x94] ss:$8 sps:$4 sm:$0xff]  }
 0x16d   : > { %v9229_v40 = vpop.f32.mrb[20].mxu0  ;;  %5357 = vmatprep.mubr.bf16.mxu0 %v8885_v30 }
 0x16e   : > { %10080 = vst [vmem:[#allocation82_spill] sm:$0xff] %v9229_v40  ;;  %v9234_v7 = vpop.f32.mrb[21].mxu0  ;;  %3729 = vmatpush1.bf16.msra.mxu1 %v7697_v50  ;;  %v7710_v50 = vld [vmem:[#allocation2 + $0x90] ss:$8 sps:$4 sm:$0xff]  }
 0x16f   : > { %10081 = vst [vmem:[#allocation83_spill] sm:$0xff] %v9234_v7  ;;  %v9240_v37 = vpop.f32.mrb[22].mxu0  ;;  %5425 = vmatpush1.bf16.msra.mxu0 %v7700_v29  ;;  %3730 = vmatprep.subr.bf16.mxu1 %v7705_v55  ;;  %v6087_v7 = vcombine.low %v10085_v6, %v10084_v47  ;;  %v9904_v29 = vrot.slane %v8831_v41, 1  ;;  %v7713_v55 = vld [vmem:[#allocation2 + $0xb50] ss:$8 sps:$4 sm:$0xff]  }
 0x170   : > { %10082 = vst [vmem:[#allocation84_spill] sm:$0xff] %v9240_v37  ;;  %v9242_v40 = vpop.f32.mrb[23].mxu0  ;;  %5426 = vmatprep.subr.bf16.mxu0 %v7709_v60  ;;  %v9253_v60 = vld [vmem:[%s8302_s11 + $0xe0] sm:$0xf]  ;;  %v7971_v6 = vld [vmem:[%s8302_s11 + $0xc8] sm:$0xf] }
 0x171   : > { %10083 = vst [vmem:[#allocation85_spill] sm:$0xff] %v9242_v40  ;;  %2697 = vmatmul.mubr.bf16.gmra.mrb[16].mxu1 %v8892_v63  ;;  %v7729_v63 = vld [vmem:[#allocation2 + $0xb74] ss:$8 sps:$4 sm:$0xff]  }
 0x172   : > { %5358 = vmatmul.mubr.bf16.gmra.mrb[40].mxu0 %v9238_v59  ;;  %3731 = vmatpush1.bf16.msra.mxu1 %v7703_v56  ;;  %v10088_v56 = vrot.slane %v8712_v38, 1  ;;  %v10092_v38 = vrot.slane %v8801_v11, 1  ;;  %v7975_v40 = vld [vmem:[%s8302_s11 + $0x1d4] sm:$0x11] }
 0x173   : > { %5427 = vmatpush1.bf16.msra.mxu0 %v7707_v44  ;;  %3732 = vmatprep.subr.bf16.mxu1 %v7712_v34 }
 0x174   : > { %5428 = vmatprep.subr.bf16.mxu0 %v7715_v24  ;;  %2706 = vmatprep.mubr.bf16.mxu1 %v6087_v7  ;;  %v6086_v44 = vcombine.low %v10088_v56, %v9904_v29  ;;  %v6469_v24 = vcombine.low %v7971_v6, %v9253_v60  ;;  %v7716_v7 = vld [vmem:[#allocation2 + $0xa0] ss:$8 sps:$4 sm:$0xff]   ;;  %v9906_v6 = vrot.slane %v8855_v46, 1  ;;  %v7736_v29 = vld [vmem:[#allocation2 + $0xb84] ss:$8 sps:$4 sm:$0xff]  }
 0x175   : > { %v9255_v47 = vpop.f32.mrb[24].mxu0  ;;  %5367 = vmatprep.mubr.bf16.mxu0 %v6470_v18  ;;  %v7721_v18 = vld [vmem:[#allocation2 + $0xb60] ss:$8 sps:$4 sm:$0xff]  }
 0x176   : > { %10086 = vst [vmem:[#allocation86_spill] sm:$0xff] %v9255_v47  ;;  %v9259_v31 = vpop.f32.mrb[25].mxu0  ;;  %3733 = vmatpush1.bf16.msra.mxu1 %v7710_v50  ;;  %v9905_v50 = vrot.slane %v8858_v42, 1 }
 0x177   : > { %10087 = vst [vmem:[#allocation87_spill] sm:$0xff] %v9259_v31  ;;  %v9267_v34 = vpop.f32.mrb[26].mxu0  ;;  %5429 = vmatpush1.bf16.msra.mxu0 %v7713_v55  ;;  %3734 = vmatprep.subr.bf16.mxu1 %v7718_v13  ;;  %v10091_v31 = vrot.slane %v10039_v45, 1  ;;  %v7724_v55 = vld [vmem:[#allocation2 + $0xb0] ss:$8 sps:$4 sm:$0xff]  }
 0x178   : > { %10089 = vst [vmem:[#allocation88_spill] sm:$0xff] %v9267_v34  ;;  %v9269_v47 = vpop.f32.mrb[27].mxu0  ;;  %5430 = vmatprep.subr.bf16.mxu0 %v7723_v32  ;;  %v7727_v13 = vld [vmem:[#allocation2 + $0xb70] ss:$8 sps:$4 sm:$0xff]   ;;  %v7732_v32 = vld [vmem:[#allocation2 + $0xc4] ss:$8 sps:$4 sm:$0xff]  }
 0x179   : > { %10090 = vst [vmem:[#allocation89_spill] sm:$0xff] %v9269_v47  ;;  %v6096_v56 = vcombine.low %v10092_v38, %v10091_v31  ;;  %2707 = vmatmul.mubr.bf16.gmra.mrb[20].mxu1 %v6086_v44  ;;  %v7734_v31 = vld [vmem:[#allocation2 + $0xb80] ss:$8 sps:$4 sm:$0xff]  }
 0x17a   : > { %5368 = vmatmul.mubr.bf16.gmra.mrb[44].mxu0 %v6469_v24  ;;  %3735 = vmatpush1.bf16.msra.mxu1 %v7716_v7  ;;  %v7973_v7 = vld [vmem:[%s8302_s11 + $0x140] sm:$0xf]  ;;  %v7974_v34 = vld [vmem:[%s8302_s11 + $0x1c8] sm:$0xff] }
 0x17b   : > { %5431 = vmatpush1.bf16.msra.mxu0 %v7721_v18  ;;  %3736 = vmatprep.subr.bf16.mxu1 %v7726_v62  ;;  %v6095_v62 = vcombine.low %v9906_v6, %v9905_v50  ;;  %v9298_v37 = vcombine.low %v7974_v34, %v7975_v40  ;;  %v10097_v50 = vrot.slane %v9117_v15, 1  ;;  %v7745_v40 = vld [vmem:[#allocation2 + $0xe4] ss:$8 sps:$4 sm:$0xff]  }
 0x17c   : > { %5432 = vmatprep.subr.bf16.mxu0 %v7729_v63  ;;  %2716 = vmatprep.mubr.bf16.mxu1 %v6096_v56  ;;  %v7972_v63 = vld [vmem:[%s8302_s11 + $0x128] sm:$0xf]  ;;  %v7749_v34 = vld [vmem:[#allocation2 + $0xba4] ss:$8 sps:$4 sm:$0xff]  }
 0x17d   : > { %v9277_v47 = vpop.f32.mrb[28].mxu0  ;;  %5377 = vmatprep.mubr.bf16.mxu0 %v8938_v10  ;;  %v9290_v18 = vcombine.low %v7972_v63, %v7973_v7  ;;  %v7730_v56 = vld [vmem:[#allocation2 + $0xc0] ss:$8 sps:$4 sm:$0xff]   ;;  %v10098_v63 = vrot.slane %v8838_v48, 1  ;;  %v944_v19 = vshrl.u32 %v9298_v37, 16 }
 0x17e   : > { %10093 = vst [vmem:[#allocation90_spill] sm:$0xff] %v9277_v47  ;;  %v9282_v24 = vpop.f32.mrb[29].mxu0  ;;  %3737 = vmatpush1.bf16.msra.mxu1 %v7724_v55  ;;  %v7742_v47 = vld [vmem:[#allocation2 + $0xb94] ss:$8 sps:$4 sm:$0xff]   ;;  %v9909_v55 = vrot.slane %v8898_v0, 1 }
 0x17f   : > { %10094 = vst [vmem:[#allocation91_spill] sm:$0xff] %v9282_v24  ;;  %v9292_v38 = vpop.f32.mrb[30].mxu0  ;;  %5433 = vmatpush1.bf16.msra.mxu0 %v7727_v13  ;;  %3738 = vmatprep.subr.bf16.mxu1 %v7732_v32  ;;  %v7739_v24 = vld [vmem:[#allocation2 + $0xd4] ss:$8 sps:$4 sm:$0xff]   ;;  %v6105_v7 = vcombine.low %v10098_v63, %v10097_v50  ;;  %v7737_v13 = vld [vmem:[#allocation2 + $0xd0] ss:$8 sps:$4 sm:$0xff]  }
 0x180   : > { %10095 = vst [vmem:[#allocation92_spill] sm:$0xff] %v9292_v38  ;;  %v9294_v44 = vpop.f32.mrb[31].mxu0  ;;  %5434 = vmatprep.subr.bf16.mxu0 %v7736_v29  ;;  %v9908_v29 = vrot.slane %v8902_v21, 1  ;;  %v7740_v32 = vld [vmem:[#allocation2 + $0xb90] ss:$8 sps:$4 sm:$0xff]   ;;  %v946_v50 = vshll.u32 %v9298_v37, 16 }
 0x181   : > { %10096 = vst [vmem:[#allocation93_spill] sm:$0xff] %v9294_v44  ;;  %2717 = vmatmul.mubr.bf16.gmra.mrb[24].mxu1 %v6095_v62  ;;  %v7977_v63 = vld [vmem:[%s8302_s11 + $0x170] sm:$0xf]  ;;  %v7978_v44 = vld [vmem:[%s8302_s11 + $0x18] sm:$0xff]  ;;  %v7979_v38 = vld [vmem:[%s8302_s11] sm:$0xff] }
 0x182   : > { %5378 = vmatmul.mubr.bf16.gmra.mrb[48].mxu0 %v9290_v18  ;;  %3739 = vmatpush1.bf16.msra.mxu1 %v7730_v56  ;;  %v6104_v62 = vcombine.low %v9909_v55, %v9908_v29  ;;  %v7743_v56 = vld [vmem:[#allocation2 + $0xe0] ss:$8 sps:$4 sm:$0xff]   ;;  %v6252_v4 = vcombine.high %v7979_v38, %v7978_v44  ;;  %v948_v21 = vrot.slane %v946_v50, 1 }
 0x183   : > { %5435 = vmatpush1.bf16.msra.mxu0 %v7734_v31  ;;  %3740 = vmatprep.subr.bf16.mxu1 %v7739_v24  ;;  %v7976_v31 = vld [vmem:[%s8302_s11 + $0x158] sm:$0xf]  ;;  %v7752_v24 = vld [vmem:[#allocation2 + $0xf4] ss:$8 sps:$4 sm:$0xff]   ;;  %v7980_v29 = vld [vmem:[%s8302_s11 + $0x188] sm:$0xf] }
 0x184   : > { %5436 = vmatprep.subr.bf16.mxu0 %v7742_v47  ;;  %2726 = vmatprep.mubr.bf16.mxu1 %v6105_v7  ;;  %v9315_v6 = vcombine.low %v7976_v31, %v7977_v63  ;;  %v7747_v47 = vld [vmem:[#allocation2 + $0xba0] ss:$8 sps:$4 sm:$0xff]   ;;  %v7755_v7 = vld [vmem:[#allocation2 + $0xbb4] ss:$8 sps:$4 sm:$0xff]   ;;  %v7760_v31 = vld [vmem:[#allocation2 + $0x104] ss:$8 sps:$4 sm:$0xff]   ;;  %v6251_v63 = vcombine.low %v7979_v38, %v7978_v44 }
 0x185   : > { %5387 = vmatprep.mubr.bf16.mxu0 %v8963_v27  ;;  %v7981_v55 = vld [vmem:[%s8302_s11 + $0x1a0] sm:$0xf]  ;;  %v9329_v44 = vld [vmem:[%s8302_s11 + $0x1d0] sm:$0xf]  ;;  %v7773_v38 = vld [vmem:[#allocation2 + $0x124] ss:$8 sps:$4 sm:$0xff]  }
 0x186   : > { %3741 = vmatpush1.bf16.msra.mxu1 %v7737_v13  ;;  %v7750_v13 = vld [vmem:[#allocation2 + $0xf0] ss:$8 sps:$4 sm:$0xff]   ;;  %v9324_v50 = vcombine.low %v7980_v29, %v7981_v55  ;;  %v7778_v55 = vld [vmem:[#allocation2 + $0xbe4] ss:$8 sps:$4 sm:$0xff]  }
 0x187   : > { %5437 = vmatpush1.bf16.msra.mxu0 %v7740_v32  ;;  %3742 = vmatprep.subr.bf16.mxu1 %v7745_v40  ;;  %v7753_v32 = vld [vmem:[#allocation2 + $0xbb0] ss:$8 sps:$4 sm:$0xff]   ;;  %v7764_v40 = vld [vmem:[#allocation2 + $0xbc4] ss:$8 sps:$4 sm:$0xff]  }
 0x188   : > { %5438 = vmatprep.subr.bf16.mxu0 %v7749_v34  ;;  %v949_v34 = vor.u32 %v948_v21, %v944_v19  ;;  %v7765_v21 = vld [vmem:[#allocation2 + $0x110] ss:$8 sps:$4 sm:$0xff]  }
 0x189   : > { %2727 = vmatmul.mubr.bf16.gmra.mrb[28].mxu1 %v6104_v62  ;;  %v7758_v62 = vld [vmem:[#allocation2 + $0x100] ss:$8 sps:$4 sm:$0xff]   ;;  %v7768_v19 = vld [vmem:[#allocation2 + $0xbd0] ss:$8 sps:$4 sm:$0xff]  }
 0x18a   : > { %5388 = vmatmul.mubr.bf16.gmra.mrb[52].mxu0 %v9315_v6  ;;  %3743 = vmatpush1.bf16.msra.mxu1 %v7743_v56  ;;  %v7762_v56 = vld [vmem:[#allocation2 + $0xbc0] ss:$8 sps:$4 sm:$0xff]   ;;  %v7982_v29 = vld [vmem:[%s8302_s11 + $0x1b8] sm:$0xf] }
 0x18b   : > { %5439 = vmatpush1.bf16.msra.mxu0 %v7747_v47  ;;  %3744 = vmatprep.subr.bf16.mxu1 %v7752_v24  ;;  %v7767_v47 = vld [vmem:[#allocation2 + $0x114] ss:$8 sps:$4 sm:$0xff]  }
 0x18c   : > { %5440 = vmatprep.subr.bf16.mxu0 %v7755_v7  ;;  %3746 = vmatprep.mubr.bf16.mxu1 %v6252_v4  ;;  %v7770_v24 = vld [vmem:[#allocation2 + $0xbd4] ss:$8 sps:$4 sm:$0xff]   ;;  %v6479_v4 = vcombine.low %v8928_v5, %v949_v34  ;;  %v6478_v7 = vcombine.low %v7982_v29, %v9329_v44  ;;  %v7771_v5 = vld [vmem:[#allocation2 + $0x120] ss:$8 sps:$4 sm:$0xff]   ;;  %v7782_v34 = vld [vmem:[#allocation2 + $0xbf0] ss:$8 sps:$4 sm:$0xff]  }
 0x18d   : > { %5397 = vmatprep.mubr.bf16.mxu0 %v8986_v23  ;;  %v7797_v29 = vld [vmem:[#allocation2 + $0x160] ss:$8 sps:$4 sm:$0xff]  }
 0x18e   : > { %3745 = vmatpush1.bf16.msra.mxu1 %v7750_v13  ;;  %v7776_v13 = vld [vmem:[#allocation2 + $0xbe0] ss:$8 sps:$4 sm:$0xff]  }
 0x18f   : > { %5441 = vmatpush1.bf16.msra.mxu0 %v7753_v32  ;;  %3827 = vmatprep.subr.bf16.mxu1 %v7760_v31  ;;  %v7781_v32 = vld [vmem:[#allocation2 + $0x134] ss:$8 sps:$4 sm:$0xff]  }
 0x190   : > { %5442 = vmatprep.subr.bf16.mxu0 %v7764_v40  ;;  %v7784_v31 = vld [vmem:[#allocation2 + $0xbf4] ss:$8 sps:$4 sm:$0xff]   ;;  %v9336_v40 = vcombine.low %v8955_v43, %v8976_v57  ;;  %v7785_v43 = vld [vmem:[#allocation2 + $0x140] ss:$8 sps:$4 sm:$0xff]  }
 0x191   : > { %3747 = vmatmul.mubr.bf16.vlgmr.msra.gmra.mrb[32].mxu1 %v6251_v63  ;;  %v7787_v63 = vld [vmem:[#allocation2 + $0x144] ss:$8 sps:$4 sm:$0xff]   ;;  %v7788_v57 = vld [vmem:[#allocation2 + $0xc00] ss:$8 sps:$4 sm:$0xff]  }
 0x192   : > { %5398 = vmatmul.mubr.bf16.gmra.mrb[56].mxu0 %v9324_v50  ;;  %3828 = vmatpush1.bf16.msra.mxu1 %v7758_v62  ;;  %v7790_v62 = vld [vmem:[#allocation2 + $0xc04] ss:$8 sps:$4 sm:$0xff]  }
 0x193   : > { %5443 = vmatpush1.bf16.msra.mxu0 %v7762_v56  ;;  %3829 = vmatprep.subr.bf16.mxu1 %v7767_v47  ;;  %v243_v56 = vld [vmem:[%s8302_s11 + $0xec] sm:$0x1]  ;;  %v7796_v47 = vld [vmem:[#allocation2 + $0xc14] ss:$8 sps:$4 sm:$0xff]  }
 0x194   : > { %5444 = vmatprep.subr.bf16.mxu0 %v7770_v24  ;;  %3756 = vmatprep.mubr.bf16.mxu1 %v10018_v39  ;;  %v7779_v39 = vld [vmem:[#allocation2 + $0x130] ss:$8 sps:$4 sm:$0xff]   ;;  %v9343_v24 = vcombine.low %v9253_v60, %v243_v56 }
 0x195   : > { %5407 = vmatprep.mubr.bf16.mxu0 %v6479_v4  ;;  %v9347_v4 = vcombine.low %v8978_v36, %v8997_v52  ;;  %v10100_v52 = vld [vmem:[#allocation71_spill] sm:$0xff] }
 0x196   : > { %3830 = vmatpush1.bf16.msra.mxu1 %v7765_v21  ;;  %v7791_v21 = vld [vmem:[#allocation2 + $0x150] ss:$8 sps:$4 sm:$0xff]   ;;  %v750_v36 = vshll.u32 %v9343_v24, 16 }
 0x197   : > { %5445 = vmatpush1.bf16.msra.mxu0 %v7768_v19  ;;  %3831 = vmatprep.subr.bf16.mxu1 %v7773_v38  ;;  %v7794_v19 = vld [vmem:[#allocation2 + $0xc10] ss:$8 sps:$4 sm:$0xff]   ;;  %v7799_v38 = vld [vmem:[#allocation2 + $0x164] ss:$8 sps:$4 sm:$0xff]  }
 0x198   : > { %5446 = vmatprep.subr.bf16.mxu0 %v7778_v55  ;;  %v7802_v55 = vld [vmem:[#allocation2 + $0xc24] ss:$8 sps:$4 sm:$0xff]   ;;  %v752_v56 = vrot.slane %v750_v36, 1  ;;  %v10105_v36 = vld [vmem:[#allocation26_spill] sm:$0xff] }
 0x199   : > { %3757 = vmatmul.mubr.bf16.gmra.mrb[36].mxu1 %v10022_v54  ;;  %v7793_v54 = vld [vmem:[#allocation2 + $0x154] ss:$8 sps:$4 sm:$0xff]  }
 0x19a   : > { %5408 = vmatmul.mubr.bf16.gmra.mrb[60].mxu0 %v6478_v7  ;;  %3832 = vmatpush1.bf16.msra.mxu1 %v7771_v5  ;;  %v7800_v7 = vld [vmem:[#allocation2 + $0xc20] ss:$8 sps:$4 sm:$0xff]   ;;  %v7805_v5 = vld [vmem:[#allocation2 + $0x174] ss:$8 sps:$4 sm:$0xff]  }
 0x19b   : > { %5447 = vmatpush1.bf16.msra.mxu0 %v7776_v13  ;;  %3833 = vmatprep.subr.bf16.mxu1 %v7781_v32  ;;  %v7808_v13 = vld [vmem:[#allocation2 + $0xc34] ss:$8 sps:$4 sm:$0xff]   ;;  %v7983_v32 = vld [vmem:[%s8302_s11 + $0x108] sm:$0xff] }
 0x19c   : > { %5448 = vmatprep.subr.bf16.mxu0 %v7784_v31  ;;  %3766 = vmatprep.mubr.bf16.mxu1 %v10023_v1  ;;  %v10099_v1 = vld [vmem:[#allocation49_spill] sm:$0xff] }
 0x19d   : > { %5450 = vmatprep.mubr.bf16.mxu0 %v9336_v40  ;;  %v7984_v31 = vld [vmem:[%s8302_s11 + $0xf0] sm:$0xff] }
 0x19e   : > { %3834 = vmatpush1.bf16.msra.mxu1 %v7779_v39  ;;  %v6288_v39 = vcombine.high %v7984_v31, %v7983_v32 }
 0x19f   : > { %5449 = vmatpush1.bf16.msra.mxu0 %v7782_v34  ;;  %3835 = vmatprep.subr.bf16.mxu1 %v7787_v63  ;;  %v10103_v34 = vld [vmem:[#allocation69_spill] sm:$0xff] }
 0x1a0   : > { %5531 = vmatprep.subr.bf16.mxu0 %v7790_v62  ;;  %v748_v62 = vshrl.u32 %v9343_v24, 16 }
 0x1a1   : > { %3767 = vmatmul.mubr.bf16.gmra.mrb[40].mxu1 %v10028_v51  ;;  %v10101_v51 = vld [vmem:[#allocation68_spill] sm:$0xff] }
 0x1a2   : > { %5451 = vmatmul.mubr.bf16.vlgmr.msra.gmra.mrb[32].mxu0 %v10099_v1  ;;  %3836 = vmatpush1.bf16.msra.mxu1 %v7785_v43  ;;  %v9356_v60 = vcombine.low %v10101_v51, %v10100_v52  ;;  %v10104_v43 = vld [vmem:[#allocation65_spill] sm:$0xff]  ;;  %v10106_v52 = vld [vmem:[#allocation72_spill] sm:$0xff] }
 0x1a3   : > { %5532 = vmatpush1.bf16.msra.mxu0 %v7788_v57  ;;  %3837 = vmatprep.subr.bf16.mxu1 %v7793_v54  ;;  %v743_v57 = vshll.u32 %v10104_v43, 16  ;;  %v7803_v54 = vld [vmem:[#allocation2 + $0x170] ss:$8 sps:$4 sm:$0xff]   ;;  %v741_v51 = vshrl.u32 %v10104_v43, 16 }
 0x1a4   : > { %5533 = vmatprep.subr.bf16.mxu0 %v7796_v47  ;;  %3776 = vmatprep.mubr.bf16.mxu1 %v10033_v49  ;;  %v10102_v49 = vld [vmem:[#allocation73_spill] sm:$0xff] }
 0x1a5   : > { %5460 = vmatprep.mubr.bf16.mxu0 %v9347_v4  ;;  %v9362_v63 = vcombine.low %v10103_v34, %v10102_v49  ;;  %v7806_v47 = vld [vmem:[#allocation2 + $0xc30] ss:$8 sps:$4 sm:$0xff]   ;;  %v745_v49 = vrot.slane %v743_v57, 1  ;;  %v7828_v57 = vld [vmem:[#allocation2 + $0xc64] ss:$8 sps:$4 sm:$0xff]  }
 0x1a6   : > { %3838 = vmatpush1.bf16.msra.mxu1 %v7791_v21  ;;  %v7813_v21 = vld [vmem:[#allocation2 + $0x184] ss:$8 sps:$4 sm:$0xff]  }
 0x1a7   : > { %5534 = vmatpush1.bf16.msra.mxu0 %v7794_v19  ;;  %3839 = vmatprep.subr.bf16.mxu1 %v7799_v38  ;;  %v7816_v19 = vld [vmem:[#allocation2 + $0xc44] ss:$8 sps:$4 sm:$0xff]   ;;  %v753_v38 = vor.u32 %v752_v56, %v748_v62  ;;  %v7820_v62 = vld [vmem:[#allocation2 + $0xc50] ss:$8 sps:$4 sm:$0xff]  }
 0x1a8   : > { %5535 = vmatprep.subr.bf16.mxu0 %v7802_v55  ;;  %v6287_v55 = vcombine.low %v7984_v31, %v7983_v32  ;;  %v746_v32 = vor.u32 %v745_v49, %v741_v51  ;;  %v7817_v31 = vld [vmem:[#allocation2 + $0x190] ss:$8 sps:$4 sm:$0xff]   ;;  %v7825_v56 = vld [vmem:[#allocation2 + $0x1a4] ss:$8 sps:$4 sm:$0xff]  }
 0x1a9   : > { %3777 = vmatmul.mubr.bf16.gmra.mrb[44].mxu1 %v10036_v35  ;;  %v9371_v35 = vcombine.low %v10106_v52, %v10105_v36  ;;  %v10109_v36 = vld [vmem:[#allocation30_spill] sm:$0xff]  ;;  %v10110_v52 = vld [vmem:[#allocation29_spill] sm:$0xff] }
 0x1aa   : > { %5461 = vmatmul.mubr.bf16.gmra.mrb[36].mxu0 %v9356_v60  ;;  %3840 = vmatpush1.bf16.msra.mxu1 %v7797_v29  ;;  %v7811_v29 = vld [vmem:[#allocation2 + $0x180] ss:$8 sps:$4 sm:$0xff]   ;;  %v9380_v51 = vcombine.low %v10110_v52, %v10109_v36  ;;  %v7832_v49 = vld [vmem:[#allocation2 + $0xc70] ss:$8 sps:$4 sm:$0xff]   ;;  %v7849_v36 = vld [vmem:[#allocation2 + $0x1e4] ss:$8 sps:$4 sm:$0xff]  }
 0x1ab   : > { %5536 = vmatpush1.bf16.msra.mxu0 %v7800_v7  ;;  %3841 = vmatprep.subr.bf16.mxu1 %v7805_v5  ;;  %v7814_v7 = vld [vmem:[#allocation2 + $0xc40] ss:$8 sps:$4 sm:$0xff]   ;;  %v7819_v5 = vld [vmem:[#allocation2 + $0x194] ss:$8 sps:$4 sm:$0xff]  }
 0x1ac   : > { %5537 = vmatprep.subr.bf16.mxu0 %v7808_v13  ;;  %3786 = vmatprep.mubr.bf16.mxu1 %v6288_v39  ;;  %v7822_v13 = vld [vmem:[#allocation2 + $0xc54] ss:$8 sps:$4 sm:$0xff]  }
 0x1ad   : > { %5470 = vmatprep.mubr.bf16.mxu0 %v9362_v63  ;;  %v10107_v39 = vld [vmem:[#allocation74_spill] sm:$0xff] }
 0x1ae   : > { %3842 = vmatpush1.bf16.msra.mxu1 %v7803_v54  ;;  %v6472_v34 = vcombine.low %v10107_v39, %v753_v38  ;;  %v10108_v54 = vld [vmem:[#allocation15_spill] sm:$0xff]  ;;  %v7831_v38 = vld [vmem:[#allocation2 + $0x1b4] ss:$8 sps:$4 sm:$0xff]  }
 0x1af   : > { %5538 = vmatpush1.bf16.msra.mxu0 %v7806_v47  ;;  %3843 = vmatprep.subr.bf16.mxu1 %v7813_v21  ;;  %v6471_v47 = vcombine.low %v10108_v54, %v746_v32  ;;  %v7823_v21 = vld [vmem:[#allocation2 + $0x1a0] ss:$8 sps:$4 sm:$0xff]   ;;  %v283_v39 = vld [vmem:[%s8302_s11 + $0x1dc] sm:$0x1]  ;;  %v10113_v32 = vld [vmem:[#allocation17_spill] sm:$0xff] }
 0x1b0   : > { %5539 = vmatprep.subr.bf16.mxu0 %v7816_v19  ;;  %v7826_v19 = vld [vmem:[#allocation2 + $0xc60] ss:$8 sps:$4 sm:$0xff]   ;;  %v9392_v54 = vcombine.low %v9329_v44, %v283_v39  ;;  %v7852_v44 = vld [vmem:[#allocation2 + $0xca4] ss:$8 sps:$4 sm:$0xff]  }
 0x1b1   : > { %3787 = vmatmul.mubr.bf16.gmra.mrb[48].mxu1 %v6287_v55  ;;  %v7834_v55 = vld [vmem:[#allocation2 + $0xc74] ss:$8 sps:$4 sm:$0xff]  }
 0x1b2   : > { %5471 = vmatmul.mubr.bf16.gmra.mrb[40].mxu0 %v9371_v35  ;;  %3844 = vmatpush1.bf16.msra.mxu1 %v7811_v29  ;;  %v7837_v29 = vld [vmem:[#allocation2 + $0x1c4] ss:$8 sps:$4 sm:$0xff]   ;;  %v960_v52 = vshll.u32 %v9392_v54, 16 }
 0x1b3   : > { %5540 = vmatpush1.bf16.msra.mxu0 %v7814_v7  ;;  %3845 = vmatprep.subr.bf16.mxu1 %v7819_v5  ;;  %v7840_v7 = vld [vmem:[#allocation2 + $0xc84] ss:$8 sps:$4 sm:$0xff]  }
 0x1b4   : > { %5541 = vmatprep.subr.bf16.mxu0 %v7822_v13  ;;  %3796 = vmatprep.mubr.bf16.mxu1 %v10043_v2  ;;  %v7829_v2 = vld [vmem:[#allocation2 + $0x1b0] ss:$8 sps:$4 sm:$0xff]  }
 0x1b5   : > { %5480 = vmatprep.mubr.bf16.mxu0 %v6472_v34  ;;  %v10111_v5 = vld [vmem:[#allocation28_spill] sm:$0xff] }
 0x1b6   : > { %3846 = vmatpush1.bf16.msra.mxu1 %v7817_v31  ;;  %v547_v13 = vshll.u32 %v10111_v5, 16  ;;  %v10112_v34 = vld [vmem:[#allocation20_spill] sm:$0xff] }
 0x1b7   : > { %5542 = vmatpush1.bf16.msra.mxu0 %v7820_v62  ;;  %3847 = vmatprep.subr.bf16.mxu1 %v7825_v56  ;;  %v9389_v31 = vcombine.low %v10113_v32, %v10112_v34  ;;  %v7838_v62 = vld [vmem:[#allocation2 + $0xc80] ss:$8 sps:$4 sm:$0xff]   ;;  %v7843_v56 = vld [vmem:[#allocation2 + $0x1d4] ss:$8 sps:$4 sm:$0xff]   ;;  %v958_v32 = vshrl.u32 %v9392_v54, 16 }
 0x1b8   : > { %5543 = vmatprep.subr.bf16.mxu0 %v7828_v57  ;;  %v7846_v57 = vld [vmem:[#allocation2 + $0xc94] ss:$8 sps:$4 sm:$0xff]  }
 0x1b9   : > { %3797 = vmatmul.mubr.bf16.gmra.mrb[52].mxu1 %v10044_v3  ;;  %v7835_v3 = vld [vmem:[#allocation2 + $0x1c0] ss:$8 sps:$4 sm:$0xff]  }
 0x1ba   : > { %5481 = vmatmul.mubr.bf16.gmra.mrb[44].mxu0 %v6471_v47  ;;  %3848 = vmatpush1.bf16.msra.mxu1 %v7823_v21  ;;  %v545_v21 = vshrl.u32 %v10111_v5, 16  ;;  %v7858_v5 = vld [vmem:[#allocation2 + $0xcb4] ss:$8 sps:$4 sm:$0xff]  }
 0x1bb   : > { %5544 = vmatpush1.bf16.msra.mxu0 %v7826_v19  ;;  %3849 = vmatprep.subr.bf16.mxu1 %v7831_v38  ;;  %v549_v19 = vrot.slane %v547_v13, 1  ;;  %v7841_v38 = vld [vmem:[#allocation2 + $0x1d0] ss:$8 sps:$4 sm:$0xff]  }
 0x1bc   : > { %5545 = vmatprep.subr.bf16.mxu0 %v7834_v55  ;;  %3806 = vmatprep.mubr.bf16.mxu1 %v10047_v9  ;;  %v10114_v9 = vld [vmem:[#allocation19_spill] sm:$0xff]  ;;  %v7844_v55 = vld [vmem:[#allocation2 + $0xc90] ss:$8 sps:$4 sm:$0xff]  }
 0x1bd   : > { %5490 = vmatprep.mubr.bf16.mxu0 %v9380_v51  ;;  %v9396_v47 = vcombine.low %v10114_v9, %v9100_v58  ;;  %v550_v58 = vor.u32 %v549_v19, %v545_v21  ;;  %v10116_v13 = vld [vmem:[#allocation44_spill] sm:$0xff]  ;;  %v7985_v19 = vld [vmem:[%s8302_s11 + $0x20] sm:$0xf] }
 0x1be   : > { %3850 = vmatpush1.bf16.msra.mxu1 %v7829_v2  ;;  %v10115_v2 = vld [vmem:[#allocation32_spill] sm:$0xff] }
 0x1bf   : > { %5546 = vmatpush1.bf16.msra.mxu0 %v7832_v49  ;;  %3851 = vmatprep.subr.bf16.mxu1 %v7837_v29  ;;  %v7847_v49 = vld [vmem:[#allocation2 + $0x1e0] ss:$8 sps:$4 sm:$0xff]   ;;  %v6254_v39 = vcombine.low %v550_v58, %v10116_v13  ;;  %v7862_v9 = vld [vmem:[#allocation2 + $0x204] ss:$8 sps:$4 sm:$0xff]  }
 0x1c0   : > { %5547 = vmatprep.subr.bf16.mxu0 %v7840_v7  ;;  %v7850_v29 = vld [vmem:[#allocation2 + $0xca0] ss:$8 sps:$4 sm:$0xff]   ;;  %v7855_v7 = vld [vmem:[#allocation2 + $0x1f4] ss:$8 sps:$4 sm:$0xff]   ;;  %v7877_v13 = vld [vmem:[#allocation2 + $0xce4] ss:$8 sps:$4 sm:$0xff]  }
 0x1c1   : > { %3807 = vmatmul.mubr.bf16.gmra.mrb[56].mxu1 %v10051_v53  ;;  %v9406_v53 = vcombine.low %v10115_v2, %v9124_v8  ;;  %v10118_v8 = vld [vmem:[#allocation37_spill] sm:$0xff]  ;;  %v7860_v58 = vld [vmem:[#allocation2 + $0x200] ss:$8 sps:$4 sm:$0xff]  }
 0x1c2   : > { %5491 = vmatmul.mubr.bf16.gmra.mrb[48].mxu0 %v9389_v31  ;;  %3852 = vmatpush1.bf16.msra.mxu1 %v7835_v3  ;;  %v962_v3 = vrot.slane %v960_v52, 1  ;;  %v7863_v52 = vld [vmem:[#allocation2 + $0xcc0] ss:$8 sps:$4 sm:$0xff]   ;;  %v7868_v2 = vld [vmem:[#allocation2 + $0x214] ss:$8 sps:$4 sm:$0xff]  }
 0x1c3   : > { %5548 = vmatpush1.bf16.msra.mxu0 %v7838_v62  ;;  %3853 = vmatprep.subr.bf16.mxu1 %v7843_v56  ;;  %v953_v62 = vshll.u32 %v10118_v8, 16  ;;  %v7853_v56 = vld [vmem:[#allocation2 + $0x1f0] ss:$8 sps:$4 sm:$0xff]  }
 0x1c4   : > { %5549 = vmatprep.subr.bf16.mxu0 %v7846_v57  ;;  %3816 = vmatprep.mubr.bf16.mxu1 %v10054_v20  ;;  %v10117_v20 = vld [vmem:[#allocation33_spill] sm:$0xff]  ;;  %v963_v21 = vor.u32 %v962_v3, %v958_v32  ;;  %v7875_v32 = vld [vmem:[#allocation2 + $0xce0] ss:$8 sps:$4 sm:$0xff]  }
 0x1c5   : > { %5500 = vmatprep.mubr.bf16.mxu0 %v9396_v47  ;;  %v9411_v34 = vcombine.low %v10117_v20, %v9131_v28  ;;  %v7856_v57 = vld [vmem:[#allocation2 + $0xcb0] ss:$8 sps:$4 sm:$0xff]   ;;  %v7865_v28 = vld [vmem:[#allocation2 + $0xcc4] ss:$8 sps:$4 sm:$0xff]   ;;  %v7880_v3 = vld [vmem:[#allocation2 + $0x234] ss:$8 sps:$4 sm:$0xff]  }
 0x1c6   : > { %3854 = vmatpush1.bf16.msra.mxu1 %v7841_v38  ;;  %v7986_v38 = vld [vmem:[%s8302_s11 + $0x8] sm:$0xf] }
 0x1c7   : > { %5550 = vmatpush1.bf16.msra.mxu0 %v7844_v55  ;;  %3855 = vmatprep.subr.bf16.mxu1 %v7849_v36  ;;  %v6253_v55 = vcombine.low %v7986_v38, %v7985_v19  ;;  %v951_v36 = vshrl.u32 %v10118_v8, 16  ;;  %v10121_v19 = vld [vmem:[#allocation62_spill] sm:$0xff] }
 0x1c8   : > { %5551 = vmatprep.subr.bf16.mxu0 %v7852_v44  ;;  %v955_v44 = vrot.slane %v953_v62, 1  ;;  %v7883_v62 = vld [vmem:[#allocation2 + $0xcf4] ss:$8 sps:$4 sm:$0xff]  }
 0x1c9   : > { %3817 = vmatmul.mubr.bf16.gmra.mrb[60].mxu1 %v10059_v33  ;;  %v9422_v33 = vcombine.low %v9126_v16, %v9141_v12  ;;  %v7866_v16 = vld [vmem:[#allocation2 + $0x210] ss:$8 sps:$4 sm:$0xff]  }
 0x1ca   : > { %5501 = vmatmul.mubr.bf16.gmra.mrb[52].mxu0 %v9406_v53  ;;  %3856 = vmatpush1.bf16.msra.mxu1 %v7847_v49  ;;  %v7871_v49 = vld [vmem:[#allocation2 + $0xcd4] ss:$8 sps:$4 sm:$0xff]   ;;  %v7869_v12 = vld [vmem:[#allocation2 + $0xcd0] ss:$8 sps:$4 sm:$0xff]  }
 0x1cb   : > { %5552 = vmatpush1.bf16.msra.mxu0 %v7850_v29  ;;  %3857 = vmatprep.subr.bf16.mxu1 %v7855_v7  ;;  %v6481_v29 = vcombine.low %v9133_v25, %v963_v21  ;;  %v956_v7 = vor.u32 %v955_v44, %v951_v36  ;;  %v7872_v25 = vld [vmem:[#allocation2 + $0x220] ss:$8 sps:$4 sm:$0xff]   ;;  %v7889_v21 = vld [vmem:[#allocation2 + $0xd04] ss:$8 sps:$4 sm:$0xff]  }
 0x1cc   : > { %5553 = vmatprep.subr.bf16.mxu0 %v7858_v5  ;;  %3859 = vmatprep.mubr.bf16.mxu1 %v6254_v39  ;;  %v7874_v5 = vld [vmem:[#allocation2 + $0x224] ss:$8 sps:$4 sm:$0xff]   ;;  %v10122_v38 = vld [vmem:[#allocation34_spill] sm:$0xff] }
 0x1cd   : > { %5510 = vmatprep.mubr.bf16.mxu0 %v9411_v34  ;;  %v10119_v39 = vld [vmem:[#allocation59_spill] sm:$0xff] }
 0x1ce   : > { %3858 = vmatpush1.bf16.msra.mxu1 %v7853_v56  ;;  %v6480_v20 = vcombine.low %v10119_v39, %v956_v7  ;;  %v7878_v56 = vld [vmem:[#allocation2 + $0x230] ss:$8 sps:$4 sm:$0xff]   ;;  %v7887_v36 = vld [vmem:[#allocation2 + $0xd00] ss:$8 sps:$4 sm:$0xff]  }
 0x1cf   : > { %5554 = vmatpush1.bf16.msra.mxu0 %v7856_v57  ;;  %3940 = vmatprep.subr.bf16.mxu1 %v7862_v9  ;;  %v7881_v57 = vld [vmem:[#allocation2 + $0xcf0] ss:$8 sps:$4 sm:$0xff]  }
 0x1d0   : > { %5555 = vmatprep.subr.bf16.mxu0 %v7865_v28  ;;  %v10120_v9 = vld [vmem:[#allocation46_spill] sm:$0xff]  ;;  %v7886_v28 = vld [vmem:[#allocation2 + $0x244] ss:$8 sps:$4 sm:$0xff]   ;;  %v10125_v39 = vld [vmem:[#allocation61_spill] sm:$0xff] }
 0x1d1   : > { %3860 = vmatmul.mubr.bf16.vlgmr.msra.gmra.mrb[32].mxu1 %v6253_v55  ;;  %v7884_v55 = vld [vmem:[#allocation2 + $0x240] ss:$8 sps:$4 sm:$0xff]  }
 0x1d2   : > { %5511 = vmatmul.mubr.bf16.gmra.mrb[56].mxu0 %v9422_v33  ;;  %3941 = vmatpush1.bf16.msra.mxu1 %v7860_v58  ;;  %v7892_v58 = vld [vmem:[#allocation2 + $0x254] ss:$8 sps:$4 sm:$0xff]  }
 0x1d3   : > { %5556 = vmatpush1.bf16.msra.mxu0 %v7863_v52  ;;  %3942 = vmatprep.subr.bf16.mxu1 %v7868_v2  ;;  %v7898_v52 = vld [vmem:[#allocation2 + $0xd14] ss:$8 sps:$4 sm:$0xff]   ;;  %v10123_v2 = vld [vmem:[#allocation35_spill] sm:$0xff] }
 0x1d4   : > { %5557 = vmatprep.subr.bf16.mxu0 %v7871_v49  ;;  %3869 = vmatprep.mubr.bf16.mxu1 %v8819_v26  ;;  %v757_v26 = vshll.u32 %v10120_v9, 16  ;;  %v7890_v49 = vld [vmem:[#allocation2 + $0x250] ss:$8 sps:$4 sm:$0xff]  }
 0x1d5   : > { %5520 = vmatprep.mubr.bf16.mxu0 %v6481_v29  ;;  %v7896_v29 = vld [vmem:[#allocation2 + $0xd10] ss:$8 sps:$4 sm:$0xff]  }
 0x1d6   : > { %3943 = vmatpush1.bf16.msra.mxu1 %v7866_v16  ;;  %v759_v44 = vrot.slane %v757_v26, 1  ;;  %v7895_v16 = vld [vmem:[#allocation2 + $0x264] ss:$8 sps:$4 sm:$0xff]   ;;  %v7987_v26 = vld [vmem:[%s8302_s11 + $0x110] sm:$0xf] }
 0x1d7   : > { %5558 = vmatpush1.bf16.msra.mxu0 %v7869_v12  ;;  %3944 = vmatprep.subr.bf16.mxu1 %v7874_v5  ;;  %v7908_v12 = vld [vmem:[#allocation2 + $0xd24] ss:$8 sps:$4 sm:$0xff]  }
 0x1d8   : > { %5559 = vmatprep.subr.bf16.mxu0 %v7877_v13  ;;  %v10124_v5 = vld [vmem:[#allocation36_spill] sm:$0xff] }
 0x1d9   : > { %3870 = vmatmul.mubr.bf16.gmra.mrb[36].mxu1 %v9192_v14  ;;  %v755_v14 = vshrl.u32 %v10120_v9, 16  ;;  %v7893_v13 = vld [vmem:[#allocation2 + $0x260] ss:$8 sps:$4 sm:$0xff]   ;;  %v7915_v9 = vld [vmem:[#allocation2 + $0xd30] ss:$8 sps:$4 sm:$0xff]  }
 0x1da   : > { %5521 = vmatmul.mubr.bf16.gmra.mrb[60].mxu0 %v6480_v20  ;;  %3945 = vmatpush1.bf16.msra.mxu1 %v7872_v25  ;;  %v7901_v20 = vld [vmem:[#allocation2 + $0x274] ss:$8 sps:$4 sm:$0xff]   ;;  %v7906_v25 = vld [vmem:[#allocation2 + $0xd20] ss:$8 sps:$4 sm:$0xff]  }
 0x1db   : > { %5560 = vmatpush1.bf16.msra.mxu0 %v7875_v32  ;;  %3946 = vmatprep.subr.bf16.mxu1 %v7880_v3  ;;  %v760_v7 = vor.u32 %v759_v44, %v755_v14  ;;  %v10126_v32 = vld [vmem:[#allocation38_spill] sm:$0xff]  ;;  %v7926_v14 = vld [vmem:[#allocation2 + $0xd44] ss:$8 sps:$4 sm:$0xff]   ;;  %v10130_v44 = vld [vmem:[#allocation45_spill] sm:$0xff] }
 0x1dc   : > { %5561 = vmatprep.subr.bf16.mxu0 %v7883_v62  ;;  %3879 = vmatprep.mubr.bf16.mxu1 %v10121_v19  ;;  %v7899_v3 = vld [vmem:[#allocation2 + $0x270] ss:$8 sps:$4 sm:$0xff]   ;;  %v7911_v19 = vld [vmem:[#allocation2 + $0x294] ss:$8 sps:$4 sm:$0xff]  }
 0x1dd   : > { %5563 = vmatprep.mubr.bf16.mxu0 %v10122_v38  ;;  %v10127_v62 = vld [vmem:[#allocation41_spill] sm:$0xff]  ;;  %v10128_v38 = vld [vmem:[#allocation70_spill] sm:$0xff] }
 0x1de   : > { %3947 = vmatpush1.bf16.msra.mxu1 %v7878_v56  ;;  %v7905_v56 = vld [vmem:[#allocation2 + $0x284] ss:$8 sps:$4 sm:$0xff]  }
 0x1df   : > { %5562 = vmatpush1.bf16.msra.mxu0 %v7881_v57  ;;  %3948 = vmatprep.subr.bf16.mxu1 %v7886_v28  ;;  %v992_v57 = vrot.slane %v10104_v43, 1  ;;  %v7988_v28 = vld [vmem:[%s8302_s11 + $0xf8] sm:$0xf]  ;;  %v991_v43 = vrot.slane %v9200_v17, 1 }
 0x1e0   : > { %5644 = vmatprep.subr.bf16.mxu0 %v7889_v21  ;;  %v6289_v21 = vcombine.low %v7988_v28, %v7987_v26  ;;  %v7933_v17 = vld [vmem:[#allocation2 + $0xd50] ss:$8 sps:$4 sm:$0xff]  }
 0x1e1   : > { %3880 = vmatmul.mubr.bf16.gmra.mrb[40].mxu1 %v9221_v61  ;;  %v6290_v61 = vcombine.low %v760_v7, %v10125_v39  ;;  %v10133_v39 = vld [vmem:[#allocation55_spill] sm:$0xff]  ;;  %v10137_v26 = vld [vmem:[#allocation25_spill] sm:$0xff] }
 0x1e2   : > { %5564 = vmatmul.mubr.bf16.vlgmr.msra.gmra.mrb[32].mxu0 %v10123_v2  ;;  %3949 = vmatpush1.bf16.msra.mxu1 %v7884_v55  ;;  %v10129_v55 = vrot.slane %v10128_v38, 1  ;;  %v7935_v2 = vld [vmem:[#allocation2 + $0xd54] ss:$8 sps:$4 sm:$0xff]   ;;  %v554_v28 = vshll.u32 %v10137_v26, 16 }
 0x1e3   : > { %5645 = vmatpush1.bf16.msra.mxu0 %v7887_v36  ;;  %3950 = vmatprep.subr.bf16.mxu1 %v7892_v58  ;;  %v7924_v58 = vld [vmem:[#allocation2 + $0xd40] ss:$8 sps:$4 sm:$0xff]  }
 0x1e4   : > { %3889 = vmatprep.mubr.bf16.mxu1 %v8885_v30  ;;  %5573 = vmatprep.mubr.bf16.mxu0 %v10124_v5  ;;  %v7917_v30 = vld [vmem:[#allocation2 + $0xd34] ss:$8 sps:$4 sm:$0xff]   ;;  %v6474_v36 = vcombine.low %v10129_v55, %v992_v57  ;;  %v556_v55 = vrot.slane %v554_v28, 1 }
 0x1e5   : > { %5646 = vmatprep.subr.bf16.mxu0 %v7898_v52  ;;  %v7909_v52 = vld [vmem:[#allocation2 + $0x290] ss:$8 sps:$4 sm:$0xff]   ;;  %v7920_v5 = vld [vmem:[#allocation2 + $0x2b4] ss:$8 sps:$4 sm:$0xff]  }
 0x1e6   : > { %3951 = vmatpush1.bf16.msra.mxu1 %v7890_v49  ;;  %v7914_v49 = vld [vmem:[#allocation2 + $0x2a4] ss:$8 sps:$4 sm:$0xff]  }
 0x1e7   : > { %5647 = vmatpush1.bf16.msra.mxu0 %v7896_v29  ;;  %3952 = vmatprep.subr.bf16.mxu1 %v7895_v16  ;;  %v10131_v29 = vld [vmem:[#allocation52_spill] sm:$0xff] }
 0x1e8   : > { %5648 = vmatprep.subr.bf16.mxu0 %v7908_v12  ;;  %v10132_v7 = vrot.slane %v10131_v29, 1  ;;  %v7912_v12 = vld [vmem:[#allocation2 + $0x2a0] ss:$8 sps:$4 sm:$0xff]   ;;  %v1022_v29 = vrot.slane %v10118_v8, 1 }
 0x1e9   : > { %3890 = vmatmul.mubr.bf16.gmra.mrb[44].mxu1 %v9238_v59  ;;  %v7903_v59 = vld [vmem:[#allocation2 + $0x280] ss:$8 sps:$4 sm:$0xff]  }
 0x1ea   : > { %5574 = vmatmul.mubr.bf16.gmra.mrb[36].mxu0 %v10126_v32  ;;  %3953 = vmatpush1.bf16.msra.mxu1 %v7893_v13  ;;  %v6473_v16 = vcombine.low %v10132_v7, %v991_v43  ;;  %v7941_v13 = vld [vmem:[#allocation2 + $0xd64] ss:$8 sps:$4 sm:$0xff]   ;;  %v7939_v32 = vld [vmem:[#allocation2 + $0xd60] ss:$8 sps:$4 sm:$0xff]  }
 0x1eb   : > { %3899 = vmatprep.mubr.bf16.mxu1 %v6290_v61  ;;  %3954 = vmatprep.subr.bf16.mxu1 %v7901_v20  ;;  %v561_v61 = vshll.u32 %v10133_v39, 16  ;;  %v10134_v20 = vld [vmem:[#allocation51_spill] sm:$0xff]  ;;  %v10141_v43 = vld [vmem:[#allocation66_spill] sm:$0xff] }
 0x1ec   : > { %5583 = vmatprep.mubr.bf16.mxu0 %v10127_v62  ;;  %5649 = vmatpush1.bf16.msra.mxu0 %v7906_v25  ;;  %v7923_v25 = vld [vmem:[#allocation2 + $0x2c4] ss:$8 sps:$4 sm:$0xff]   ;;  %v7929_v62 = vld [vmem:[#allocation2 + $0x2d4] ss:$8 sps:$4 sm:$0xff]   ;;  %v7990_v8 = vld [vmem:[#allocation2 + $0x300] ss:$8 sps:$4 sm:$0xff]  }
 0x1ed   : > { %5650 = vmatprep.subr.bf16.mxu0 %v7917_v30  ;;  %v7921_v30 = vld [vmem:[#allocation2 + $0x2c0] ss:$8 sps:$4 sm:$0xff]  }
 0x1ee   : > { %3955 = vmatpush1.bf16.msra.mxu1 %v7899_v3  ;;  %v559_v3 = vshrl.u32 %v10133_v39, 16  ;;  %v10144_v7 = vld [vmem:[#allocation67_spill] sm:$0xff] }
 0x1ef   : > { %3956 = vmatprep.subr.bf16.mxu1 %v7905_v56  ;;  %v10135_v56 = vrot.slane %v8801_v11, 1  ;;  %v552_v11 = vshrl.u32 %v10137_v26, 16  ;;  %v7999_v26 = vld [vmem:[#allocation2 + $0x354] ss:$8 sps:$4 sm:$0xff]  }
 0x1f0   : > { %5651 = vmatpush1.bf16.msra.mxu0 %v7915_v9  ;;  %v7944_v9 = vld [vmem:[#allocation2 + $0xd74] ss:$8 sps:$4 sm:$0xff]  }
 0x1f1   : > { %3900 = vmatmul.mubr.bf16.gmra.mrb[48].mxu1 %v6289_v21  ;;  %5652 = vmatprep.subr.bf16.mxu0 %v7926_v14  ;;  %v10138_v21 = vld [vmem:[#allocation56_spill] sm:$0xff] }
 0x1f2   : > { %5584 = vmatmul.mubr.bf16.gmra.mrb[40].mxu0 %v10130_v44  ;;  %3957 = vmatpush1.bf16.msra.mxu1 %v7903_v59  ;;  %v7942_v59 = vld [vmem:[#allocation2 + $0xd70] ss:$8 sps:$4 sm:$0xff]   ;;  %v7930_v44 = vld [vmem:[#allocation2 + $0x2e0] ss:$8 sps:$4 sm:$0xff]  }
 0x1f3   : > { %3909 = vmatprep.mubr.bf16.mxu1 %v8938_v10  ;;  %3958 = vmatprep.subr.bf16.mxu1 %v7911_v19  ;;  %v7918_v10 = vld [vmem:[#allocation2 + $0x2b0] ss:$8 sps:$4 sm:$0xff]  }
 0x1f4   : > { %5593 = vmatprep.mubr.bf16.mxu0 %v6474_v36  ;;  %5653 = vmatpush1.bf16.msra.mxu0 %v7924_v58  ;;  %v7927_v19 = vld [vmem:[#allocation2 + $0x2d0] ss:$8 sps:$4 sm:$0xff]   ;;  %v10139_v36 = vrot.slane %v8855_v46, 1  ;;  %v7938_v58 = vld [vmem:[#allocation2 + $0x2f4] ss:$8 sps:$4 sm:$0xff]  }
 0x1f5   : > { %5654 = vmatprep.subr.bf16.mxu0 %v7935_v2  ;;  %v10143_v2 = vrot.slane %v10039_v45, 1  ;;  %v7936_v46 = vld [vmem:[#allocation2 + $0x2f0] ss:$8 sps:$4 sm:$0xff]   ;;  %v10146_v45 = vrot.slane %v8858_v42, 1  ;;  %v10148_v42 = vld [vmem:[#allocation63_spill] sm:$0xff] }
 0x1f6   : > { %3959 = vmatpush1.bf16.msra.mxu1 %v7909_v52  ;;  %v10142_v52 = vrot.slane %v8838_v48, 1  ;;  %v10145_v48 = vrot.slane %v8898_v0, 1  ;;  %v7991_v0 = vld [vmem:[#allocation2 + $0x314] ss:$8 sps:$4 sm:$0xff]  }
 0x1f7   : > { %3960 = vmatprep.subr.bf16.mxu1 %v7914_v49 }
 0x1f8   : > { %5655 = vmatpush1.bf16.msra.mxu0 %v7933_v17  ;;  %v9480_v49 = vcombine.low %v10143_v2, %v10142_v52  ;;  %v10158_v52 = vld [vmem:[#allocation47_spill] sm:$0xff] }
 0x1f9   : > { %3910 = vmatmul.mubr.bf16.gmra.mrb[52].mxu1 %v9290_v18  ;;  %5656 = vmatprep.subr.bf16.mxu0 %v7941_v13  ;;  %v563_v18 = vrot.slane %v561_v61, 1  ;;  %v1021_v13 = vrot.slane %v9298_v37, 1  ;;  %v7992_v61 = vld [vmem:[#allocation2 + $0x310] ss:$8 sps:$4 sm:$0xff]  }
 0x1fa   : > { %5594 = vmatmul.mubr.bf16.gmra.mrb[44].mxu0 %v6473_v16  ;;  %3961 = vmatpush1.bf16.msra.mxu1 %v7912_v12  ;;  %v9491_v12 = vcombine.low %v10146_v45, %v10145_v48  ;;  %v10150_v37 = vld [vmem:[#allocation64_spill] sm:$0xff] }
 0x1fb   : > { %3919 = vmatprep.mubr.bf16.mxu1 %v8963_v27  ;;  %3962 = vmatprep.subr.bf16.mxu1 %v7920_v5  ;;  %v10136_v27 = vrot.slane %v8760_v22, 1  ;;  %v564_v38 = vor.u32 %v563_v18, %v559_v3  ;;  %v7932_v22 = vld [vmem:[#allocation2 + $0x2e4] ss:$8 sps:$4 sm:$0xff]   ;;  %v10147_v5 = vrot.slane %v9117_v15, 1  ;;  %v7994_v15 = vld [vmem:[#allocation2 + $0x320] ss:$8 sps:$4 sm:$0xff]  }
 0x1fc   : > { %5603 = vmatprep.mubr.bf16.mxu0 %v10134_v20  ;;  %5657 = vmatpush1.bf16.msra.mxu0 %v7939_v32  ;;  %v7993_v20 = vld [vmem:[#allocation2 + $0x324] ss:$8 sps:$4 sm:$0xff]   ;;  %v10151_v32 = vmov 0   ;;  %v769_v3 = vshrl.u32 %v10150_v37, 16 }
 0x1fd   : > { %v9461_v57 = vcombine.low %v10136_v27, %v10135_v56  ;;  %5658 = vmatprep.subr.bf16.mxu0 %v7944_v9  ;;  %v6483_v17 = vcombine.low %v10147_v5, %v1022_v29  ;;  %v10153_v56 = vld [vmem:[#allocation42_spill] sm:$0xff]  ;;  %v10160_v48 = vld [vmem:[#allocation48_spill] sm:$0xff] }
 0x1fe   : > { %3963 = vmatpush1.bf16.msra.mxu1 %v7918_v10  ;;  %v10149_v10 = vrot.slane %v10148_v42, 1  ;;  %v764_v27 = vshll.u32 %v10153_v56, 16  ;;  %v8002_v29 = vld [vmem:[#allocation2 + $0x360] ss:$8 sps:$4 sm:$0xff]   ;;  %v10163_v42 = vld [vmem:[#allocation53_spill] sm:$0xff] }
 0x1ff   : > { %3964 = vmatprep.subr.bf16.mxu1 %v7923_v25  ;;  %v771_v25 = vshll.u32 %v10150_v37, 16  ;;  %v10161_v5 = vld [vmem:[#allocation16_spill] sm:$0xff]  ;;  %v10165_v37 = vld [vmem:[#allocation14_spill] sm:$0xff] }
 0x200   : > { %5659 = vmatpush1.bf16.msra.mxu0 %v7942_v59  ;;  %v6482_v39 = vcombine.low %v10149_v10, %v1021_v13  ;;  %v10162_v13 = vld [vmem:[#allocation50_spill] sm:$0xff] }
 0x201   : > { %3920 = vmatmul.mubr.bf16.gmra.mrb[56].mxu1 %v9315_v6  ;;  %v10140_v6 = vrot.slane %v8831_v41, 1  ;;  %v557_v41 = vor.u32 %v556_v55, %v552_v11  ;;  %v773_v18 = vrot.slane %v771_v25, 1  ;;  %v993_v25 = vrot.slane %v9343_v24, 1 }
 0x202   : > { %5604 = vmatmul.mubr.bf16.gmra.mrb[48].mxu0 %v10138_v21  ;;  %3965 = vmatpush1.bf16.msra.mxu1 %v7921_v30  ;;  %v7996_v30 = vld [vmem:[#allocation2 + $0x330] ss:$8 sps:$4 sm:$0xff]  }
 0x203   : > { %3929 = vmatprep.mubr.bf16.mxu1 %v8986_v23  ;;  %3966 = vmatprep.subr.bf16.mxu1 %v7929_v62  ;;  %v9473_v14 = vcombine.low %v10140_v6, %v10139_v36  ;;  %v6256_v23 = vcombine.low %v564_v38, %v10141_v43  ;;  %v6255_v16 = vcombine.low %v557_v41, %v10144_v7  ;;  %v7997_v62 = vld [vmem:[#allocation2 + $0x344] ss:$8 sps:$4 sm:$0xff]   ;;  %v10154_v21 = vld [vmem:[#allocation22_spill] sm:$0xff]  ;;  %v766_v38 = vrot.slane %v764_v27, 1 }
 0x204   : > { %5613 = vmatprep.mubr.bf16.mxu0 %v9461_v57  ;;  %v774_v9 = vor.u32 %v773_v18, %v769_v3  ;;  %v8000_v36 = vld [vmem:[#allocation2 + $0x350] ss:$8 sps:$4 sm:$0xff]   ;;  %v8003_v7 = vld [vmem:[#allocation2 + $0x374] ss:$8 sps:$4 sm:$0xff]   ;;  %v10166_v18 = vld [vmem:[#allocation31_spill] sm:$0xff] }
 0x205   : > { %v10159_v41 = vld [vmem:[#allocation12_spill] sm:$0xff] }
 0x206   : > { %3967 = vmatpush1.bf16.msra.mxu1 %v7927_v19 }
 0x207   : > { %3968 = vmatprep.subr.bf16.mxu1 %v7932_v22  ;;  %v10155_v22 = vld [vmem:[#allocation40_spill] sm:$0xff] }
 0x209   : > { %3930 = vmatmul.mubr.bf16.gmra.mrb[60].mxu1 %v9324_v50  ;;  %v7989_v50 = vld [vmem:[#allocation2 + $0x304] ss:$8 sps:$4 sm:$0xff]  }
 0x20a   : > { %5614 = vmatmul.mubr.bf16.gmra.mrb[52].mxu0 %v9473_v14  ;;  %3969 = vmatpush1.bf16.msra.mxu1 %v7930_v44  ;;  %v10157_v44 = vld [vmem:[#allocation43_spill] sm:$0xff] }
 0x20b   : > { %3972 = vmatprep.mubr.bf16.mxu1 %v6256_v23  ;;  %3970 = vmatprep.subr.bf16.mxu1 %v7938_v58  ;;  %v8001_v58 = vld [vmem:[#allocation2 + $0x364] ss:$8 sps:$4 sm:$0xff]  }
 0x20c   : > { %5623 = vmatprep.mubr.bf16.mxu0 %v9480_v49 }
 0x20e   : > { %3971 = vmatpush1.bf16.msra.mxu1 %v7936_v46 }
 0x20f   : > { %6637 = vmatprep.subr.bf16.mxu1 %v7989_v50 }
 0x211   : > { %3973 = vmatmul.mubr.bf16.vlgmr.msra.gmra.mrb[32].mxu1 %v6255_v16 }
 0x212   : > { %5624 = vmatmul.mubr.bf16.gmra.mrb[56].mxu0 %v9491_v12  ;;  %6653 = vmatpush1.bf16.msra.mxu1 %v7990_v8 }
 0x213   : > { %3982 = vmatprep.mubr.bf16.mxu1 %v9336_v40  ;;  %6638 = vmatprep.subr.bf16.mxu1 %v7991_v0  ;;  %v7995_v40 = vld [vmem:[#allocation2 + $0x334] ss:$8 sps:$4 sm:$0xff]   ;;  %v8004_v0 = vld [vmem:[#allocation2 + $0x370] ss:$8 sps:$4 sm:$0xff]  }
 0x214   : > { %5633 = vmatprep.mubr.bf16.mxu0 %v6483_v17 }
 0x216   : > { %6654 = vmatpush1.bf16.msra.mxu1 %v7992_v61  ;;  %v8005_v61 = vld [vmem:[#allocation2 + $0x384] ss:$8 sps:$4 sm:$0xff]  }
 0x217   : > { %6639 = vmatprep.subr.bf16.mxu1 %v7993_v20  ;;  %v10164_v20 = vld [vmem:[#allocation75_spill] sm:$0xff] }
 0x219   : > { %3983 = vmatmul.mubr.bf16.gmra.mrb[36].mxu1 %v10099_v1  ;;  %v10152_v1 = vld [vmem:[#allocation11_spill] sm:$0xff] }
 0x21a   : > { %5634 = vmatmul.mubr.bf16.gmra.mrb[60].mxu0 %v6482_v39  ;;  %6655 = vmatpush1.bf16.msra.mxu1 %v7994_v15 }
 0x21b   : > { %3992 = vmatprep.mubr.bf16.mxu1 %v9347_v4  ;;  %6640 = vmatprep.subr.bf16.mxu1 %v7995_v40  ;;  %v7998_v4 = vld [vmem:[#allocation2 + $0x340] ss:$8 sps:$4 sm:$0xff]  }
 0x21c   : > { %5676 = vmatprep.mubr.bf16.mxu0 %v10151_v32  ;;  %v8006_v40 = vld [vmem:[#allocation2 + $0x380] ss:$8 sps:$4 sm:$0xff]  }
 0x21e   : > { %6656 = vmatpush1.bf16.msra.mxu1 %v7996_v30  ;;  %v8007_v30 = vld [vmem:[#allocation2 + $0x394] ss:$8 sps:$4 sm:$0xff]  }
 0x21f   : > { %6641 = vmatprep.subr.bf16.mxu1 %v7997_v62 }
 0x221   : > { %3993 = vmatmul.mubr.bf16.gmra.mrb[40].mxu1 %v9356_v60  ;;  %v762_v60 = vshrl.u32 %v10153_v56, 16  ;;  %v10167_v56 = vld [vmem:[#allocation13_spill] sm:$0xff] }
 0x222   : > { %5677 = vmatmul.mubr.bf16.vlgmr.msra.gmra.mrb[32].mxu0 %v10152_v1  ;;  %6657 = vmatpush1.bf16.msra.mxu1 %v7998_v4  ;;  %v10168_v27 = vrot.slane %v10167_v56, 1  ;;  %v8019_v56 = vld [vmem:[#allocation2 + $0x3f4] ss:$8 sps:$4 sm:$0xff]  }
 0x223   : > { %4002 = vmatprep.mubr.bf16.mxu1 %v9362_v63  ;;  %6642 = vmatprep.subr.bf16.mxu1 %v7999_v26  ;;  %v10156_v63 = vld [vmem:[#allocation27_spill] sm:$0xff]  ;;  %v767_v46 = vor.u32 %v766_v38, %v762_v60  ;;  %v10171_v38 = vld [vmem:[#allocation76_spill] sm:$0xff] }
 0x224   : > { %5686 = vmatprep.mubr.bf16.mxu0 %v10151_v32  ;;  %v2658_v28 = vpop.f32.mrb[0].mxu1  ;;  %v6292_v6 = vcombine.low %v774_v9, %v10156_v63  ;;  %v6475_v4 = vcombine.low %v10168_v27, %v993_v25  ;;  %v10169_v9 = vld [vmem:[#allocation54_spill] sm:$0xff]  ;;  %v8009_v60 = vld [vmem:[#allocation2 + $0x3a4] ss:$8 sps:$4 sm:$0xff]  }
 0x225   : > { %v9511_v59 = vadd.f32 %v10154_v21, %v2658_v28  ;;  %v2660_v19 = vpop.f32.mrb[1].mxu1  ;;  %v6291_v17 = vcombine.low %v767_v46, %v10161_v5  ;;  %v8008_v28 = vld [vmem:[#allocation2 + $0x390] ss:$8 sps:$4 sm:$0xff]   ;;  %v8014_v5 = vld [vmem:[#allocation2 + $0x3c0] ss:$8 sps:$4 sm:$0xff]  }
 0x226   : > { %v9515_v11 = vadd.f32 %v10155_v22, %v2660_v19  ;;  %v2662_v55 = vpop.f32.mrb[2].mxu1  ;;  %6658 = vmatpush1.bf16.msra.mxu1 %v8000_v36  ;;  %v10170_v21 = vld [vmem:[#allocation57_spill] sm:$0xff] }
 0x227   : > { %v9519_v43 = vadd.f32 %v10157_v44, %v2662_v55  ;;  %v2664_v23 = vpop.f32.mrb[3].mxu1  ;;  %6643 = vmatprep.subr.bf16.mxu1 %v8001_v58  ;;  %v8010_v55 = vld [vmem:[#allocation2 + $0x3a0] ss:$8 sps:$4 sm:$0xff]   ;;  %v8011_v36 = vld [vmem:[#allocation2 + $0x3b4] ss:$8 sps:$4 sm:$0xff]  }
 0x228   : > { %v9522_v2 = vadd.f32 %v10158_v52, %v2664_v23  ;;  %v10173_v58 = vld [vmem:[#allocation60_spill] sm:$0xff] }
 0x229   : > { %4003 = vmatmul.mubr.bf16.gmra.mrb[44].mxu1 %v9371_v35  ;;  %v8012_v46 = vld [vmem:[#allocation2 + $0x3b0] ss:$8 sps:$4 sm:$0xff]  }
 0x22a   : > { %5687 = vmatmul.mubr.bf16.gmra.mrb[36].mxu0 %v10159_v41  ;;  %6659 = vmatpush1.bf16.msra.mxu1 %v8002_v29 }
 0x22b   : > { %4012 = vmatprep.mubr.bf16.mxu1 %v6292_v6  ;;  %6644 = vmatprep.subr.bf16.mxu1 %v8003_v7  ;;  %v10172_v6 = vld [vmem:[#allocation58_spill] sm:$0xff] }
 0x22c   : > { %5696 = vmatprep.mubr.bf16.mxu0 %v10151_v32  ;;  %v2668_v16 = vpop.f32.mrb[4].mxu1 }
 0x22d   : > { %v9528_v45 = vadd.f32 %v10160_v48, %v2668_v16  ;;  %v2670_v50 = vpop.f32.mrb[5].mxu1  ;;  %v10175_v16 = vld [vmem:[#allocation78_spill] sm:$0xff] }
 0x22e   : > { %v9532_v8 = vadd.f32 %v10162_v13, %v2670_v50  ;;  %v2672_v35 = vpop.f32.mrb[6].mxu1  ;;  %6660 = vmatpush1.bf16.msra.mxu1 %v8004_v0  ;;  %v10176_v50 = vld [vmem:[#allocation18_spill] sm:$0xff] }
 0x22f   : > { %v9535_v10 = vadd.f32 %v10163_v42, %v2672_v35  ;;  %v2674_v39 = vpop.f32.mrb[7].mxu1  ;;  %6645 = vmatprep.subr.bf16.mxu1 %v8005_v61  ;;  %v10177_v35 = vld [vmem:[#allocation79_spill] sm:$0xff] }
 0x230   : > { %v9538_v15 = vadd.f32 %v10164_v20, %v2674_v39  ;;  %v10178_v39 = vld [vmem:[#allocation80_spill] sm:$0xff] }
 0x231   : > { %4013 = vmatmul.mubr.bf16.gmra.mrb[48].mxu1 %v6291_v17  ;;  %v8015_v17 = vld [vmem:[#allocation2 + $0x3d4] ss:$8 sps:$4 sm:$0xff]  }
 0x232   : > { %5697 = vmatmul.mubr.bf16.gmra.mrb[40].mxu0 %v10165_v37  ;;  %6661 = vmatpush1.bf16.msra.mxu1 %v8006_v40  ;;  %v10179_v37 = vld [vmem:[#allocation39_spill] sm:$0xff] }
 0x233   : > { %4022 = vmatprep.mubr.bf16.mxu1 %v9380_v51  ;;  %6646 = vmatprep.subr.bf16.mxu1 %v8007_v30  ;;  %v10180_v30 = vld [vmem:[#allocation81_spill] sm:$0xff] }
 0x234   : > { %5706 = vmatprep.mubr.bf16.mxu0 %v10151_v32  ;;  %v2678_v3 = vpop.f32.mrb[8].mxu1 }
 0x235   : > { %v9545_v62 = vadd.f32 %v10166_v18, %v2678_v3  ;;  %v2680_v1 = vpop.f32.mrb[9].mxu1  ;;  %v10181_v18 = vld [vmem:[#allocation21_spill] sm:$0xff] }
 0x236   : > { %v9550_v26 = vadd.f32 %v10169_v9, %v2680_v1  ;;  %v2682_v24 = vpop.f32.mrb[10].mxu1  ;;  %6662 = vmatpush1.bf16.msra.mxu1 %v8008_v28  ;;  %v8018_v1 = vld [vmem:[#allocation2 + $0x3e0] ss:$8 sps:$4 sm:$0xff]  }
 0x237   : > { %v9553_v51 = vadd.f32 %v10170_v21, %v2682_v24  ;;  %v2684_v19 = vpop.f32.mrb[11].mxu1  ;;  %6647 = vmatprep.subr.bf16.mxu1 %v8009_v60  ;;  %v10183_v28 = vld [vmem:[#allocation83_spill] sm:$0xff]  ;;  %v10184_v60 = vld [vmem:[#allocation84_spill] sm:$0xff] }
 0x238   : > { %v9556_v22 = vadd.f32 %v10171_v38, %v2684_v19 }
 0x239   : > { %4023 = vmatmul.mubr.bf16.gmra.mrb[52].mxu1 %v9389_v31  ;;  %v10174_v31 = vld [vmem:[#allocation77_spill] sm:$0xff] }
 0x23a   : > { %5707 = vmatmul.mubr.bf16.gmra.mrb[44].mxu0 %v6475_v4  ;;  %6663 = vmatpush1.bf16.msra.mxu1 %v8010_v55  ;;  %v10182_v4 = vld [vmem:[#allocation82_spill] sm:$0xff] }
 0x23b   : > { %4032 = vmatprep.mubr.bf16.mxu1 %v9396_v47  ;;  %6648 = vmatprep.subr.bf16.mxu1 %v8011_v36  ;;  %v8013_v47 = vld [vmem:[#allocation2 + $0x3c4] ss:$8 sps:$4 sm:$0xff]  }
 0x23c   : > { %5716 = vmatprep.mubr.bf16.mxu0 %v10151_v32  ;;  %v2688_v63 = vpop.f32.mrb[12].mxu1 }
 0x23d   : > { %v9562_v44 = vadd.f32 %v10172_v6, %v2688_v63  ;;  %v2690_v23 = vpop.f32.mrb[13].mxu1  ;;  %v10186_v63 = vld [vmem:[#allocation23_spill] sm:$0xff]  ;;  %v1023_v6 = vrot.slane %v9392_v54, 1 }
 0x23e   : > { %v9565_v52 = vadd.f32 %v10173_v58, %v2690_v23  ;;  %v2692_v41 = vpop.f32.mrb[14].mxu1  ;;  %6664 = vmatpush1.bf16.msra.mxu1 %v8012_v46  ;;  %v10187_v58 = vld [vmem:[#allocation86_spill] sm:$0xff] }
 0x23f   : > { %v9568_v29 = vadd.f32 %v10174_v31, %v2692_v41  ;;  %v2694_v7 = vpop.f32.mrb[15].mxu1  ;;  %6649 = vmatprep.subr.bf16.mxu1 %v8013_v47  ;;  %v10188_v31 = vld [vmem:[#allocation24_spill] sm:$0xff] }
 0x240   : > { %v9571_v48 = vadd.f32 %v10175_v16, %v2694_v7  ;;  %v10189_v7 = vrot.slane %v10188_v31, 1  ;;  %v10190_v16 = vld [vmem:[#allocation87_spill] sm:$0xff] }
 0x241   : > { %4033 = vmatmul.mubr.bf16.gmra.mrb[56].mxu1 %v9406_v53  ;;  %v8016_v53 = vld [vmem:[#allocation2 + $0x3d0] ss:$8 sps:$4 sm:$0xff]  }
 0x242   : > { %5717 = vmatmul.mubr.bf16.gmra.mrb[48].mxu0 %v10176_v50  ;;  %6665 = vmatpush1.bf16.msra.mxu1 %v8014_v5  ;;  %v6484_v47 = vcombine.low %v10189_v7, %v1023_v6  ;;  %v10191_v5 = vld [vmem:[#allocation88_spill] sm:$0xff] }
 0x243   : > { %4042 = vmatprep.mubr.bf16.mxu1 %v9411_v34  ;;  %6650 = vmatprep.subr.bf16.mxu1 %v8015_v17  ;;  %v8017_v34 = vld [vmem:[#allocation2 + $0x3e4] ss:$8 sps:$4 sm:$0xff]  }
 0x244   : > { %5726 = vmatprep.mubr.bf16.mxu0 %v10151_v32  ;;  %v2698_v13 = vpop.f32.mrb[16].mxu1 }
 0x245   : > { %v9578_v0 = vadd.f32 %v10177_v35, %v2698_v13  ;;  %v2700_v42 = vpop.f32.mrb[17].mxu1  ;;  %v10192_v13 = vld [vmem:[#allocation89_spill] sm:$0xff]  ;;  %v10193_v35 = vld [vmem:[#allocation90_spill] sm:$0xff] }
 0x246   : > { %v9581_v61 = vadd.f32 %v10178_v39, %v2700_v42  ;;  %v2702_v20 = vpop.f32.mrb[18].mxu1  ;;  %6666 = vmatpush1.bf16.msra.mxu1 %v8016_v53 }
 0x247   : > { %v9584_v25 = vadd.f32 %v10179_v37, %v2702_v20  ;;  %v2704_v40 = vpop.f32.mrb[19].mxu1  ;;  %6651 = vmatprep.subr.bf16.mxu1 %v8017_v34  ;;  %v10194_v20 = vld [vmem:[#allocation91_spill] sm:$0xff] }
 0x248   : > { %v9587_v3 = vadd.f32 %v10180_v30, %v2704_v40  ;;  %v10195_v40 = vld [vmem:[#allocation92_spill] sm:$0xff] }
 0x249   : > { %4043 = vmatmul.mubr.bf16.gmra.mrb[60].mxu1 %v9422_v33  ;;  %v8020_v33 = vld [vmem:[#allocation2 + $0x3f0] ss:$8 sps:$4 sm:$0xff]  }
 0x24a   : > { %5727 = vmatmul.mubr.bf16.gmra.mrb[52].mxu0 %v10181_v18  ;;  %6667 = vmatpush1.bf16.msra.mxu1 %v8018_v1  ;;  %v10196_v18 = vld [vmem:[#allocation93_spill] sm:$0xff] }
 0x24b   : > { %4145 = vmatprep.mubr.bf16.mxu1 %v9461_v57  ;;  %6652 = vmatprep.subr.bf16.mxu1 %v8019_v56  ;;  %v10185_v57 = vld [vmem:[#allocation85_spill] sm:$0xff] }
 0x24c   : > { %5736 = vmatprep.mubr.bf16.mxu0 %v10151_v32  ;;  %v2708_v27 = vpop.f32.mrb[20].mxu1 }
 0x24d   : > { %v9594_v9 = vadd.f32 %v10182_v4, %v2708_v27  ;;  %v2710_v24 = vpop.f32.mrb[21].mxu1 }
 0x24e   : > { %v9597_v21 = vadd.f32 %v10183_v28, %v2710_v24  ;;  %v2712_v19 = vpop.f32.mrb[22].mxu1  ;;  %6668 = vmatpush1.bf16.msra.mxu1 %v8020_v33  ;;  %v5791_v33 = vlaneseq }
 0x24f   : > { %v9600_v38 = vadd.f32 %v10184_v60, %v2712_v19  ;;  %v2714_v55 = vpop.f32.mrb[23].mxu1 }
 0x250   : > { %v9603_v36 = vadd.f32 %v10185_v57, %v2714_v55  ;;  %v5792_v55 = vshrl.u32 %v5791_v33, 7 }
 0x251   : > { %4146 = vmatmul.mubr.bf16.vlgmr.msra.gmra.mrb[56].mxu1 %v9473_v14 }
 0x252   : > { %5737 = vmatmul.mubr.bf16.gmra.mrb[56].mxu0 %v10186_v63  ;;  %4155 = vmatprep.mubr.bf16.mxu1 %v9480_v49  ;;  %v5797_v7 = vsub.s32 1, %v5792_v55 }
 0x253   : > { %5746 = vmatprep.mubr.bf16.mxu0 %v10151_v32 }
 0x254   : > { %v2718_v23 = vpop.f32.mrb[24].mxu1 }
 0x255   : > { %v9611_v41 = vadd.f32 %v10187_v58, %v2718_v23  ;;  %v2720_v46 = vpop.f32.mrb[25].mxu1 }
 0x256   : > { %v9616_v50 = vadd.f32 %v10190_v16, %v2720_v46  ;;  %v2722_v14 = vpop.f32.mrb[26].mxu1  ;;  %v5793_v46 = vsub.s32 0, %v5792_v55 }
 0x257   : > { %v9619_v17 = vadd.f32 %v10191_v5, %v2722_v14  ;;  %v2724_v54 = vpop.f32.mrb[27].mxu1 }
 0x258   : > { %v9622_v49 = vadd.f32 %v10192_v13, %v2724_v54 }
 0x259   : > { %4156 = vmatmul.mubr.bf16.gmra.mrb[60].mxu1 %v9491_v12 }
 0x25a   : > { %5747 = vmatmul.mubr.bf16.gmra.mrb[60].mxu0 %v6484_v47 }
 0x25c   : > { %v2728_v32 = vpop.f32.mrb[28].mxu1 }
 0x25d   : > { %v9626_v42 = vadd.f32 %v10193_v35, %v2728_v32  ;;  %v2730_v39 = vpop.f32.mrb[29].mxu1 }
 0x25e   : > { %v9629_v53 = vadd.f32 %v10194_v20, %v2730_v39  ;;  %v2732_v37 = vpop.f32.mrb[30].mxu1 }
 0x25f   : > { %v9632_v34 = vadd.f32 %v10195_v40, %v2732_v37  ;;  %v2734_v30 = vpop.f32.mrb[31].mxu1 }
 0x260   : > { %v9635_v1 = vadd.f32 %v10196_v18, %v2734_v30 }
 0x2e4   : > { %v3974_v56 = vpop.f32.mrb[32].mxu1 }
 0x2e5   : > { %v6670_v12 = vadd.f32 %v9511_v59, %v3974_v56  ;;  %v3976_v27 = vpop.f32.mrb[33].mxu1 }
 0x2e6   : > { %v6673_v4 = vadd.f32 %v9515_v11, %v3976_v27  ;;  %v3978_v24 = vpop.f32.mrb[34].mxu1 }
 0x2e7   : > { %v6676_v28 = vadd.f32 %v9519_v43, %v3978_v24  ;;  %v3980_v19 = vpop.f32.mrb[35].mxu1  ;;  %v5789_v43 = vld [vmem:[#allocation5] sm:$0x3] }
 0x2e8   : > { %v6679_v60 = vadd.f32 %v9522_v2, %v3980_v19  ;;  %v9648_v2 = vrot.slane %v5789_v43, %v5793_v46 }
 0x2ec   : > { %v3984_v57 = vpop.f32.mrb[36].mxu1 }
 0x2ed   : > { %v6682_v63 = vadd.f32 %v9528_v45, %v3984_v57  ;;  %v3986_v6 = vpop.f32.mrb[37].mxu1  ;;  %v9650_v45 = vrot.slane %v5789_v43, %v5797_v7 }
 0x2ee   : > { %v6685_v23 = vadd.f32 %v9532_v8, %v3986_v6  ;;  %v3988_v59 = vpop.f32.mrb[38].mxu1 }
 0x2ef   : > { %v6688_v58 = vadd.f32 %v9535_v10, %v3988_v59  ;;  %v3990_v11 = vpop.f32.mrb[39].mxu1 }
 0x2f0   : > { %v6691_v31 = vadd.f32 %v9538_v15, %v3990_v11 }
 0x2f4   : > { %v3994_v47 = vpop.f32.mrb[40].mxu1 }
 0x2f5   : > { %v5678_v16 = vpop.f32.mrb[32].mxu0  ;;  %v6694_v8 = vadd.f32 %v9545_v62, %v3994_v47  ;;  %v3996_v5 = vpop.f32.mrb[41].mxu1 }
 0x2f6   : > { %v6671_v14 = vadd.f32 %v6670_v12, %v5678_v16  ;;  %v5680_v10 = vpop.f32.mrb[33].mxu0  ;;  %v6697_v54 = vadd.f32 %v9550_v26, %v3996_v5  ;;  %v3998_v15 = vpop.f32.mrb[42].mxu1 }
 0x2f7   : > { %v6674_v13 = vadd.f32 %v6673_v4, %v5680_v10  ;;  %v5682_v32 = vpop.f32.mrb[34].mxu0  ;;  %v6700_v39 = vadd.f32 %v9553_v51, %v3998_v15  ;;  %v4000_v37 = vpop.f32.mrb[43].mxu1 }
 0x2f8   : > { %v5801_v35 = vadd.f32 %v6671_v14, %v9648_v2  ;;  %v6677_v20 = vadd.f32 %v6676_v28, %v5682_v32  ;;  %v5684_v40 = vpop.f32.mrb[35].mxu0  ;;  %v6703_v18 = vadd.f32 %v9556_v22, %v4000_v37 }
 0x2f9   : > { %v5802_v30 = vadd.f32 %v6674_v13, %v9650_v45  ;;  %v6680_v62 = vadd.f32 %v6679_v60, %v5684_v40 }
 0x2fa   : > { %5833 = vst [vmem:[%s9658_s20] sm:$0xff] %v5801_v35  ;;  %v5803_v26 = vadd.f32 %v6677_v20, %v9648_v2 }
 0x2fb   : > { %5834 = vst [vmem:[%s9658_s20 + $0x8] sm:$0xff] %v5802_v30  ;;  %v5804_v51 = vadd.f32 %v6680_v62, %v9650_v45 }
 0x2fc   : > { %5835 = vst [vmem:[%s9658_s20 + $0x10] sm:$0xff] %v5803_v26  ;;  %v4004_v56 = vpop.f32.mrb[44].mxu1 }
 0x2fd   : > { %5836 = vst [vmem:[%s9658_s20 + $0x18] sm:$0xff] %v5804_v51  ;;  %v5688_v12 = vpop.f32.mrb[36].mxu0  ;;  %v6706_v27 = vadd.f32 %v9562_v44, %v4004_v56  ;;  %v4006_v4 = vpop.f32.mrb[45].mxu1 }
 0x2fe   : > { %v6683_v22 = vadd.f32 %v6682_v63, %v5688_v12  ;;  %v5690_v24 = vpop.f32.mrb[37].mxu0  ;;  %v6709_v28 = vadd.f32 %v9565_v52, %v4006_v4  ;;  %v4008_v33 = vpop.f32.mrb[46].mxu1 }
 0x2ff   : > { %v6686_v19 = vadd.f32 %v6685_v23, %v5690_v24  ;;  %v5692_v60 = vpop.f32.mrb[38].mxu0  ;;  %v6712_v57 = vadd.f32 %v9568_v29, %v4008_v33  ;;  %v4010_v59 = vpop.f32.mrb[47].mxu1 }
 0x300   : > { %v5805_v55 = vadd.f32 %v6683_v22, %v9648_v2  ;;  %v6689_v6 = vadd.f32 %v6688_v58, %v5692_v60  ;;  %v5694_v11 = vpop.f32.mrb[39].mxu0  ;;  %v6715_v63 = vadd.f32 %v9571_v48, %v4010_v59 }
 0x301   : > { %v5806_v44 = vadd.f32 %v6686_v19, %v9650_v45  ;;  %v6692_v46 = vadd.f32 %v6691_v31, %v5694_v11 }
 0x302   : > { %5837 = vst [vmem:[%s9658_s20 + $0x20] sm:$0xff] %v5805_v55  ;;  %v5807_v52 = vadd.f32 %v6689_v6, %v9648_v2 }
 0x303   : > { %5838 = vst [vmem:[%s9658_s20 + $0x28] sm:$0xff] %v5806_v44  ;;  %v5808_v23 = vadd.f32 %v6692_v46, %v9650_v45 }
 0x304   : > { %5839 = vst [vmem:[%s9658_s20 + $0x30] sm:$0xff] %v5807_v52  ;;  %v4014_v43 = vpop.f32.mrb[48].mxu1 }
 0x305   : > { %5840 = vst [vmem:[%s9658_s20 + $0x38] sm:$0xff] %v5808_v23  ;;  %v5698_v7 = vpop.f32.mrb[40].mxu0  ;;  %v6718_v29 = vadd.f32 %v9578_v0, %v4014_v43  ;;  %v4016_v47 = vpop.f32.mrb[49].mxu1 }
 0x306   : > { %v6695_v58 = vadd.f32 %v6694_v8, %v5698_v7  ;;  %v5700_v16 = vpop.f32.mrb[41].mxu0  ;;  %v6721_v48 = vadd.f32 %v9581_v61, %v4016_v47  ;;  %v4018_v14 = vpop.f32.mrb[50].mxu1 }
 0x307   : > { %v6698_v31 = vadd.f32 %v6697_v54, %v5700_v16  ;;  %v5702_v5 = vpop.f32.mrb[42].mxu0  ;;  %v6724_v13 = vadd.f32 %v9584_v25, %v4018_v14  ;;  %v4020_v32 = vpop.f32.mrb[51].mxu1 }
 0x308   : > { %v5809_v10 = vadd.f32 %v6695_v58, %v9648_v2  ;;  %v6701_v15 = vadd.f32 %v6700_v39, %v5702_v5  ;;  %v5704_v35 = vpop.f32.mrb[43].mxu0  ;;  %v6727_v8 = vadd.f32 %v9587_v3, %v4020_v32 }
 0x309   : > { %v5810_v0 = vadd.f32 %v6698_v31, %v9650_v45  ;;  %v6704_v20 = vadd.f32 %v6703_v18, %v5704_v35 }
 0x30a   : > { %5841 = vst [vmem:[%s9658_s20 + $0x40] sm:$0xff] %v5809_v10  ;;  %v5811_v61 = vadd.f32 %v6701_v15, %v9648_v2 }
 0x30b   : > { %5842 = vst [vmem:[%s9658_s20 + $0x48] sm:$0xff] %v5810_v0  ;;  %v5812_v54 = vadd.f32 %v6704_v20, %v9650_v45 }
 0x30c   : > { %5843 = vst [vmem:[%s9658_s20 + $0x50] sm:$0xff] %v5811_v61  ;;  %v4024_v37 = vpop.f32.mrb[52].mxu1 }
 0x30d   : > { %5844 = vst [vmem:[%s9658_s20 + $0x58] sm:$0xff] %v5812_v54  ;;  %v5708_v40 = vpop.f32.mrb[44].mxu0  ;;  %v6730_v25 = vadd.f32 %v9594_v9, %v4024_v37  ;;  %v4026_v30 = vpop.f32.mrb[53].mxu1 }
 0x30e   : > { %v6707_v39 = vadd.f32 %v6706_v27, %v5708_v40  ;;  %v5710_v62 = vpop.f32.mrb[45].mxu0  ;;  %v6733_v3 = vadd.f32 %v9597_v21, %v4026_v30  ;;  %v4028_v26 = vpop.f32.mrb[54].mxu1 }
 0x30f   : > { %v6710_v18 = vadd.f32 %v6709_v28, %v5710_v62  ;;  %v5712_v51 = vpop.f32.mrb[46].mxu0  ;;  %v6736_v12 = vadd.f32 %v9600_v38, %v4028_v26  ;;  %v4030_v4 = vpop.f32.mrb[55].mxu1 }
 0x310   : > { %v5813_v56 = vadd.f32 %v6707_v39, %v9648_v2  ;;  %v6713_v22 = vadd.f32 %v6712_v57, %v5712_v51  ;;  %v5714_v24 = vpop.f32.mrb[47].mxu0  ;;  %v6739_v27 = vadd.f32 %v9603_v36, %v4030_v4 }
 0x311   : > { %v5814_v9 = vadd.f32 %v6710_v18, %v9650_v45  ;;  %v6716_v19 = vadd.f32 %v6715_v63, %v5714_v24 }
 0x312   : > { %5845 = vst [vmem:[%s9658_s20 + $0x60] sm:$0xff] %v5813_v56  ;;  %v5815_v21 = vadd.f32 %v6713_v22, %v9648_v2 }
 0x313   : > { %5846 = vst [vmem:[%s9658_s20 + $0x68] sm:$0xff] %v5814_v9  ;;  %v5816_v28 = vadd.f32 %v6716_v19, %v9650_v45 }
 0x314   : > { %5847 = vst [vmem:[%s9658_s20 + $0x70] sm:$0xff] %v5815_v21 }
 0x315   : > { %5848 = vst [vmem:[%s9658_s20 + $0x78] sm:$0xff] %v5816_v28  ;;  %v5718_v38 = vpop.f32.mrb[48].mxu0 }
 0x316   : > { %v6719_v33 = vadd.f32 %v6718_v29, %v5718_v38  ;;  %v5720_v60 = vpop.f32.mrb[49].mxu0 }
 0x317   : > { %v6722_v55 = vadd.f32 %v6721_v48, %v5720_v60  ;;  %v5722_v57 = vpop.f32.mrb[50].mxu0 }
 0x318   : > { %v5817_v36 = vadd.f32 %v6719_v33, %v9648_v2  ;;  %v6725_v6 = vadd.f32 %v6724_v13, %v5722_v57  ;;  %v5724_v59 = vpop.f32.mrb[51].mxu0 }
 0x319   : > { %v5818_v11 = vadd.f32 %v6722_v55, %v9650_v45  ;;  %v6728_v44 = vadd.f32 %v6727_v8, %v5724_v59 }
 0x31a   : > { %5849 = vst [vmem:[%s9658_s20 + $0x80] sm:$0xff] %v5817_v36  ;;  %v5819_v63 = vadd.f32 %v6725_v6, %v9648_v2 }
 0x31b   : > { %5850 = vst [vmem:[%s9658_s20 + $0x88] sm:$0xff] %v5818_v11  ;;  %v5820_v46 = vadd.f32 %v6728_v44, %v9650_v45 }
 0x31c   : > { %5851 = vst [vmem:[%s9658_s20 + $0x90] sm:$0xff] %v5819_v63 }
 0x31d   : > { %5852 = vst [vmem:[%s9658_s20 + $0x98] sm:$0xff] %v5820_v46  ;;  %v5728_v52 = vpop.f32.mrb[52].mxu0 }
 0x31e   : > { %v6731_v23 = vadd.f32 %v6730_v25, %v5728_v52  ;;  %v5730_v43 = vpop.f32.mrb[53].mxu0 }
 0x31f   : > { %v6734_v7 = vadd.f32 %v6733_v3, %v5730_v43  ;;  %v5732_v29 = vpop.f32.mrb[54].mxu0 }
 0x320   : > { %v5821_v58 = vadd.f32 %v6731_v23, %v9648_v2  ;;  %v6737_v47 = vadd.f32 %v6736_v12, %v5732_v29  ;;  %v5734_v16 = vpop.f32.mrb[55].mxu0 }
 0x321   : > { %v5822_v48 = vadd.f32 %v6734_v7, %v9650_v45  ;;  %v6740_v31 = vadd.f32 %v6739_v27, %v5734_v16 }
 0x322   : > { %5853 = vst [vmem:[%s9658_s20 + $0xa0] sm:$0xff] %v5821_v58  ;;  %v5823_v14 = vadd.f32 %v6737_v47, %v9648_v2 }
 0x323   : > { %5854 = vst [vmem:[%s9658_s20 + $0xa8] sm:$0xff] %v5822_v48  ;;  %v5824_v5 = vadd.f32 %v6740_v31, %v9650_v45 }
 0x324   : > { %5855 = vst [vmem:[%s9658_s20 + $0xb0] sm:$0xff] %v5823_v14  ;;  %v4147_v10 = vpop.f32.mrb[56].mxu1 }
 0x325   : > { %5856 = vst [vmem:[%s9658_s20 + $0xb8] sm:$0xff] %v5824_v5  ;;  %v5738_v13 = vpop.f32.mrb[56].mxu0  ;;  %v6742_v15 = vadd.f32 %v9611_v41, %v4147_v10  ;;  %v4149_v32 = vpop.f32.mrb[57].mxu1 }
 0x326   : > { %v5740_v35 = vpop.f32.mrb[57].mxu0  ;;  %v6745_v0 = vadd.f32 %v9616_v50, %v4149_v32  ;;  %v4151_v8 = vpop.f32.mrb[58].mxu1 }
 0x327   : > { %v5742_v20 = vpop.f32.mrb[58].mxu0  ;;  %v6743_v61 = vadd.f32 %v6742_v15, %v5738_v13  ;;  %v6748_v54 = vadd.f32 %v9619_v17, %v4151_v8  ;;  %v4153_v37 = vpop.f32.mrb[59].mxu1 }
 0x328   : > { %v5744_v40 = vpop.f32.mrb[59].mxu0  ;;  %v6746_v25 = vadd.f32 %v6745_v0, %v5740_v35  ;;  %v6751_v39 = vadd.f32 %v9622_v49, %v4153_v37 }
 0x329   : > { %v5825_v41 = vadd.f32 %v6743_v61, %v9648_v2  ;;  %v6749_v30 = vadd.f32 %v6748_v54, %v5742_v20 }
 0x32a   : > { %v5826_v62 = vadd.f32 %v6746_v25, %v9650_v45  ;;  %v6752_v3 = vadd.f32 %v6751_v39, %v5744_v40 }
 0x32b   : > { %5857 = vst [vmem:[%s9658_s20 + $0xc0] sm:$0xff] %v5825_v41  ;;  %v5827_v50 = vadd.f32 %v6749_v30, %v9648_v2 }
 0x32c   : > { %5858 = vst [vmem:[%s9658_s20 + $0xc8] sm:$0xff] %v5826_v62  ;;  %v5828_v18 = vadd.f32 %v6752_v3, %v9650_v45  ;;  %v4157_v26 = vpop.f32.mrb[60].mxu1 }
 0x32d   : > { %v5748_v17 = vpop.f32.mrb[60].mxu0  ;;  %5859 = vst [vmem:[%s9658_s20 + $0xd0] sm:$0xff] %v5827_v50  ;;  %v6754_v51 = vadd.f32 %v9626_v42, %v4157_v26  ;;  %v4159_v49 = vpop.f32.mrb[61].mxu1 }
 0x32e   : > { %v5750_v56 = vpop.f32.mrb[61].mxu0  ;;  %5860 = vst [vmem:[%s9658_s20 + $0xd8] sm:$0xff] %v5828_v18  ;;  %v6757_v12 = vadd.f32 %v9629_v53, %v4159_v49  ;;  %v4161_v22 = vpop.f32.mrb[62].mxu1 }
 0x32f   : > { %v5752_v4 = vpop.f32.mrb[62].mxu0  ;;  %v6755_v24 = vadd.f32 %v6754_v51, %v5748_v17  ;;  %v6760_v9 = vadd.f32 %v9632_v34, %v4161_v22  ;;  %v4163_v27 = vpop.f32.mrb[63].mxu1 }
 0x330   : > { %v5754_v19 = vpop.f32.mrb[63].mxu0  ;;  %v6758_v21 = vadd.f32 %v6757_v12, %v5750_v56  ;;  %v6763_v42 = vadd.f32 %v9635_v1, %v4163_v27 }
 0x331   : > { %v5829_v28 = vadd.f32 %v6755_v24, %v9648_v2  ;;  %v6761_v53 = vadd.f32 %v6760_v9, %v5752_v4 }
 0x332   : > { %v5830_v38 = vadd.f32 %v6758_v21, %v9650_v45  ;;  %v6764_v33 = vadd.f32 %v6763_v42, %v5754_v19 }
 0x333   : > { %5861 = vst [vmem:[%s9658_s20 + $0xe0] sm:$0xff] %v5829_v28  ;;  %v5831_v34 = vadd.f32 %v6761_v53, %v9648_v2 }
 0x334   : > { %5862 = vst [vmem:[%s9658_s20 + $0xe8] sm:$0xff] %v5830_v38  ;;  %v5832_v1 = vadd.f32 %v6764_v33, %v9650_v45 }
 0x335   : > { %5863 = vst [vmem:[%s9658_s20 + $0xf0] sm:$0xff] %v5831_v34 }
 0x336   : > { %5864 = vst [vmem:[%s9658_s20 + $0xf8] sm:$0xff] %v5832_v1 }
 0x337   : > { %8090 = shalt.err (!%p8087_p11)
}
 0x338   : > { %s8091_s9 = scalar_lea.hbm %s9743_s5, 4096  ;;  %s8095_s29 = scalar_lea.hbm %s9797_s3, 8192 }
 0x339   : > { %p8092_p13 = scmp.ne.s32.totalorder %s9743_s5, %s8091_s9  ;;  %p8096_p6 = scmp.lt.u32.totalorder %s9743_s5, %s9797_s3 }
 0x33a   : > { %p8097_p9 = scmp.lt.u32.totalorder %s8095_s29, %s8091_s9  ;;  %p8099_p10 = scmp.lt.u32.totalorder %s8091_s9, %s9743_s5 }
 0x33b   : > { %p8093_p5 = pnand %p8092_p13, %p10197_p1 }
 0x33c   : > { %p8098_p12 = por %p8097_p9, %p8096_p6 }
 0x33d   : > { %p8094_p0 = pneg %p8093_p5 }
 0x33e   : > { %p8100_p2 = por %p8099_p10, %p8098_p12 }
 0x340   : > { %p8101_p3 = pnand %p8100_p2, %p8094_p0 }
 0x342   : > { %8104 = shalt.err (!%p8101_p3)
}
 0x343   : > { %s8155_s17 = smov 256   ;;  %s8156_s19 = smov 16  }
 0x344   : > { %7126 = dma.vmem_to_hbm [thread:$0]  (%p10197_p1), %s9745_s28, 4096, %s9743_s5, %s9753_s16, %s8155_s17, %s8155_s17, %s8156_s19  }
 0x345 PF: > { %p7143_p4 = scmp.ge.s32.totalorder %s8147_s15, 2  ;;  %s5895_s20 = sand.u32 1, %s8135_s12  }
 0x346   : > { %p10198_p7 = scmp.ne.s32.totalorder %s9911_s23, 0  ;;  %s5896_s25 = scalar_lea.sflag [#allocation4], %s5895_s20 }
 0x348   : > { %p7136_p8 = pnand %p7143_p4, %p10198_p7 }
 0x34a   : > { %8130 = dma.done.wait (!%p7136_p8), %s5896_s25, 4096  }
 0x34b   : > { %8132 = vsyncadd (!%p7136_p8), %s5896_s25, 4294963200  ;;  %p15_p11 = scmp.ge.s32.totalorder %s8202_s18, 4   ;;  %s10199_s12 = smov %s8139_s13 }
 0x34c   : > { %s10200_s13 = smov %s8143_s14  ;;  %s10201_s14 = smov %s8213_s21 }
 0x34d   : > { %s10202_s15 = smov %s8202_s18  ;;  %17 = sbr.rel (!%p15_p11) target bundleno = 5 (0x5), region = 78 }
 0x354   :  { %5901 = vsyncpa [#allocation3], 1 }
 0x355   :  { %5903 = vsyncpa [#allocation3 + $0x1], 1 }
 0x356   :  { %5904 = vsyncpa [#allocation6], 1 }
 0x357   :  { %5905 = vsyncpa [#allocation4], 1 }
 0x358   :  { %5907 = vsyncpa [#allocation4 + $0x1], 1 }

</bundles_post_ra>
